<compile_context>
chip_gen: v7x
topology: tpu7x:2x2x1
jax: 0.10.0
libtpu: 0.0.40
codegen_flags: <defaults>
</compile_context>

<pallas_src>
import jax
import jax.numpy as jnp
from jax.experimental import pallas as pl
from jax.experimental.pallas import tpu as pltpu

PAD = 1
_LC = 8   # L-chunk (sublane) size for the one-hot count loop


def _round_up(x, m):
    return ((x + m - 1) // m) * m


def _base_trans_kernel(ast1_ref, ast2_ref, emb_ref, w1_ref, b1_ref,
                       w2t_ref, b2_ref, out_ref, sum_acc, cnt_acc):
    # grid = (batch tile i, vocab chunk j, L tile k); j and k are reductions.
    j = pl.program_id(1)
    k = pl.program_id(2)
    nj = pl.num_programs(1)
    nk = pl.num_programs(2)

    lt, bt = ast1_ref.shape            # ids come in (L, B)-transposed
    v_chunk, _ = emb_ref.shape
    v_base = j * v_chunk

    @pl.when((j == 0) & (k == 0))
    def _():
        sum_acc[...] = jnp.zeros_like(sum_acc)
        cnt_acc[...] = jnp.zeros_like(cnt_acc)

    # ---- per-tile token counts restricted to this vocab chunk -------------
    # counts[b, v] = #{ l in tile : ids[l, b] == v_base + v }
    # The L axis is processed in _LC-row chunks so the live one-hot stays at
    # (_LC, bt, v_chunk); static trip count -> fully unrolled at trace time.
    iota_v = jax.lax.broadcasted_iota(jnp.int32, (_LC, bt, v_chunk), 2) + v_base

    def tile_counts(ids_ref):
        acc = jnp.zeros((bt, v_chunk), jnp.float32)
        for c in range(lt // _LC):
            ids_c = ids_ref[pl.ds(c * _LC, _LC), :]                  # (LC, bt)
            oh = (ids_c[:, :, None] == iota_v).astype(jnp.float32)   # (LC,bt,vc)
            acc = acc + jnp.sum(oh, axis=0)                          # (bt, vc)
        return acc

    c1 = tile_counts(ast1_ref)
    c2 = tile_counts(ast2_ref)

    # ---- pooled sums via one stacked MXU matmul ----------------------------
    # Masked sum of embedding rows == counts @ emb_chunk (the PAD row of the
    # table is zeroed in the wrapper, so no mask in the hot loop).  Counts are
    # small integers (<= l_tile <= 256), exact in bf16.
    c12 = jnp.concatenate([c1, c2], axis=0).astype(jnp.bfloat16)     # (2bt, vc)
    sum_acc[...] += jnp.dot(c12, emb_ref[...],
                            preferred_element_type=jnp.float32)      # (2bt, Hp)

    # ---- valid-token counts (mean-pool denominator) ------------------------
    # tokens that fell in this chunk, minus PAD (PAD==1 always lives in chunk 0)
    s1 = jnp.sum(c1, axis=-1, keepdims=True)                         # (bt, 1)
    s2 = jnp.sum(c2, axis=-1, keepdims=True)
    pad1 = jnp.where(j == 0, c1[:, PAD:PAD + 1], 0.0)
    pad2 = jnp.where(j == 0, c2[:, PAD:PAD + 1], 0.0)
    cnt_acc[:bt, :] += s1 - pad1
    cnt_acc[bt:, :] += s2 - pad2

    # ---- finalize -----------------------------------------------------------
    @pl.when((j == nj - 1) & (k == nk - 1))
    def _():
        denom = jnp.maximum(cnt_acc[...], 1.0)                       # all-PAD guard
        pooled = sum_acc[...] / denom                                # exact divide
        o1 = pooled[:bt, :]
        o2 = pooled[bt:, :]
        abs_dist = jnp.abs(o1 - o2)                                  # (bt, Hp)

        # ClassificationHead: dropout(identity) -> dense -> tanh -> out_proj
        h = jnp.tanh(jnp.dot(abs_dist.astype(jnp.bfloat16), w1_ref[...],
                             preferred_element_type=jnp.float32)
                     + b1_ref[...])                                  # (bt, 512)

        # softmax over 2 classes == [sigmoid(l0 - l1), 1 - sigmoid(l0 - l1)]
        w2t = w2t_ref[...]                                           # (2, 512)
        b2 = b2_ref[...]                                             # (1, 2)
        w_diff = w2t[0:1, :] - w2t[1:2, :]                           # (1, 512)
        b_diff = b2[:, 0:1] - b2[:, 1:2]                             # (1, 1)
        d = jnp.sum(h * w_diff, axis=-1, keepdims=True) + b_diff     # (bt, 1)
        p0 = 1.0 / (1.0 + jnp.exp(-d))                               # exact sigmoid
        lane = jax.lax.broadcasted_iota(jnp.int32, (bt, 2), 1)
        out_ref[...] = jnp.where(lane == 0, p0, 1.0 - p0)            # (bt, 2)


def base_trans_forward(ast1, ast2, params):
    """Full BaseTrans.forward: embedding mean-pool, |o1-o2|, classifier, softmax."""
    emb_table = params["embedding"].astype(jnp.float32)              # (V, H)
    w1 = params["w_dense"].astype(jnp.float32)                       # (H, D)
    b1 = params["b_dense"].astype(jnp.float32)                       # (1, D)
    w2t = params["w_out"].astype(jnp.float32).T                      # (2, D)
    b2 = params["b_out"].astype(jnp.float32)                         # (1, 2)

    B, L = ast1.shape
    V, H = emb_table.shape
    D = w1.shape[1]

    # Tile sizes (footprint independent of V; fits all of v5e/v6e/v7x VMEM).
    b_tile = min(64, _round_up(B, 8))       # >=2 'parallel' blocks once B>=128
    b_pad = _round_up(B, b_tile)
    l_tile = min(256, _round_up(L, 128))    # <=256 keeps counts exact in bf16
    l_pad = _round_up(L, l_tile)
    v_chunk = min(512, _round_up(V, 128))   # vocab streamed in chunks
    v_pad = _round_up(V, v_chunk)
    h_pad = _round_up(H, 128)               # lane-dense / MXU-aligned features

    # Ids padded with PAD and transposed to (L, B): L on sublanes makes the
    # in-kernel chunked one-hot + reduction sublane-friendly (no XLU).
    def prep_ids(a):
        return jnp.full((l_pad, b_pad), PAD, jnp.int32).at[:L, :B].set(
            a.astype(jnp.int32).T)

    ast1_t = prep_ids(ast1)
    ast2_t = prep_ids(ast2)

    # bf16 table with the PAD row zeroed (replaces the in-kernel mask) and
    # zero padding to (v_pad, h_pad).
    emb_p = jnp.zeros((v_pad, h_pad), jnp.float32).at[:V, :H].set(emb_table)
    emb_p = emb_p.at[PAD, :].set(0.0).astype(jnp.bfloat16)

    w1_p = jnp.zeros((h_pad, D), jnp.float32).at[:H, :].set(w1).astype(jnp.bfloat16)

    grid = (b_pad // b_tile, v_pad // v_chunk, l_pad // l_tile)
    const = lambda i, j, k: (0, 0)          # resident params: no per-step re-DMA

    out = pl.pallas_call(
        _base_trans_kernel,
        out_shape=jax.ShapeDtypeStruct((b_pad, 2), jnp.float32),
        grid_spec=pltpu.PrefetchScalarGridSpec(
            num_scalar_prefetch=0,
            grid=grid,
            in_specs=[
                pl.BlockSpec((l_tile, b_tile), lambda i, j, k: (k, i)),   # ast1^T
                pl.BlockSpec((l_tile, b_tile), lambda i, j, k: (k, i)),   # ast2^T
                pl.BlockSpec((v_chunk, h_pad), lambda i, j, k: (j, 0)),   # emb chunk
                pl.BlockSpec((h_pad, D), const),                          # w_dense
                pl.BlockSpec((1, D), const),                              # b_dense
                pl.BlockSpec((2, D), const),                              # w_out.T
                pl.BlockSpec((1, 2), const),                              # b_out
            ],
            out_specs=pl.BlockSpec((b_tile, 2), lambda i, j, k: (i, 0)),
            scratch_shapes=[pltpu.VMEM((2 * b_tile, h_pad), jnp.float32),  # pooled sums
                            pltpu.VMEM((2 * b_tile, 1), jnp.float32)],     # token counts
        ),
        compiler_params=pltpu.CompilerParams(
            dimension_semantics=("parallel", "arbitrary", "arbitrary"),
        ),
    )(ast1_t, ast2_t, emb_p, w1_p, b1, w2t, b2)

    return out[:B]


def base_trans_reference(ast1, ast2, params):
    """Pure-JAX reference of the same forward pass (correctness check)."""
    emb_table = params["embedding"]

    def pool(ast):
        emb = jnp.take(emb_table, ast, axis=0)
        mask = (ast != PAD).astype(jnp.float32)
        s = jnp.sum(emb * mask[:, :, None], axis=1)
        c = jnp.maximum(jnp.sum(mask, axis=1, keepdims=True), 1.0)
        return s / c

    abs_dist = jnp.abs(pool(ast1) - pool(ast2))
    h = jnp.tanh(abs_dist @ params["w_dense"] + params["b_dense"])
    logits = h @ params["w_out"] + params["b_out"]
    return jax.nn.softmax(logits, axis=-1)


def init_params(key, vocab_size, hidden_size):
    k_emb, k_w1, k_b1, k_w2, k_b2 = jax.random.split(key, 5)
    return {
        # src_embedding table (synthetic, deterministic)
        "embedding": jax.random.normal(k_emb, (vocab_size, hidden_size),
                                       jnp.float32) * 0.1,
        # ClassificationHead.dense: Linear(hidden_size, 512)
        "w_dense": jax.random.normal(k_w1, (hidden_size, 512), jnp.float32) * 0.05,
        "b_dense": jax.random.normal(k_b1, (1, 512), jnp.float32) * 0.01,
        # ClassificationHead.out_proj: Linear(512, 2)
        "w_out": jax.random.normal(k_w2, (512, 2), jnp.float32) * 0.05,
        "b_out": jax.random.normal(k_b2, (1, 2), jnp.float32) * 0.01,
    }


if __name__ == "__main__":
    B, L, H, V = 2, 8, 32, 50

    key = jax.random.PRNGKey(0)
    k_params, k_a1, k_a2 = jax.random.split(key, 3)

    params = init_params(k_params, V, H)

    # Token ids in [2, V); pad the tail of each sequence with PAD (=1).
    ast1 = jax.random.randint(k_a1, (B, L), 2, V, dtype=jnp.int32)
    ast2 = jax.random.randint(k_a2, (B, L), 2, V, dtype=jnp.int32)
    ast1 = ast1.at[:, -2:].set(PAD)
    ast2 = ast2.at[:, -3:].set(PAD)

    prob = base_trans_forward(ast1, ast2, params)
    jax.block_until_ready(prob)

    assert prob.shape == (B, 2)
    assert bool(jnp.all(jnp.isfinite(prob)))
    assert bool(jnp.allclose(jnp.sum(prob, axis=-1), 1.0, atol=1e-5))

    ref = base_trans_reference(ast1, ast2, params)
    assert bool(jnp.allclose(prob, ref, atol=2e-2))

    print("KERNEL_OK")
</pallas_src>

<mosaic_0001>
module attributes {stable_mosaic.version = 11 : i64} {
  func.func @_base_trans_kernel(%arg0: i32, %arg1: i32, %arg2: i32, %arg3: memref<128x8xi32, #tpu.memory_space<vmem>>, %arg4: memref<128x8xi32, #tpu.memory_space<vmem>>, %arg5: memref<128x128xbf16, #tpu.memory_space<vmem>>, %arg6: memref<128x512xbf16, #tpu.memory_space<vmem>>, %arg7: memref<1x512xf32, #tpu.memory_space<vmem>>, %arg8: memref<2x512xf32, #tpu.memory_space<vmem>>, %arg9: memref<1x2xf32, #tpu.memory_space<vmem>>, %arg10: memref<8x2xf32, #tpu.memory_space<vmem>>, %arg11: memref<16x128xf32, #tpu.memory_space<vmem>>, %arg12: memref<16x1xf32, #tpu.memory_space<vmem>>) attributes {dimension_semantics = [#tpu.dimension_semantics<parallel>, #tpu.dimension_semantics<arbitrary>, #tpu.dimension_semantics<arbitrary>], iteration_bounds = array<i64: 1, 1, 1>, scalar_prefetch = 0 : i64, scratch_operands = 2 : i64, tpu.core_type = #tpu.core_type<tc>, window_params = [{transform_indices = @transform_0, window_bounds = array<i64: 128, 8>}, {transform_indices = @transform_1, window_bounds = array<i64: 128, 8>}, {transform_indices = @transform_2, window_bounds = array<i64: 128, 128>}, {pipeline_mode = #tpu.pipeline_mode<synchronous>, transform_indices = @transform_3, window_bounds = array<i64: 128, 512>}, {pipeline_mode = #tpu.pipeline_mode<synchronous>, transform_indices = @transform_4, window_bounds = array<i64: 1, 512>}, {pipeline_mode = #tpu.pipeline_mode<synchronous>, transform_indices = @transform_5, window_bounds = array<i64: 2, 512>}, {pipeline_mode = #tpu.pipeline_mode<synchronous>, transform_indices = @transform_6, window_bounds = array<i64: 1, 2>}, {transform_indices = @transform_7, window_bounds = array<i64: 8, 2>}]} {
    %c128_i32 = arith.constant 128 : i32
    %0 = arith.muli %arg1, %c128_i32 : i32
    %c0_i32 = arith.constant 0 : i32
    %1 = arith.cmpi eq, %arg1, %c0_i32 : i32
    %c0_i32_0 = arith.constant 0 : i32
    %2 = arith.cmpi eq, %arg2, %c0_i32_0 : i32
    %3 = arith.andi %1, %2 : i1
    %4 = arith.extui %3 : i1 to i32
    %c0_i32_1 = arith.constant 0 : i32
    %5 = arith.cmpi ne, %4, %c0_i32_1 : i32
    scf.if %5 {
      %cst_107 = arith.constant 0.000000e+00 : f32
      %299 = vector.broadcast %cst_107 : f32 to vector<16x128xf32>
      %c0_108 = arith.constant 0 : index
      %c0_109 = arith.constant 0 : index
      %300 = vector.load %arg11[%c0_108, %c0_109] : memref<16x128xf32, #tpu.memory_space<vmem>>, vector<16x128xf32>
      tpu.vector_store %arg11[%c0_108, %c0_109], %299 {strides = array<i32>} : memref<16x128xf32, #tpu.memory_space<vmem>>, vector<16x128xf32>,
      %cst_110 = arith.constant 0.000000e+00 : f32
      %301 = vector.broadcast %cst_110 : f32 to vector<16x1xf32>
      %c0_111 = arith.constant 0 : index
      %c0_112 = arith.constant 0 : index
      %302 = vector.load %arg12[%c0_111, %c0_112] : memref<16x1xf32, #tpu.memory_space<vmem>>, vector<16x1xf32>
      tpu.vector_store %arg12[%c0_111, %c0_112], %301 {strides = array<i32>} : memref<16x1xf32, #tpu.memory_space<vmem>>, vector<16x1xf32>,
    } else {
    }
    %6 = tpu.iota {dimensions = array<i32: 2>} : vector<8x8x128xi32>
    %7 = vector.broadcast %0 : i32 to vector<8x8x128xi32>
    %8 = arith.addi %6, %7 : vector<8x8x128xi32>
    %cst = arith.constant 0.000000e+00 : f32
    %9 = vector.broadcast %cst : f32 to vector<8x128xf32>
    %c0 = arith.constant 0 : index
    %c0_2 = arith.constant 0 : index
    %10 = vector.load %arg3[%c0, %c0_2] : memref<128x8xi32, #tpu.memory_space<vmem>>, vector<8x8xi32>
    %11 = vector.shape_cast %10 : vector<8x8xi32> to vector<8x8x1xi32>
    %12 = vector.broadcast %11 : vector<8x8x1xi32> to vector<8x8x128xi32>
    %13 = arith.cmpi eq, %12, %8 : vector<8x8x128xi32>
    %14 = arith.extui %13 : vector<8x8x128xi1> to vector<8x8x128xi32>
    %15 = arith.sitofp %14 : vector<8x8x128xi32> to vector<8x8x128xf32>
    %cst_3 = arith.constant dense<0.000000e+00> : vector<8x128xf32>
    %16 = vector.multi_reduction <add>, %15, %cst_3 [0] : vector<8x8x128xf32> to vector<8x128xf32>
    %17 = arith.addf %9, %16 : vector<8x128xf32>
    %c8 = arith.constant 8 : index
    %c0_4 = arith.constant 0 : index
    %18 = vector.load %arg3[%c8, %c0_4] : memref<128x8xi32, #tpu.memory_space<vmem>>, vector<8x8xi32>
    %19 = vector.shape_cast %18 : vector<8x8xi32> to vector<8x8x1xi32>
    %20 = vector.broadcast %19 : vector<8x8x1xi32> to vector<8x8x128xi32>
    %21 = arith.cmpi eq, %20, %8 : vector<8x8x128xi32>
    %22 = arith.extui %21 : vector<8x8x128xi1> to vector<8x8x128xi32>
    %23 = arith.sitofp %22 : vector<8x8x128xi32> to vector<8x8x128xf32>
    %cst_5 = arith.constant dense<0.000000e+00> : vector<8x128xf32>
    %24 = vector.multi_reduction <add>, %23, %cst_5 [0] : vector<8x8x128xf32> to vector<8x128xf32>
    %25 = arith.addf %17, %24 : vector<8x128xf32>
    %c16 = arith.constant 16 : index
    %c0_6 = arith.constant 0 : index
    %26 = vector.load %arg3[%c16, %c0_6] : memref<128x8xi32, #tpu.memory_space<vmem>>, vector<8x8xi32>
    %27 = vector.shape_cast %26 : vector<8x8xi32> to vector<8x8x1xi32>
    %28 = vector.broadcast %27 : vector<8x8x1xi32> to vector<8x8x128xi32>
    %29 = arith.cmpi eq, %28, %8 : vector<8x8x128xi32>
    %30 = arith.extui %29 : vector<8x8x128xi1> to vector<8x8x128xi32>
    %31 = arith.sitofp %30 : vector<8x8x128xi32> to vector<8x8x128xf32>
    %cst_7 = arith.constant dense<0.000000e+00> : vector<8x128xf32>
    %32 = vector.multi_reduction <add>, %31, %cst_7 [0] : vector<8x8x128xf32> to vector<8x128xf32>
    %33 = arith.addf %25, %32 : vector<8x128xf32>
    %c24 = arith.constant 24 : index
    %c0_8 = arith.constant 0 : index
    %34 = vector.load %arg3[%c24, %c0_8] : memref<128x8xi32, #tpu.memory_space<vmem>>, vector<8x8xi32>
    %35 = vector.shape_cast %34 : vector<8x8xi32> to vector<8x8x1xi32>
    %36 = vector.broadcast %35 : vector<8x8x1xi32> to vector<8x8x128xi32>
    %37 = arith.cmpi eq, %36, %8 : vector<8x8x128xi32>
    %38 = arith.extui %37 : vector<8x8x128xi1> to vector<8x8x128xi32>
    %39 = arith.sitofp %38 : vector<8x8x128xi32> to vector<8x8x128xf32>
    %cst_9 = arith.constant dense<0.000000e+00> : vector<8x128xf32>
    %40 = vector.multi_reduction <add>, %39, %cst_9 [0] : vector<8x8x128xf32> to vector<8x128xf32>
    %41 = arith.addf %33, %40 : vector<8x128xf32>
    %c32 = arith.constant 32 : index
    %c0_10 = arith.constant 0 : index
    %42 = vector.load %arg3[%c32, %c0_10] : memref<128x8xi32, #tpu.memory_space<vmem>>, vector<8x8xi32>
    %43 = vector.shape_cast %42 : vector<8x8xi32> to vector<8x8x1xi32>
    %44 = vector.broadcast %43 : vector<8x8x1xi32> to vector<8x8x128xi32>
    %45 = arith.cmpi eq, %44, %8 : vector<8x8x128xi32>
    %46 = arith.extui %45 : vector<8x8x128xi1> to vector<8x8x128xi32>
    %47 = arith.sitofp %46 : vector<8x8x128xi32> to vector<8x8x128xf32>
    %cst_11 = arith.constant dense<0.000000e+00> : vector<8x128xf32>
    %48 = vector.multi_reduction <add>, %47, %cst_11 [0] : vector<8x8x128xf32> to vector<8x128xf32>
    %49 = arith.addf %41, %48 : vector<8x128xf32>
    %c40 = arith.constant 40 : index
    %c0_12 = arith.constant 0 : index
    %50 = vector.load %arg3[%c40, %c0_12] : memref<128x8xi32, #tpu.memory_space<vmem>>, vector<8x8xi32>
    %51 = vector.shape_cast %50 : vector<8x8xi32> to vector<8x8x1xi32>
    %52 = vector.broadcast %51 : vector<8x8x1xi32> to vector<8x8x128xi32>
    %53 = arith.cmpi eq, %52, %8 : vector<8x8x128xi32>
    %54 = arith.extui %53 : vector<8x8x128xi1> to vector<8x8x128xi32>
    %55 = arith.sitofp %54 : vector<8x8x128xi32> to vector<8x8x128xf32>
    %cst_13 = arith.constant dense<0.000000e+00> : vector<8x128xf32>
    %56 = vector.multi_reduction <add>, %55, %cst_13 [0] : vector<8x8x128xf32> to vector<8x128xf32>
    %57 = arith.addf %49, %56 : vector<8x128xf32>
    %c48 = arith.constant 48 : index
    %c0_14 = arith.constant 0 : index
    %58 = vector.load %arg3[%c48, %c0_14] : memref<128x8xi32, #tpu.memory_space<vmem>>, vector<8x8xi32>
    %59 = vector.shape_cast %58 : vector<8x8xi32> to vector<8x8x1xi32>
    %60 = vector.broadcast %59 : vector<8x8x1xi32> to vector<8x8x128xi32>
    %61 = arith.cmpi eq, %60, %8 : vector<8x8x128xi32>
    %62 = arith.extui %61 : vector<8x8x128xi1> to vector<8x8x128xi32>
    %63 = arith.sitofp %62 : vector<8x8x128xi32> to vector<8x8x128xf32>
    %cst_15 = arith.constant dense<0.000000e+00> : vector<8x128xf32>
    %64 = vector.multi_reduction <add>, %63, %cst_15 [0] : vector<8x8x128xf32> to vector<8x128xf32>
    %65 = arith.addf %57, %64 : vector<8x128xf32>
    %c56 = arith.constant 56 : index
    %c0_16 = arith.constant 0 : index
    %66 = vector.load %arg3[%c56, %c0_16] : memref<128x8xi32, #tpu.memory_space<vmem>>, vector<8x8xi32>
    %67 = vector.shape_cast %66 : vector<8x8xi32> to vector<8x8x1xi32>
    %68 = vector.broadcast %67 : vector<8x8x1xi32> to vector<8x8x128xi32>
    %69 = arith.cmpi eq, %68, %8 : vector<8x8x128xi32>
    %70 = arith.extui %69 : vector<8x8x128xi1> to vector<8x8x128xi32>
    %71 = arith.sitofp %70 : vector<8x8x128xi32> to vector<8x8x128xf32>
    %cst_17 = arith.constant dense<0.000000e+00> : vector<8x128xf32>
    %72 = vector.multi_reduction <add>, %71, %cst_17 [0] : vector<8x8x128xf32> to vector<8x128xf32>
    %73 = arith.addf %65, %72 : vector<8x128xf32>
    %c64 = arith.constant 64 : index
    %c0_18 = arith.constant 0 : index
    %74 = vector.load %arg3[%c64, %c0_18] : memref<128x8xi32, #tpu.memory_space<vmem>>, vector<8x8xi32>
    %75 = vector.shape_cast %74 : vector<8x8xi32> to vector<8x8x1xi32>
    %76 = vector.broadcast %75 : vector<8x8x1xi32> to vector<8x8x128xi32>
    %77 = arith.cmpi eq, %76, %8 : vector<8x8x128xi32>
    %78 = arith.extui %77 : vector<8x8x128xi1> to vector<8x8x128xi32>
    %79 = arith.sitofp %78 : vector<8x8x128xi32> to vector<8x8x128xf32>
    %cst_19 = arith.constant dense<0.000000e+00> : vector<8x128xf32>
    %80 = vector.multi_reduction <add>, %79, %cst_19 [0] : vector<8x8x128xf32> to vector<8x128xf32>
    %81 = arith.addf %73, %80 : vector<8x128xf32>
    %c72 = arith.constant 72 : index
    %c0_20 = arith.constant 0 : index
    %82 = vector.load %arg3[%c72, %c0_20] : memref<128x8xi32, #tpu.memory_space<vmem>>, vector<8x8xi32>
    %83 = vector.shape_cast %82 : vector<8x8xi32> to vector<8x8x1xi32>
    %84 = vector.broadcast %83 : vector<8x8x1xi32> to vector<8x8x128xi32>
    %85 = arith.cmpi eq, %84, %8 : vector<8x8x128xi32>
    %86 = arith.extui %85 : vector<8x8x128xi1> to vector<8x8x128xi32>
    %87 = arith.sitofp %86 : vector<8x8x128xi32> to vector<8x8x128xf32>
    %cst_21 = arith.constant dense<0.000000e+00> : vector<8x128xf32>
    %88 = vector.multi_reduction <add>, %87, %cst_21 [0] : vector<8x8x128xf32> to vector<8x128xf32>
    %89 = arith.addf %81, %88 : vector<8x128xf32>
    %c80 = arith.constant 80 : index
    %c0_22 = arith.constant 0 : index
    %90 = vector.load %arg3[%c80, %c0_22] : memref<128x8xi32, #tpu.memory_space<vmem>>, vector<8x8xi32>
    %91 = vector.shape_cast %90 : vector<8x8xi32> to vector<8x8x1xi32>
    %92 = vector.broadcast %91 : vector<8x8x1xi32> to vector<8x8x128xi32>
    %93 = arith.cmpi eq, %92, %8 : vector<8x8x128xi32>
    %94 = arith.extui %93 : vector<8x8x128xi1> to vector<8x8x128xi32>
    %95 = arith.sitofp %94 : vector<8x8x128xi32> to vector<8x8x128xf32>
    %cst_23 = arith.constant dense<0.000000e+00> : vector<8x128xf32>
    %96 = vector.multi_reduction <add>, %95, %cst_23 [0] : vector<8x8x128xf32> to vector<8x128xf32>
    %97 = arith.addf %89, %96 : vector<8x128xf32>
    %c88 = arith.constant 88 : index
    %c0_24 = arith.constant 0 : index
    %98 = vector.load %arg3[%c88, %c0_24] : memref<128x8xi32, #tpu.memory_space<vmem>>, vector<8x8xi32>
    %99 = vector.shape_cast %98 : vector<8x8xi32> to vector<8x8x1xi32>
    %100 = vector.broadcast %99 : vector<8x8x1xi32> to vector<8x8x128xi32>
    %101 = arith.cmpi eq, %100, %8 : vector<8x8x128xi32>
    %102 = arith.extui %101 : vector<8x8x128xi1> to vector<8x8x128xi32>
    %103 = arith.sitofp %102 : vector<8x8x128xi32> to vector<8x8x128xf32>
    %cst_25 = arith.constant dense<0.000000e+00> : vector<8x128xf32>
    %104 = vector.multi_reduction <add>, %103, %cst_25 [0] : vector<8x8x128xf32> to vector<8x128xf32>
    %105 = arith.addf %97, %104 : vector<8x128xf32>
    %c96 = arith.constant 96 : index
    %c0_26 = arith.constant 0 : index
    %106 = vector.load %arg3[%c96, %c0_26] : memref<128x8xi32, #tpu.memory_space<vmem>>, vector<8x8xi32>
    %107 = vector.shape_cast %106 : vector<8x8xi32> to vector<8x8x1xi32>
    %108 = vector.broadcast %107 : vector<8x8x1xi32> to vector<8x8x128xi32>
    %109 = arith.cmpi eq, %108, %8 : vector<8x8x128xi32>
    %110 = arith.extui %109 : vector<8x8x128xi1> to vector<8x8x128xi32>
    %111 = arith.sitofp %110 : vector<8x8x128xi32> to vector<8x8x128xf32>
    %cst_27 = arith.constant dense<0.000000e+00> : vector<8x128xf32>
    %112 = vector.multi_reduction <add>, %111, %cst_27 [0] : vector<8x8x128xf32> to vector<8x128xf32>
    %113 = arith.addf %105, %112 : vector<8x128xf32>
    %c104 = arith.constant 104 : index
    %c0_28 = arith.constant 0 : index
    %114 = vector.load %arg3[%c104, %c0_28] : memref<128x8xi32, #tpu.memory_space<vmem>>, vector<8x8xi32>
    %115 = vector.shape_cast %114 : vector<8x8xi32> to vector<8x8x1xi32>
    %116 = vector.broadcast %115 : vector<8x8x1xi32> to vector<8x8x128xi32>
    %117 = arith.cmpi eq, %116, %8 : vector<8x8x128xi32>
    %118 = arith.extui %117 : vector<8x8x128xi1> to vector<8x8x128xi32>
    %119 = arith.sitofp %118 : vector<8x8x128xi32> to vector<8x8x128xf32>
    %cst_29 = arith.constant dense<0.000000e+00> : vector<8x128xf32>
    %120 = vector.multi_reduction <add>, %119, %cst_29 [0] : vector<8x8x128xf32> to vector<8x128xf32>
    %121 = arith.addf %113, %120 : vector<8x128xf32>
    %c112 = arith.constant 112 : index
    %c0_30 = arith.constant 0 : index
    %122 = vector.load %arg3[%c112, %c0_30] : memref<128x8xi32, #tpu.memory_space<vmem>>, vector<8x8xi32>
    %123 = vector.shape_cast %122 : vector<8x8xi32> to vector<8x8x1xi32>
    %124 = vector.broadcast %123 : vector<8x8x1xi32> to vector<8x8x128xi32>
    %125 = arith.cmpi eq, %124, %8 : vector<8x8x128xi32>
    %126 = arith.extui %125 : vector<8x8x128xi1> to vector<8x8x128xi32>
    %127 = arith.sitofp %126 : vector<8x8x128xi32> to vector<8x8x128xf32>
    %cst_31 = arith.constant dense<0.000000e+00> : vector<8x128xf32>
    %128 = vector.multi_reduction <add>, %127, %cst_31 [0] : vector<8x8x128xf32> to vector<8x128xf32>
    %129 = arith.addf %121, %128 : vector<8x128xf32>
    %c120 = arith.constant 120 : index
    %c0_32 = arith.constant 0 : index
    %130 = vector.load %arg3[%c120, %c0_32] : memref<128x8xi32, #tpu.memory_space<vmem>>, vector<8x8xi32>
    %131 = vector.shape_cast %130 : vector<8x8xi32> to vector<8x8x1xi32>
    %132 = vector.broadcast %131 : vector<8x8x1xi32> to vector<8x8x128xi32>
    %133 = arith.cmpi eq, %132, %8 : vector<8x8x128xi32>
    %134 = arith.extui %133 : vector<8x8x128xi1> to vector<8x8x128xi32>
    %135 = arith.sitofp %134 : vector<8x8x128xi32> to vector<8x8x128xf32>
    %cst_33 = arith.constant dense<0.000000e+00> : vector<8x128xf32>
    %136 = vector.multi_reduction <add>, %135, %cst_33 [0] : vector<8x8x128xf32> to vector<8x128xf32>
    %137 = arith.addf %129, %136 : vector<8x128xf32>
    %cst_34 = arith.constant 0.000000e+00 : f32
    %138 = vector.broadcast %cst_34 : f32 to vector<8x128xf32>
    %c0_35 = arith.constant 0 : index
    %c0_36 = arith.constant 0 : index
    %139 = vector.load %arg4[%c0_35, %c0_36] : memref<128x8xi32, #tpu.memory_space<vmem>>, vector<8x8xi32>
    %140 = vector.shape_cast %139 : vector<8x8xi32> to vector<8x8x1xi32>
    %141 = vector.broadcast %140 : vector<8x8x1xi32> to vector<8x8x128xi32>
    %142 = arith.cmpi eq, %141, %8 : vector<8x8x128xi32>
    %143 = arith.extui %142 : vector<8x8x128xi1> to vector<8x8x128xi32>
    %144 = arith.sitofp %143 : vector<8x8x128xi32> to vector<8x8x128xf32>
    %cst_37 = arith.constant dense<0.000000e+00> : vector<8x128xf32>
    %145 = vector.multi_reduction <add>, %144, %cst_37 [0] : vector<8x8x128xf32> to vector<8x128xf32>
    %146 = arith.addf %138, %145 : vector<8x128xf32>
    %c8_38 = arith.constant 8 : index
    %c0_39 = arith.constant 0 : index
    %147 = vector.load %arg4[%c8_38, %c0_39] : memref<128x8xi32, #tpu.memory_space<vmem>>, vector<8x8xi32>
    %148 = vector.shape_cast %147 : vector<8x8xi32> to vector<8x8x1xi32>
    %149 = vector.broadcast %148 : vector<8x8x1xi32> to vector<8x8x128xi32>
    %150 = arith.cmpi eq, %149, %8 : vector<8x8x128xi32>
    %151 = arith.extui %150 : vector<8x8x128xi1> to vector<8x8x128xi32>
    %152 = arith.sitofp %151 : vector<8x8x128xi32> to vector<8x8x128xf32>
    %cst_40 = arith.constant dense<0.000000e+00> : vector<8x128xf32>
    %153 = vector.multi_reduction <add>, %152, %cst_40 [0] : vector<8x8x128xf32> to vector<8x128xf32>
    %154 = arith.addf %146, %153 : vector<8x128xf32>
    %c16_41 = arith.constant 16 : index
    %c0_42 = arith.constant 0 : index
    %155 = vector.load %arg4[%c16_41, %c0_42] : memref<128x8xi32, #tpu.memory_space<vmem>>, vector<8x8xi32>
    %156 = vector.shape_cast %155 : vector<8x8xi32> to vector<8x8x1xi32>
    %157 = vector.broadcast %156 : vector<8x8x1xi32> to vector<8x8x128xi32>
    %158 = arith.cmpi eq, %157, %8 : vector<8x8x128xi32>
    %159 = arith.extui %158 : vector<8x8x128xi1> to vector<8x8x128xi32>
    %160 = arith.sitofp %159 : vector<8x8x128xi32> to vector<8x8x128xf32>
    %cst_43 = arith.constant dense<0.000000e+00> : vector<8x128xf32>
    %161 = vector.multi_reduction <add>, %160, %cst_43 [0] : vector<8x8x128xf32> to vector<8x128xf32>
    %162 = arith.addf %154, %161 : vector<8x128xf32>
    %c24_44 = arith.constant 24 : index
    %c0_45 = arith.constant 0 : index
    %163 = vector.load %arg4[%c24_44, %c0_45] : memref<128x8xi32, #tpu.memory_space<vmem>>, vector<8x8xi32>
    %164 = vector.shape_cast %163 : vector<8x8xi32> to vector<8x8x1xi32>
    %165 = vector.broadcast %164 : vector<8x8x1xi32> to vector<8x8x128xi32>
    %166 = arith.cmpi eq, %165, %8 : vector<8x8x128xi32>
    %167 = arith.extui %166 : vector<8x8x128xi1> to vector<8x8x128xi32>
    %168 = arith.sitofp %167 : vector<8x8x128xi32> to vector<8x8x128xf32>
    %cst_46 = arith.constant dense<0.000000e+00> : vector<8x128xf32>
    %169 = vector.multi_reduction <add>, %168, %cst_46 [0] : vector<8x8x128xf32> to vector<8x128xf32>
    %170 = arith.addf %162, %169 : vector<8x128xf32>
    %c32_47 = arith.constant 32 : index
    %c0_48 = arith.constant 0 : index
    %171 = vector.load %arg4[%c32_47, %c0_48] : memref<128x8xi32, #tpu.memory_space<vmem>>, vector<8x8xi32>
    %172 = vector.shape_cast %171 : vector<8x8xi32> to vector<8x8x1xi32>
    %173 = vector.broadcast %172 : vector<8x8x1xi32> to vector<8x8x128xi32>
    %174 = arith.cmpi eq, %173, %8 : vector<8x8x128xi32>
    %175 = arith.extui %174 : vector<8x8x128xi1> to vector<8x8x128xi32>
    %176 = arith.sitofp %175 : vector<8x8x128xi32> to vector<8x8x128xf32>
    %cst_49 = arith.constant dense<0.000000e+00> : vector<8x128xf32>
    %177 = vector.multi_reduction <add>, %176, %cst_49 [0] : vector<8x8x128xf32> to vector<8x128xf32>
    %178 = arith.addf %170, %177 : vector<8x128xf32>
    %c40_50 = arith.constant 40 : index
    %c0_51 = arith.constant 0 : index
    %179 = vector.load %arg4[%c40_50, %c0_51] : memref<128x8xi32, #tpu.memory_space<vmem>>, vector<8x8xi32>
    %180 = vector.shape_cast %179 : vector<8x8xi32> to vector<8x8x1xi32>
    %181 = vector.broadcast %180 : vector<8x8x1xi32> to vector<8x8x128xi32>
    %182 = arith.cmpi eq, %181, %8 : vector<8x8x128xi32>
    %183 = arith.extui %182 : vector<8x8x128xi1> to vector<8x8x128xi32>
    %184 = arith.sitofp %183 : vector<8x8x128xi32> to vector<8x8x128xf32>
    %cst_52 = arith.constant dense<0.000000e+00> : vector<8x128xf32>
    %185 = vector.multi_reduction <add>, %184, %cst_52 [0] : vector<8x8x128xf32> to vector<8x128xf32>
    %186 = arith.addf %178, %185 : vector<8x128xf32>
    %c48_53 = arith.constant 48 : index
    %c0_54 = arith.constant 0 : index
    %187 = vector.load %arg4[%c48_53, %c0_54] : memref<128x8xi32, #tpu.memory_space<vmem>>, vector<8x8xi32>
    %188 = vector.shape_cast %187 : vector<8x8xi32> to vector<8x8x1xi32>
    %189 = vector.broadcast %188 : vector<8x8x1xi32> to vector<8x8x128xi32>
    %190 = arith.cmpi eq, %189, %8 : vector<8x8x128xi32>
    %191 = arith.extui %190 : vector<8x8x128xi1> to vector<8x8x128xi32>
    %192 = arith.sitofp %191 : vector<8x8x128xi32> to vector<8x8x128xf32>
    %cst_55 = arith.constant dense<0.000000e+00> : vector<8x128xf32>
    %193 = vector.multi_reduction <add>, %192, %cst_55 [0] : vector<8x8x128xf32> to vector<8x128xf32>
    %194 = arith.addf %186, %193 : vector<8x128xf32>
    %c56_56 = arith.constant 56 : index
    %c0_57 = arith.constant 0 : index
    %195 = vector.load %arg4[%c56_56, %c0_57] : memref<128x8xi32, #tpu.memory_space<vmem>>, vector<8x8xi32>
    %196 = vector.shape_cast %195 : vector<8x8xi32> to vector<8x8x1xi32>
    %197 = vector.broadcast %196 : vector<8x8x1xi32> to vector<8x8x128xi32>
    %198 = arith.cmpi eq, %197, %8 : vector<8x8x128xi32>
    %199 = arith.extui %198 : vector<8x8x128xi1> to vector<8x8x128xi32>
    %200 = arith.sitofp %199 : vector<8x8x128xi32> to vector<8x8x128xf32>
    %cst_58 = arith.constant dense<0.000000e+00> : vector<8x128xf32>
    %201 = vector.multi_reduction <add>, %200, %cst_58 [0] : vector<8x8x128xf32> to vector<8x128xf32>
    %202 = arith.addf %194, %201 : vector<8x128xf32>
    %c64_59 = arith.constant 64 : index
    %c0_60 = arith.constant 0 : index
    %203 = vector.load %arg4[%c64_59, %c0_60] : memref<128x8xi32, #tpu.memory_space<vmem>>, vector<8x8xi32>
    %204 = vector.shape_cast %203 : vector<8x8xi32> to vector<8x8x1xi32>
    %205 = vector.broadcast %204 : vector<8x8x1xi32> to vector<8x8x128xi32>
    %206 = arith.cmpi eq, %205, %8 : vector<8x8x128xi32>
    %207 = arith.extui %206 : vector<8x8x128xi1> to vector<8x8x128xi32>
    %208 = arith.sitofp %207 : vector<8x8x128xi32> to vector<8x8x128xf32>
    %cst_61 = arith.constant dense<0.000000e+00> : vector<8x128xf32>
    %209 = vector.multi_reduction <add>, %208, %cst_61 [0] : vector<8x8x128xf32> to vector<8x128xf32>
    %210 = arith.addf %202, %209 : vector<8x128xf32>
    %c72_62 = arith.constant 72 : index
    %c0_63 = arith.constant 0 : index
    %211 = vector.load %arg4[%c72_62, %c0_63] : memref<128x8xi32, #tpu.memory_space<vmem>>, vector<8x8xi32>
    %212 = vector.shape_cast %211 : vector<8x8xi32> to vector<8x8x1xi32>
    %213 = vector.broadcast %212 : vector<8x8x1xi32> to vector<8x8x128xi32>
    %214 = arith.cmpi eq, %213, %8 : vector<8x8x128xi32>
    %215 = arith.extui %214 : vector<8x8x128xi1> to vector<8x8x128xi32>
    %216 = arith.sitofp %215 : vector<8x8x128xi32> to vector<8x8x128xf32>
    %cst_64 = arith.constant dense<0.000000e+00> : vector<8x128xf32>
    %217 = vector.multi_reduction <add>, %216, %cst_64 [0] : vector<8x8x128xf32> to vector<8x128xf32>
    %218 = arith.addf %210, %217 : vector<8x128xf32>
    %c80_65 = arith.constant 80 : index
    %c0_66 = arith.constant 0 : index
    %219 = vector.load %arg4[%c80_65, %c0_66] : memref<128x8xi32, #tpu.memory_space<vmem>>, vector<8x8xi32>
    %220 = vector.shape_cast %219 : vector<8x8xi32> to vector<8x8x1xi32>
    %221 = vector.broadcast %220 : vector<8x8x1xi32> to vector<8x8x128xi32>
    %222 = arith.cmpi eq, %221, %8 : vector<8x8x128xi32>
    %223 = arith.extui %222 : vector<8x8x128xi1> to vector<8x8x128xi32>
    %224 = arith.sitofp %223 : vector<8x8x128xi32> to vector<8x8x128xf32>
    %cst_67 = arith.constant dense<0.000000e+00> : vector<8x128xf32>
    %225 = vector.multi_reduction <add>, %224, %cst_67 [0] : vector<8x8x128xf32> to vector<8x128xf32>
    %226 = arith.addf %218, %225 : vector<8x128xf32>
    %c88_68 = arith.constant 88 : index
    %c0_69 = arith.constant 0 : index
    %227 = vector.load %arg4[%c88_68, %c0_69] : memref<128x8xi32, #tpu.memory_space<vmem>>, vector<8x8xi32>
    %228 = vector.shape_cast %227 : vector<8x8xi32> to vector<8x8x1xi32>
    %229 = vector.broadcast %228 : vector<8x8x1xi32> to vector<8x8x128xi32>
    %230 = arith.cmpi eq, %229, %8 : vector<8x8x128xi32>
    %231 = arith.extui %230 : vector<8x8x128xi1> to vector<8x8x128xi32>
    %232 = arith.sitofp %231 : vector<8x8x128xi32> to vector<8x8x128xf32>
    %cst_70 = arith.constant dense<0.000000e+00> : vector<8x128xf32>
    %233 = vector.multi_reduction <add>, %232, %cst_70 [0] : vector<8x8x128xf32> to vector<8x128xf32>
    %234 = arith.addf %226, %233 : vector<8x128xf32>
    %c96_71 = arith.constant 96 : index
    %c0_72 = arith.constant 0 : index
    %235 = vector.load %arg4[%c96_71, %c0_72] : memref<128x8xi32, #tpu.memory_space<vmem>>, vector<8x8xi32>
    %236 = vector.shape_cast %235 : vector<8x8xi32> to vector<8x8x1xi32>
    %237 = vector.broadcast %236 : vector<8x8x1xi32> to vector<8x8x128xi32>
    %238 = arith.cmpi eq, %237, %8 : vector<8x8x128xi32>
    %239 = arith.extui %238 : vector<8x8x128xi1> to vector<8x8x128xi32>
    %240 = arith.sitofp %239 : vector<8x8x128xi32> to vector<8x8x128xf32>
    %cst_73 = arith.constant dense<0.000000e+00> : vector<8x128xf32>
    %241 = vector.multi_reduction <add>, %240, %cst_73 [0] : vector<8x8x128xf32> to vector<8x128xf32>
    %242 = arith.addf %234, %241 : vector<8x128xf32>
    %c104_74 = arith.constant 104 : index
    %c0_75 = arith.constant 0 : index
    %243 = vector.load %arg4[%c104_74, %c0_75] : memref<128x8xi32, #tpu.memory_space<vmem>>, vector<8x8xi32>
    %244 = vector.shape_cast %243 : vector<8x8xi32> to vector<8x8x1xi32>
    %245 = vector.broadcast %244 : vector<8x8x1xi32> to vector<8x8x128xi32>
    %246 = arith.cmpi eq, %245, %8 : vector<8x8x128xi32>
    %247 = arith.extui %246 : vector<8x8x128xi1> to vector<8x8x128xi32>
    %248 = arith.sitofp %247 : vector<8x8x128xi32> to vector<8x8x128xf32>
    %cst_76 = arith.constant dense<0.000000e+00> : vector<8x128xf32>
    %249 = vector.multi_reduction <add>, %248, %cst_76 [0] : vector<8x8x128xf32> to vector<8x128xf32>
    %250 = arith.addf %242, %249 : vector<8x128xf32>
    %c112_77 = arith.constant 112 : index
    %c0_78 = arith.constant 0 : index
    %251 = vector.load %arg4[%c112_77, %c0_78] : memref<128x8xi32, #tpu.memory_space<vmem>>, vector<8x8xi32>
    %252 = vector.shape_cast %251 : vector<8x8xi32> to vector<8x8x1xi32>
    %253 = vector.broadcast %252 : vector<8x8x1xi32> to vector<8x8x128xi32>
    %254 = arith.cmpi eq, %253, %8 : vector<8x8x128xi32>
    %255 = arith.extui %254 : vector<8x8x128xi1> to vector<8x8x128xi32>
    %256 = arith.sitofp %255 : vector<8x8x128xi32> to vector<8x8x128xf32>
    %cst_79 = arith.constant dense<0.000000e+00> : vector<8x128xf32>
    %257 = vector.multi_reduction <add>, %256, %cst_79 [0] : vector<8x8x128xf32> to vector<8x128xf32>
    %258 = arith.addf %250, %257 : vector<8x128xf32>
    %c120_80 = arith.constant 120 : index
    %c0_81 = arith.constant 0 : index
    %259 = vector.load %arg4[%c120_80, %c0_81] : memref<128x8xi32, #tpu.memory_space<vmem>>, vector<8x8xi32>
    %260 = vector.shape_cast %259 : vector<8x8xi32> to vector<8x8x1xi32>
    %261 = vector.broadcast %260 : vector<8x8x1xi32> to vector<8x8x128xi32>
    %262 = arith.cmpi eq, %261, %8 : vector<8x8x128xi32>
    %263 = arith.extui %262 : vector<8x8x128xi1> to vector<8x8x128xi32>
    %264 = arith.sitofp %263 : vector<8x8x128xi32> to vector<8x8x128xf32>
    %cst_82 = arith.constant dense<0.000000e+00> : vector<8x128xf32>
    %265 = vector.multi_reduction <add>, %264, %cst_82 [0] : vector<8x8x128xf32> to vector<8x128xf32>
    %266 = arith.addf %258, %265 : vector<8x128xf32>
    %267 = tpu.concatenate %137, %266 in 0 : vector<8x128xf32>, vector<8x128xf32> -> vector<16x128xf32>
    %268 = arith.truncf %267 : vector<16x128xf32> to vector<16x128xbf16>
    %c0_83 = arith.constant 0 : index
    %c0_84 = arith.constant 0 : index
    %269 = vector.load %arg11[%c0_83, %c0_84] : memref<16x128xf32, #tpu.memory_space<vmem>>, vector<16x128xf32>
    %c0_85 = arith.constant 0 : index
    %c0_86 = arith.constant 0 : index
    %270 = vector.load %arg5[%c0_85, %c0_86] : memref<128x128xbf16, #tpu.memory_space<vmem>>, vector<128x128xbf16>
    %cst_87 = arith.constant dense<0.000000e+00> : vector<16x128xf32>
    %271 = tpu.matmul %268, %270, %cst_87 {dimension_numbers = #tpu.dot_dimension_numbers<[1], [0], [0], [1], [0, 0, 1, 1], [], []>} : vector<16x128xbf16>, vector<128x128xbf16>, vector<16x128xf32> -> vector<16x128xf32>
    %272 = arith.addf %269, %271 : vector<16x128xf32>
    %c0_88 = arith.constant 0 : index
    %c0_89 = arith.constant 0 : index
    %273 = vector.load %arg11[%c0_88, %c0_89] : memref<16x128xf32, #tpu.memory_space<vmem>>, vector<16x128xf32>
    tpu.vector_store %arg11[%c0_88, %c0_89], %272 {strides = array<i32>} : memref<16x128xf32, #tpu.memory_space<vmem>>, vector<16x128xf32>,
    %cst_90 = arith.constant dense<0.000000e+00> : vector<8xf32>
    %274 = vector.multi_reduction <add>, %137, %cst_90 [1] : vector<8x128xf32> to vector<8xf32>
    %275 = vector.shape_cast %274 : vector<8xf32> to vector<8x1xf32>
    %cst_91 = arith.constant dense<0.000000e+00> : vector<8xf32>
    %276 = vector.multi_reduction <add>, %266, %cst_91 [1] : vector<8x128xf32> to vector<8xf32>
    %277 = vector.shape_cast %276 : vector<8xf32> to vector<8x1xf32>
    %c0_i32_92 = arith.constant 0 : i32
    %278 = arith.cmpi eq, %arg1, %c0_i32_92 : i32
    %279 = vector.extract_strided_slice %137 {offsets = [0, 1], sizes = [8, 1], strides = [1, 1]} : vector<8x128xf32> to vector<8x1xf32>
    %cst_93 = arith.constant 0.000000e+00 : f32
    %280 = vector.broadcast %cst_93 : f32 to vector<8x1xf32>
    %281 = arith.select %278, %279, %280 : vector<8x1xf32>
    %c0_i32_94 = arith.constant 0 : i32
    %282 = arith.cmpi eq, %arg1, %c0_i32_94 : i32
    %283 = vector.extract_strided_slice %266 {offsets = [0, 1], sizes = [8, 1], strides = [1, 1]} : vector<8x128xf32> to vector<8x1xf32>
    %cst_95 = arith.constant 0.000000e+00 : f32
    %284 = vector.broadcast %cst_95 : f32 to vector<8x1xf32>
    %285 = arith.select %282, %283, %284 : vector<8x1xf32>
    %c0_96 = arith.constant 0 : index
    %c0_97 = arith.constant 0 : index
    %286 = vector.load %arg12[%c0_96, %c0_97] : memref<16x1xf32, #tpu.memory_space<vmem>>, vector<8x1xf32>
    %287 = arith.subf %275, %281 : vector<8x1xf32>
    %288 = arith.addf %286, %287 : vector<8x1xf32>
    %c0_98 = arith.constant 0 : index
    %c0_99 = arith.constant 0 : index
    %289 = vector.load %arg12[%c0_98, %c0_99] : memref<16x1xf32, #tpu.memory_space<vmem>>, vector<8x1xf32>
    tpu.vector_store %arg12[%c0_98, %c0_99], %288 {strides = array<i32>} : memref<16x1xf32, #tpu.memory_space<vmem>>, vector<8x1xf32>,
    %c8_100 = arith.constant 8 : index
    %c0_101 = arith.constant 0 : index
    %290 = vector.load %arg12[%c8_100, %c0_101] : memref<16x1xf32, #tpu.memory_space<vmem>>, vector<8x1xf32>
    %291 = arith.subf %277, %285 : vector<8x1xf32>
    %292 = arith.addf %290, %291 : vector<8x1xf32>
    %c8_102 = arith.constant 8 : index
    %c0_103 = arith.constant 0 : index
    %293 = vector.load %arg12[%c8_102, %c0_103] : memref<16x1xf32, #tpu.memory_space<vmem>>, vector<8x1xf32>
    tpu.vector_store %arg12[%c8_102, %c0_103], %292 {strides = array<i32>} : memref<16x1xf32, #tpu.memory_space<vmem>>, vector<8x1xf32>,
    %c0_i32_104 = arith.constant 0 : i32
    %294 = arith.cmpi eq, %arg1, %c0_i32_104 : i32
    %c0_i32_105 = arith.constant 0 : i32
    %295 = arith.cmpi eq, %arg2, %c0_i32_105 : i32
    %296 = arith.andi %294, %295 : i1
    %297 = arith.extui %296 : i1 to i32
    %c0_i32_106 = arith.constant 0 : i32
    %298 = arith.cmpi ne, %297, %c0_i32_106 : i32
    scf.if %298 {
      %c0_107 = arith.constant 0 : index
      %c0_108 = arith.constant 0 : index
      %299 = vector.load %arg12[%c0_107, %c0_108] : memref<16x1xf32, #tpu.memory_space<vmem>>, vector<16x1xf32>
      %cst_109 = arith.constant 1.000000e+00 : f32
      %300 = vector.broadcast %cst_109 : f32 to vector<16x1xf32>
      %301 = arith.maximumf %299, %300 : vector<16x1xf32>
      %c0_110 = arith.constant 0 : index
      %c0_111 = arith.constant 0 : index
      %302 = vector.load %arg11[%c0_110, %c0_111] : memref<16x128xf32, #tpu.memory_space<vmem>>, vector<16x128xf32>
      %303 = vector.broadcast %301 : vector<16x1xf32> to vector<16x128xf32>
      %304 = arith.divf %302, %303 : vector<16x128xf32>
      %305 = vector.extract_strided_slice %304 {offsets = [0, 0], sizes = [8, 128], strides = [1, 1]} : vector<16x128xf32> to vector<8x128xf32>
      %306 = vector.extract_strided_slice %304 {offsets = [8, 0], sizes = [8, 128], strides = [1, 1]} : vector<16x128xf32> to vector<8x128xf32>
      %307 = arith.subf %305, %306 : vector<8x128xf32>
      %308 = math.absf %307 : vector<8x128xf32>
      %309 = arith.truncf %308 : vector<8x128xf32> to vector<8x128xbf16>
      %c0_112 = arith.constant 0 : index
      %c0_113 = arith.constant 0 : index
      %310 = vector.load %arg6[%c0_112, %c0_113] : memref<128x512xbf16, #tpu.memory_space<vmem>>, vector<128x512xbf16>
      %cst_114 = arith.constant dense<0.000000e+00> : vector<8x512xf32>
      %311 = tpu.matmul %309, %310, %cst_114 {dimension_numbers = #tpu.dot_dimension_numbers<[1], [0], [0], [1], [0, 0, 1, 1], [], []>} : vector<8x128xbf16>, vector<128x512xbf16>, vector<8x512xf32> -> vector<8x512xf32>
      %c0_115 = arith.constant 0 : index
      %c0_116 = arith.constant 0 : index
      %312 = vector.load %arg7[%c0_115, %c0_116] : memref<1x512xf32, #tpu.memory_space<vmem>>, vector<1x512xf32>
      %313 = vector.broadcast %312 : vector<1x512xf32> to vector<8x512xf32>
      %314 = arith.addf %311, %313 : vector<8x512xf32>
      %315 = math.tanh %314 : vector<8x512xf32>
      %c0_117 = arith.constant 0 : index
      %c0_118 = arith.constant 0 : index
      %316 = vector.load %arg8[%c0_117, %c0_118] : memref<2x512xf32, #tpu.memory_space<vmem>>, vector<2x512xf32>
      %c0_119 = arith.constant 0 : index
      %c0_120 = arith.constant 0 : index
      %317 = vector.load %arg9[%c0_119, %c0_120] : memref<1x2xf32, #tpu.memory_space<vmem>>, vector<1x2xf32>
      %318 = vector.extract_strided_slice %316 {offsets = [0, 0], sizes = [1, 512], strides = [1, 1]} : vector<2x512xf32> to vector<1x512xf32>
      %319 = vector.extract_strided_slice %316 {offsets = [1, 0], sizes = [1, 512], strides = [1, 1]} : vector<2x512xf32> to vector<1x512xf32>
      %320 = arith.subf %318, %319 : vector<1x512xf32>
      %321 = vector.extract_strided_slice %317 {offsets = [0, 0], sizes = [1, 1], strides = [1, 1]} : vector<1x2xf32> to vector<1x1xf32>
      %322 = vector.extract_strided_slice %317 {offsets = [0, 1], sizes = [1, 1], strides = [1, 1]} : vector<1x2xf32> to vector<1x1xf32>
      %323 = arith.subf %321, %322 : vector<1x1xf32>
      %324 = vector.broadcast %320 : vector<1x512xf32> to vector<8x512xf32>
      %325 = arith.mulf %315, %324 : vector<8x512xf32>
      %cst_121 = arith.constant dense<0.000000e+00> : vector<8xf32>
      %326 = vector.multi_reduction <add>, %325, %cst_121 [1] : vector<8x512xf32> to vector<8xf32>
      %327 = vector.shape_cast %326 : vector<8xf32> to vector<8x1xf32>
      %328 = vector.broadcast %323 : vector<1x1xf32> to vector<8x1xf32>
      %329 = arith.addf %327, %328 : vector<8x1xf32>
      %cst_122 = arith.constant 0.000000e+00 : f32
      %330 = vector.broadcast %cst_122 : f32 to vector<8x1xf32>
      %331 = arith.subf %330, %329 : vector<8x1xf32>
      %332 = math.exp %331 : vector<8x1xf32>
      %cst_123 = arith.constant 1.000000e+00 : f32
      %333 = vector.broadcast %cst_123 : f32 to vector<8x1xf32>
      %334 = arith.addf %333, %332 : vector<8x1xf32>
      %cst_124 = arith.constant 1.000000e+00 : f32
      %335 = vector.broadcast %cst_124 : f32 to vector<8x1xf32>
      %336 = arith.divf %335, %334 : vector<8x1xf32>
      %337 = tpu.iota {dimensions = array<i32: 1>} : vector<8x2xi32>
      %c0_i32_125 = arith.constant 0 : i32
      %338 = vector.broadcast %c0_i32_125 : i32 to vector<8x2xi32>
      %339 = arith.cmpi eq, %337, %338 : vector<8x2xi32>
      %cst_126 = arith.constant 1.000000e+00 : f32
      %340 = vector.broadcast %cst_126 : f32 to vector<8x1xf32>
      %341 = arith.subf %340, %336 : vector<8x1xf32>
      %342 = vector.shape_cast %336 : vector<8x1xf32> to vector<8x1xf32>
      %343 = vector.broadcast %342 : vector<8x1xf32> to vector<8x2xf32>
      %344 = vector.shape_cast %341 : vector<8x1xf32> to vector<8x1xf32>
      %345 = vector.broadcast %344 : vector<8x1xf32> to vector<8x2xf32>
      %346 = arith.select %339, %343, %345 : vector<8x2xi1>, vector<8x2xf32>
      %c0_127 = arith.constant 0 : index
      %c0_128 = arith.constant 0 : index
      %347 = vector.load %arg10[%c0_127, %c0_128] : memref<8x2xf32, #tpu.memory_space<vmem>>, vector<8x2xf32>
      tpu.vector_store %arg10[%c0_127, %c0_128], %346 {strides = array<i32>} : memref<8x2xf32, #tpu.memory_space<vmem>>, vector<8x2xf32>,
    } else {
    }
    return
  }
  func.func @transform_0(%arg0: i32, %arg1: i32, %arg2: i32) -> (i32, i32) {
    %c0_i32 = arith.constant 0 : i32
    return %arg2, %arg0 : i32, i32
  }
  func.func @transform_1(%arg0: i32, %arg1: i32, %arg2: i32) -> (i32, i32) {
    %c0_i32 = arith.constant 0 : i32
    return %arg2, %arg0 : i32, i32
  }
  func.func @transform_2(%arg0: i32, %arg1: i32, %arg2: i32) -> (i32, i32) {
    %c0_i32 = arith.constant 0 : i32
    %c0_i32_0 = arith.constant 0 : i32
    return %arg1, %c0_i32 : i32, i32
  }
  func.func @transform_3(%arg0: i32, %arg1: i32, %arg2: i32) -> (i32, i32) {
    %c0_i32 = arith.constant 0 : i32
    %c0_i32_0 = arith.constant 0 : i32
    %c0_i32_1 = arith.constant 0 : i32
    return %c0_i32, %c0_i32_0 : i32, i32
  }
  func.func @transform_4(%arg0: i32, %arg1: i32, %arg2: i32) -> (i32, i32) {
    %c0_i32 = arith.constant 0 : i32
    %c0_i32_0 = arith.constant 0 : i32
    %c0_i32_1 = arith.constant 0 : i32
    return %c0_i32, %c0_i32_0 : i32, i32
  }
  func.func @transform_5(%arg0: i32, %arg1: i32, %arg2: i32) -> (i32, i32) {
    %c0_i32 = arith.constant 0 : i32
    %c0_i32_0 = arith.constant 0 : i32
    %c0_i32_1 = arith.constant 0 : i32
    return %c0_i32, %c0_i32_0 : i32, i32
  }
  func.func @transform_6(%arg0: i32, %arg1: i32, %arg2: i32) -> (i32, i32) {
    %c0_i32 = arith.constant 0 : i32
    %c0_i32_0 = arith.constant 0 : i32
    %c0_i32_1 = arith.constant 0 : i32
    return %c0_i32, %c0_i32_0 : i32, i32
  }
  func.func @transform_7(%arg0: i32, %arg1: i32, %arg2: i32) -> (i32, i32) {
    %c0_i32 = arith.constant 0 : i32
    %c0_i32_0 = arith.constant 0 : i32
    return %arg0, %c0_i32 : i32, i32
  }
}

</mosaic_0001>

<bundles_post_ra>
// kernel: tpu_custom_call.1
= control target key start
LH: loop header
LB: loop body
LE: loop exit
PB: predicated region body
PF: predicated region fallthrough
CT: control target
= control target key end

     0   :  { %12 = vsyncpa [#allocation5], 0  ;;  %s3898_s24 = smov [#allocation4]   ;;  %s6467_s0 = inlined_call_operand.vmem [shape: s32[128,8], index: 0, kind: input, shape index: {}]   ;;  %s6468_s1 = inlined_call_operand.vmem [shape: s32[128,8], index: 1, kind: input, shape index: {}]   ;;  %s6469_s2 = inlined_call_operand.hbm [shape: bf16[128,128], index: 2, kind: input, shape index: {}]   ;;  %s6470_s3 = inlined_call_operand.vmem [shape: bf16[128,512], index: 3, kind: input, shape index: {}]   ;;  %s6471_s4 = inlined_call_operand.vmem [shape: f32[1,512], index: 4, kind: input, shape index: {}]   ;;  %s6472_s5 = inlined_call_operand.vmem [shape: f32[2,512], index: 5, kind: input, shape index: {}]   ;;  %s6473_s6 = inlined_call_operand.vmem [shape: f32[1,2], index: 6, kind: input, shape index: {}]   ;;  %s6474_s7 = inlined_call_operand.vmem [shape: f32[8,2], index: 7, kind: output, shape index: {}]  }
   0x1   :  { %s22_s25 = sshll.u32 %s3898_s24, 4  ;;  %s3874_s28 = scalar_lea.hbm %s6469_s2, 1024  ;;  %s23_s25 = int_to_ptr.vmem [resolvable:$true] %s22_s25 }
   0x2   :  { %p3875_p0 = scmp.ne.s32.totalorder %s6469_s2, %s3874_s28  ;;  %p3878_p1 = scmp.lt.u32.totalorder %s3874_s28, %s6469_s2 }
   0x4   :  { %p3880_p2 = pnand %p3878_p1, %p3875_p0 }
   0x6   :  { %3883 = shalt.err (!%p3880_p2)
}
   0x7   :  { %s3884_s10 = scalar_lea.vmem %s23_s25, 1024  ;;  %p3889_p4 = scmp.lt.s32.totalorder %s23_s25, %s23_s25 }
   0x8   :  { %p3885_p3 = scmp.ne.s32.totalorder %s23_s25, %s3884_s10  ;;  %p3890_p5 = scmp.lt.s32.totalorder %s3884_s10, %s3884_s10 }
   0xa   :  { %p3891_p6 = por %p3890_p5, %p3889_p4 }
   0xc   :  { %p3892_p7 = pnand %p3891_p6, %p3885_p3 }
   0xe   :  { %3895 = shalt.err (!%p3892_p7)
}
   0xf   :  { %s3899_s11 = smov 64   ;;  %s3900_s12 = smov 4  }
  0x10   :  { %28 = dma.hbm_to_vmem [thread:$0]  %s6469_s2, 1024, %s23_s25, [#allocation5], %s3899_s11, %s3899_s11, %s3900_s12  }
  0x11   :  { %3896 = dma.done.wait [#allocation5], 1024  }
  0x12   :  { %3897 = vsyncadd [#allocation5], 4294966272  ;;  %v6477_v0 = vlaneseq  ;;  %v6475_v1 = vmov 0.0   ;;  %v3970_v5 = vld [vmem:[%s6467_s0 + $0x8] sm:$0xff]  ;;  %v3975_v6 = vld [vmem:[%s6467_s0] sm:$0xff]  ;;  %s3904_s26 = smov 127  }
  0x13   :  { %3765 = vmatprep.subr.bf16.mxu0 %v6475_v1  ;;  %v3988_v11 = vld [vmem:[%s6468_s1] sm:$0xff]  ;;  %v3997_v14 = vld [vmem:[%s6468_s1 + $0x8] sm:$0xff]  ;;  %v4009_v18 = vld [vmem:[%s6467_s0 + $0x10] sm:$0xff] }
  0x14   :  { %v3959_v2 = vshrl.u32 %v6477_v0, 7  ;;  %v4026_v25 = vld [vmem:[%s6468_s1 + $0x10] sm:$0xff]  ;;  %v4042_v31 = vld [vmem:[%s6467_s0 + $0x18] sm:$0xff]  ;;  %v4079_v46 = vld [vmem:[%s6467_s0 + $0x20] sm:$0xff] }
  0x15   :  { %v4059_v38 = vld [vmem:[%s6468_s1 + $0x18] sm:$0xff]  ;;  %v4096_v53 = vld [vmem:[%s6468_s1 + $0x20] sm:$0xff]  ;;  %v4116_v61 = vld [vmem:[%s6467_s0 + $0x28] sm:$0xff] }
  0x16   :  { %v3962_v3 = vsub.s32 0, %v3959_v2  ;;  %v3965_v4 = vsub.s32 1, %v3959_v2  ;;  %v4004_v17 = vsub.s32 2, %v3959_v2  ;;  %v4033_v28 = vsub.s32 3, %v3959_v2 }
  0x17   :  { %v4066_v41 = vsub.s32 4, %v3959_v2  ;;  %v4103_v56 = vsub.s32 5, %v3959_v2 }
  0x18   :  { %6514 = vst [vmem:[#allocation7_spill] sm:$0xff] %v3962_v3  ;;  %6515 = vst [vmem:[#allocation8_spill] sm:$0xff] %v3965_v4  ;;  %v150_v7 = vrot.slane %v3970_v5, %v3962_v3  ;;  %v61_v8 = vrot.slane %v3975_v6, %v3962_v3  ;;  %v157_v9 = vrot.slane %v3970_v5, %v3965_v4 }
  0x19   :  { %v68_v10 = vrot.slane %v3975_v6, %v3965_v4  ;;  %v1492_v12 = vrot.slane %v3988_v11, %v3965_v4  ;;  %v1485_v13 = vrot.slane %v3988_v11, %v3962_v3  ;;  %v1581_v15 = vrot.slane %v3997_v14, %v3965_v4  ;;  %6516 = vst [vmem:[#allocation9_spill] sm:$0xff] %v4004_v17 }
  0x1a   :  { %152 = vbcast.lane.b32.xlu1 %v150_v7, 256  ;;  %63 = vbcast.lane.b32.xlu0 %v61_v8, 256  ;;  %v1574_v16 = vrot.slane %v3997_v14, %v3962_v3  ;;  %v164_v19 = vrot.slane %v3970_v5, %v4004_v17  ;;  %v75_v20 = vrot.slane %v3975_v6, %v4004_v17 }
  0x1b   :  { %v246_v21 = vrot.slane %v4009_v18, %v3965_v4  ;;  %v239_v22 = vrot.slane %v4009_v18, %v3962_v3  ;;  %v1588_v23 = vrot.slane %v3997_v14, %v4004_v17  ;;  %v1499_v24 = vrot.slane %v3988_v11, %v4004_v17  ;;  %6517 = vst [vmem:[#allocation10_spill] sm:$0xff] %v4033_v28 }
  0x1c   :  { %v1670_v26 = vrot.slane %v4026_v25, %v3965_v4  ;;  %v1663_v27 = vrot.slane %v4026_v25, %v3962_v3  ;;  %v171_v29 = vrot.slane %v3970_v5, %v4033_v28  ;;  %v82_v30 = vrot.slane %v3975_v6, %v4033_v28 }
  0x1d   :  { %v328_v32 = vrot.slane %v4042_v31, %v3962_v3  ;;  %v253_v33 = vrot.slane %v4009_v18, %v4004_v17  ;;  %v1506_v34 = vrot.slane %v3988_v11, %v4033_v28  ;;  %v335_v35 = vrot.slane %v4042_v31, %v3965_v4 }
  0x1e   :  { %159 = vbcast.lane.b32.xlu1 %v157_v9, 256  ;;  %70 = vbcast.lane.b32.xlu0 %v68_v10, 256  ;;  %v1677_v36 = vrot.slane %v4026_v25, %v4004_v17  ;;  %v1595_v37 = vrot.slane %v3997_v14, %v4033_v28  ;;  %v1759_v39 = vrot.slane %v4059_v38, %v3965_v4 }
  0x1f   :  { %v1752_v40 = vrot.slane %v4059_v38, %v3962_v3  ;;  %v178_v42 = vrot.slane %v3970_v5, %v4066_v41  ;;  %v89_v43 = vrot.slane %v3975_v6, %v4066_v41  ;;  %v342_v44 = vrot.slane %v4042_v31, %v4004_v17 }
  0x20   :  { %v260_v45 = vrot.slane %v4009_v18, %v4033_v28  ;;  %v424_v47 = vrot.slane %v4079_v46, %v3965_v4  ;;  %v417_v48 = vrot.slane %v4079_v46, %v3962_v3  ;;  %v1602_v49 = vrot.slane %v3997_v14, %v4066_v41 }
  0x21   :  { %v1513_v50 = vrot.slane %v3988_v11, %v4066_v41  ;;  %v1766_v51 = vrot.slane %v4059_v38, %v4004_v17  ;;  %v1684_v52 = vrot.slane %v4026_v25, %v4033_v28  ;;  %v1848_v54 = vrot.slane %v4096_v53, %v3965_v4 }
  0x22   :  { %1494 = vbcast.lane.b32.xlu1 %v1492_v12, 256  ;;  %1487 = vbcast.lane.b32.xlu0 %v1485_v13, 256  ;;  %v1841_v55 = vrot.slane %v4096_v53, %v3962_v3  ;;  %v185_v57 = vrot.slane %v3970_v5, %v4103_v56  ;;  %v96_v58 = vrot.slane %v3975_v6, %v4103_v56 }
  0x23   :  { %v349_v59 = vrot.slane %v4042_v31, %v4033_v28  ;;  %v267_v60 = vrot.slane %v4009_v18, %v4066_v41  ;;  %v506_v62 = vrot.slane %v4116_v61, %v3962_v3  ;;  %v431_v63 = vrot.slane %v4079_v46, %v4004_v17 }
  0x24   :  { %v1520_v7 = vrot.slane %v3988_v11, %v4103_v56  ;;  %v513_v8 = vrot.slane %v4116_v61, %v3965_v4  ;;  %v1691_v9 = vrot.slane %v4026_v25, %v4066_v41  ;;  %v1609_v10 = vrot.slane %v3997_v14, %v4103_v56 }
  0x25   :  { %v1855_v12 = vrot.slane %v4096_v53, %v4004_v17  ;;  %v1773_v13 = vrot.slane %v4059_v38, %v4033_v28  ;;  %v1876_v0 = vrot.slane %v4096_v53, %v4103_v56 }
  0x26   :  { %1583 = vbcast.lane.b32.xlu1 %v1581_v15, 256  ;;  %1576 = vbcast.lane.b32.xlu0 %v1574_v16, 256  ;;  %v4137_v15 = vld [vmem:[%s6468_s1 + $0x28] sm:$0xff] }
  0x27   :  { %v1937_v16 = vrot.slane %v4137_v15, %v3965_v4  ;;  %v1958_v1 = vrot.slane %v4137_v15, %v4066_v41 }
  0x2a   :  { %166 = vbcast.lane.b32.xlu1 %v164_v19, 256  ;;  %77 = vbcast.lane.b32.xlu0 %v75_v20, 256  ;;  %v1930_v19 = vrot.slane %v4137_v15, %v3962_v3  ;;  %v4144_v20 = vsub.s32 6, %v3959_v2 }
  0x2e   :  { %248 = vbcast.lane.b32.xlu1 %v246_v21, 256  ;;  %241 = vbcast.lane.b32.xlu0 %v239_v22, 256  ;;  %v192_v21 = vrot.slane %v3970_v5, %v4144_v20  ;;  %v103_v22 = vrot.slane %v3975_v6, %v4144_v20 }
  0x32   :  { %1590 = vbcast.lane.b32.xlu1 %v1588_v23, 256  ;;  %1501 = vbcast.lane.b32.xlu0 %v1499_v24, 256  ;;  %v356_v23 = vrot.slane %v4042_v31, %v4066_v41  ;;  %v274_v24 = vrot.slane %v4009_v18, %v4103_v56 }
  0x36   :  { %1672 = vbcast.lane.b32.xlu1 %v1670_v26, 256  ;;  %1665 = vbcast.lane.b32.xlu0 %v1663_v27, 256  ;;  %v520_v26 = vrot.slane %v4116_v61, %v4004_v17  ;;  %v438_v27 = vrot.slane %v4079_v46, %v4033_v28 }
  0x3a   :  { %173 = vbcast.lane.b32.xlu1 %v171_v29, 256  ;;  %84 = vbcast.lane.b32.xlu0 %v82_v30, 256  ;;  %v4161_v29 = vld [vmem:[%s6467_s0 + $0x30] sm:$0xff] }
  0x3b   :  { %v602_v30 = vrot.slane %v4161_v29, %v3965_v4 }
  0x3e   :  { %330 = vbcast.lane.b32.xlu1 %v328_v32, 256  ;;  %255 = vbcast.lane.b32.xlu0 %v253_v33, 256  ;;  %v595_v32 = vrot.slane %v4161_v29, %v3962_v3 }
  0x42   :  { %1508 = vbcast.lane.b32.xlu1 %v1506_v34, 256  ;;  %337 = vbcast.lane.b32.xlu0 %v335_v35, 256  ;;  %v1616_v35 = vrot.slane %v3997_v14, %v4144_v20 }
  0x46   :  { %1679 = vbcast.lane.b32.xlu1 %v1677_v36, 256  ;;  %1597 = vbcast.lane.b32.xlu0 %v1595_v37, 256  ;;  %v1527_v36 = vrot.slane %v3988_v11, %v4144_v20 }
  0x4a   :  { %1761 = vbcast.lane.b32.xlu1 %v1759_v39, 256  ;;  %1754 = vbcast.lane.b32.xlu0 %v1752_v40, 256  ;;  %v1780_v40 = vrot.slane %v4059_v38, %v4066_v41 }
  0x4e   :  { %180 = vbcast.lane.b32.xlu1 %v178_v42, 256  ;;  %91 = vbcast.lane.b32.xlu0 %v89_v43, 256  ;;  %v1698_v42 = vrot.slane %v4026_v25, %v4103_v56 }
  0x52   :  { %344 = vbcast.lane.b32.xlu1 %v342_v44, 256  ;;  %262 = vbcast.lane.b32.xlu0 %v260_v45, 256  ;;  %v1944_v45 = vrot.slane %v4137_v15, %v4004_v17 }
  0x56   :  { %426 = vbcast.lane.b32.xlu1 %v424_v47, 256  ;;  %419 = vbcast.lane.b32.xlu0 %v417_v48, 256  ;;  %v1862_v47 = vrot.slane %v4096_v53, %v4033_v28  ;;  %v4194_v48 = vld [vmem:[%s6468_s1 + $0x30] sm:$0xff] }
  0x5a   :  { %1604 = vbcast.lane.b32.xlu1 %v1602_v49, 256  ;;  %1515 = vbcast.lane.b32.xlu0 %v1513_v50, 256 }
  0x5e   :  { %1768 = vbcast.lane.b32.xlu1 %v1766_v51, 256  ;;  %1686 = vbcast.lane.b32.xlu0 %v1684_v52, 256  ;;  %v2026_v51 = vrot.slane %v4194_v48, %v3965_v4  ;;  %v2019_v52 = vrot.slane %v4194_v48, %v3962_v3 }
  0x62   :  { %1850 = vbcast.lane.b32.xlu1 %v1848_v54, 256  ;;  %1843 = vbcast.lane.b32.xlu0 %v1841_v55, 256  ;;  %v4205_v54 = vsub.s32 7, %v3959_v2  ;;  %v363_v2 = vrot.slane %v4042_v31, %v4103_v56 }
  0x66   :  { %187 = vbcast.lane.b32.xlu1 %v185_v57, 256  ;;  %98 = vbcast.lane.b32.xlu0 %v96_v58, 256  ;;  %v199_v58 = vrot.slane %v3970_v5, %v4205_v54  ;;  %v527_v5 = vrot.slane %v4116_v61, %v4033_v28 }
  0x6a   :  { %351 = vbcast.lane.b32.xlu1 %v349_v59, 256  ;;  %269 = vbcast.lane.b32.xlu0 %v267_v60, 256  ;;  %v110_v59 = vrot.slane %v3975_v6, %v4205_v54  ;;  %v445_v6 = vrot.slane %v4079_v46, %v4066_v41 }
  0x6e   :  { %508 = vbcast.lane.b32.xlu1 %v506_v62, 256  ;;  %433 = vbcast.lane.b32.xlu0 %v431_v63, 256  ;;  %v281_v63 = vrot.slane %v4009_v18, %v4144_v20 }
  0x72   :  { %1522 = vbcast.lane.b32.xlu1 %v1520_v7, 256  ;;  %515 = vbcast.lane.b32.xlu0 %v513_v8, 256 }
  0x76   :  { %1693 = vbcast.lane.b32.xlu1 %v1691_v9, 256  ;;  %1611 = vbcast.lane.b32.xlu0 %v1609_v10, 256  ;;  %v4234_v9 = vld [vmem:[%s6467_s0 + $0x38] sm:$0xff] }
  0x7a   :  { %1857 = vbcast.lane.b32.xlu1 %v1855_v12, 256  ;;  %1775 = vbcast.lane.b32.xlu0 %v1773_v13, 256  ;;  %v684_v13 = vrot.slane %v4234_v9, %v3962_v3 }
  0x7e   :  { %1939 = vbcast.lane.b32.xlu1 %v1937_v16, 256  ;;  %1932 = vbcast.lane.b32.xlu0 %v1930_v19, 256  ;;  %v609_v16 = vrot.slane %v4161_v29, %v4004_v17 }
  0x82   :  { %194 = vbcast.lane.b32.xlu1 %v192_v21, 256  ;;  %105 = vbcast.lane.b32.xlu0 %v103_v22, 256  ;;  %v1534_v22 = vrot.slane %v3988_v11, %v4205_v54  ;;  %v1869_v11 = vrot.slane %v4096_v53, %v4066_v41 }
  0x86   :  { %358 = vbcast.lane.b32.xlu1 %v356_v23, 256  ;;  %276 = vbcast.lane.b32.xlu0 %v274_v24, 256  ;;  %v691_v23 = vrot.slane %v4234_v9, %v3965_v4 }
  0x8a   :  { %522 = vbcast.lane.b32.xlu1 %v520_v26, 256  ;;  %440 = vbcast.lane.b32.xlu0 %v438_v27, 256  ;;  %v1705_v27 = vrot.slane %v4026_v25, %v4144_v20 }
  0x8c   :  { %v4167_v33 = vpop.permute.xlu1 %152  ;;  %v4169_v34 = vpop.permute.xlu0 %63 }
  0x8e   :  { %604 = vbcast.lane.b32.xlu1 %v602_v30, 256  ;;  %597 = vbcast.lane.b32.xlu0 %v595_v32, 256  ;;  %v1623_v30 = vrot.slane %v3997_v14, %v4205_v54  ;;  %v2033_v14 = vrot.slane %v4194_v48, %v4004_v17 }
  0x90   :  { %v4175_v37 = vpop.permute.xlu1 %159  ;;  %v4177_v39 = vpop.permute.xlu0 %70 }
  0x92   :  { %1618 = vbcast.lane.b32.xlu1 %v1616_v35, 256  ;;  %1529 = vbcast.lane.b32.xlu0 %v1527_v36, 256  ;;  %v1787_v36 = vrot.slane %v4059_v38, %v4103_v56 }
  0x94   :  { %v4183_v43 = vpop.permute.xlu1 %1494  ;;  %v4185_v44 = vpop.permute.xlu0 %1487 }
  0x96   :  { %1782 = vbcast.lane.b32.xlu1 %v1780_v40, 256  ;;  %1700 = vbcast.lane.b32.xlu0 %v1698_v42, 256 }
  0x98   :  { %v4196_v49 = vpop.permute.xlu1 %1583  ;;  %v4198_v50 = vpop.permute.xlu0 %1576 }
  0x9a   :  { %1946 = vbcast.lane.b32.xlu1 %v1944_v45, 256  ;;  %1864 = vbcast.lane.b32.xlu0 %v1862_v47, 256  ;;  %v1951_v45 = vrot.slane %v4137_v15, %v4033_v28  ;;  %v4279_v47 = vld [vmem:[%s6468_s1 + $0x38] sm:$0xff] }
  0x9c   :  { %v4207_v55 = vpop.permute.xlu1 %166  ;;  %v4209_v57 = vpop.permute.xlu0 %77 }
  0x9e   :  { %2028 = vbcast.lane.b32.xlu1 %v2026_v51, 256  ;;  %2021 = vbcast.lane.b32.xlu0 %v2019_v52, 256 }
  0xa0   :  { %v4215_v60 = vpop.permute.xlu1 %248  ;;  %v4217_v62 = vpop.permute.xlu0 %241 }
  0xa2   :  { %201 = vbcast.lane.b32.xlu1 %v199_v58, 256  ;;  %112 = vbcast.lane.b32.xlu0 %v110_v59, 256  ;;  %v2115_v58 = vrot.slane %v4279_v47, %v3965_v4  ;;  %v2108_v59 = vrot.slane %v4279_v47, %v3962_v3 }
  0xa4   :  { %v4223_v7 = vpop.permute.xlu1 %1590  ;;  %v4225_v8 = vpop.permute.xlu0 %1501 }
  0xa6   :  { %365 = vbcast.lane.b32.xlu1 %v363_v2, 256  ;;  %283 = vbcast.lane.b32.xlu0 %v281_v63, 256 }
  0xa8   :  { %v4236_v10 = vpop.permute.xlu1 %1672  ;;  %v4238_v12 = vpop.permute.xlu0 %1665 }
  0xaa   :  { %529 = vbcast.lane.b32.xlu1 %v527_v5, 256  ;;  %447 = vbcast.lane.b32.xlu0 %v445_v6, 256  ;;  %v370_v5 = vrot.slane %v4042_v31, %v4144_v20  ;;  %v288_v6 = vrot.slane %v4009_v18, %v4205_v54  ;;  %v698_v18 = vrot.slane %v4234_v9, %v4004_v17 }
  0xac   :  { %v4244_v19 = vpop.permute.xlu1 %173  ;;  %v4246_v21 = vpop.permute.xlu0 %84 }
  0xae   :  { %686 = vbcast.lane.b32.xlu1 %v684_v13, 256  ;;  %611 = vbcast.lane.b32.xlu0 %v609_v16, 256 }
  0xb0   :  { %v4252_v24 = vpop.permute.xlu1 %330  ;;  %v4254_v26 = vpop.permute.xlu0 %255 }
  0xb2   :  { %1536 = vbcast.lane.b32.xlu1 %v1534_v22, 256  ;;  %693 = vbcast.lane.b32.xlu0 %v691_v23, 256  ;;  %v534_v22 = vrot.slane %v4116_v61, %v4066_v41  ;;  %v452_v23 = vrot.slane %v4079_v46, %v4103_v56 }
  0xb4   :  { %v4260_v32 = vpop.permute.xlu1 %1508  ;;  %v4262_v35 = vpop.permute.xlu0 %337 }
  0xb6   :  { %1707 = vbcast.lane.b32.xlu1 %v1705_v27, 256  ;;  %1625 = vbcast.lane.b32.xlu0 %v1623_v30, 256 }
  0xb8   :  { %v4268_v40 = vpop.permute.xlu1 %1679  ;;  %v4270_v42 = vpop.permute.xlu0 %1597 }
  0xba   :  { %1871 = vbcast.lane.b32.xlu1 %v1869_v11, 256  ;;  %1789 = vbcast.lane.b32.xlu0 %v1787_v36, 256  ;;  %v616_v11 = vrot.slane %v4161_v29, %v4033_v28  ;;  %v4316_v36 = vld [vmem:[%s6467_s0 + $0x40] sm:$0xff] }
  0xbc   :  { %v4281_v51 = vpop.permute.xlu1 %1761  ;;  %v4283_v52 = vpop.permute.xlu0 %1754 }
  0xbe   :  { %2035 = vbcast.lane.b32.xlu1 %v2033_v14, 256  ;;  %1953 = vbcast.lane.b32.xlu0 %v1951_v45, 256 }
  0xc0   :  { %v4289_v2 = vpop.permute.xlu1 %180  ;;  %v4291_v63 = vpop.permute.xlu0 %91 }
  0xc2   :  { %2117 = vbcast.lane.b32.xlu1 %v2115_v58, 256  ;;  %2110 = vbcast.lane.b32.xlu0 %v2108_v59, 256  ;;  %v780_v58 = vrot.slane %v4316_v36, %v3965_v4  ;;  %v773_v59 = vrot.slane %v4316_v36, %v3962_v3 }
  0xc4   :  { %v4297_v13 = vpop.permute.xlu1 %344  ;;  %v4299_v16 = vpop.permute.xlu0 %262 }
  0xc6   :  { %372 = vbcast.lane.b32.xlu1 %v370_v5, 256  ;;  %290 = vbcast.lane.b32.xlu0 %v288_v6, 256 }
  0xc8   :  { %v4305_v27 = vpop.permute.xlu1 %426  ;;  %v4307_v30 = vpop.permute.xlu0 %419 }
  0xca   :  { %536 = vbcast.lane.b32.xlu1 %v534_v22, 256  ;;  %454 = vbcast.lane.b32.xlu0 %v452_v23, 256  ;;  %v1794_v22 = vrot.slane %v4059_v38, %v4144_v20  ;;  %v1712_v23 = vrot.slane %v4026_v25, %v4205_v54  ;;  %v2122_v25 = vrot.slane %v4279_v47, %v4004_v17 }
  0xcc   :  { %v4318_v14 = vpop.permute.xlu1 %1604  ;;  %v4320_v45 = vpop.permute.xlu0 %1515 }
  0xce   :  { %700 = vbcast.lane.b32.xlu1 %v698_v18, 256  ;;  %618 = vbcast.lane.b32.xlu0 %v616_v11, 256 }
  0xd0   :  { %v4326_v5 = vpop.permute.xlu1 %1768  ;;  %v4328_v6 = vpop.permute.xlu0 %1686 }
  0xd1   :  { %6518 = vst [vmem:[#allocation11_spill] sm:$0xff] %v4326_v5  ;;  %6519 = vst [vmem:[#allocation12_spill] sm:$0xff] %v4328_v6  ;;  %v459_v6 = vrot.slane %v4079_v46, %v4144_v20 }
  0xd2   :  { %782 = vbcast.lane.b32.xlu1 %v780_v58, 256  ;;  %775 = vbcast.lane.b32.xlu0 %v773_v59, 256 }
  0xd4   :  { %v4334_v18 = vpop.permute.xlu1 %1850  ;;  %v4336_v11 = vpop.permute.xlu0 %1843 }
  0xd5   :  { %6520 = vst [vmem:[#allocation13_spill] sm:$0xff] %v4334_v18  ;;  %6521 = vst [vmem:[#allocation14_spill] sm:$0xff] %v4336_v11  ;;  %v2040_v11 = vrot.slane %v4194_v48, %v4033_v28 }
  0xd6   :  { %1796 = vbcast.lane.b32.xlu1 %v1794_v22, 256  ;;  %1714 = vbcast.lane.b32.xlu0 %v1712_v23, 256  ;;  %v4353_v22 = vld [vmem:[%s6468_s1 + $0x40] sm:$0xff] }
  0xd8   :  { %v4342_v58 = vpop.permute.xlu1 %187  ;;  %v4344_v59 = vpop.permute.xlu0 %98 }
  0xd9   :  { %6522 = vst [vmem:[#allocation15_spill] sm:$0xff] %v4342_v58  ;;  %6523 = vst [vmem:[#allocation16_spill] sm:$0xff] %v4344_v59 }
  0xda   :  { %1960 = vbcast.lane.b32.xlu1 %v1958_v1, 256  ;;  %1878 = vbcast.lane.b32.xlu0 %v1876_v0, 256  ;;  %v2204_v0 = vrot.slane %v4353_v22, %v3965_v4  ;;  %v2197_v1 = vrot.slane %v4353_v22, %v3962_v3 }
  0xdc   :  { %v4355_v23 = vpop.permute.xlu1 %351  ;;  %v4357_v18 = vpop.permute.xlu0 %269 }
  0xdd   :  { %6524 = vst [vmem:[#allocation17_spill] sm:$0xff] %v4355_v23  ;;  %6525 = vst [vmem:[#allocation18_spill] sm:$0xff] %v4357_v18  ;;  %v377_v18 = vrot.slane %v4042_v31, %v4205_v54  ;;  %v623_v23 = vrot.slane %v4161_v29, %v4066_v41  ;;  %v787_v31 = vrot.slane %v4316_v36, %v4004_v17 }
  0xde   :  { %2124 = vbcast.lane.b32.xlu1 %v2122_v25, 256  ;;  %2042 = vbcast.lane.b32.xlu0 %v2040_v11, 256 }
  0xe0   :  { %v4363_v59 = vpop.permute.xlu1 %508  ;;  %v4365_v58 = vpop.permute.xlu0 %433 }
  0xe1   :  { %6526 = vst [vmem:[#allocation19_spill] sm:$0xff] %v4363_v59  ;;  %6527 = vst [vmem:[#allocation20_spill] sm:$0xff] %v4365_v58  ;;  %v541_v59 = vrot.slane %v4116_v61, %v4103_v56  ;;  %v1883_v58 = vrot.slane %v4096_v53, %v4144_v20 }
  0xe2   :  { %2206 = vbcast.lane.b32.xlu1 %v2204_v0, 256  ;;  %2199 = vbcast.lane.b32.xlu0 %v2197_v1, 256 }
  0xe4   :  { %v4371_v25 = vpop.permute.xlu1 %1522  ;;  %v4373_v11 = vpop.permute.xlu0 %515 }
  0xe5   :  { %6528 = vst [vmem:[#allocation21_spill] sm:$0xff] %v4371_v25  ;;  %6529 = vst [vmem:[#allocation22_spill] sm:$0xff] %v4373_v11  ;;  %v705_v11 = vrot.slane %v4234_v9, %v4033_v28 }
  0xe6   :  { %461 = vbcast.lane.b32.xlu1 %v459_v6, 256  ;;  %379 = vbcast.lane.b32.xlu0 %v377_v18, 256  ;;  %v4390_v6 = vld [vmem:[%s6467_s0 + $0x48] sm:$0xff] }
  0xe8   :  { %v4379_v0 = vpop.permute.xlu1 %1693  ;;  %v4381_v1 = vpop.permute.xlu0 %1611 }
  0xe9   :  { %6530 = vst [vmem:[#allocation23_spill] sm:$0xff] %v4379_v0  ;;  %6531 = vst [vmem:[#allocation24_spill] sm:$0xff] %v4381_v1 }
  0xea   :  { %625 = vbcast.lane.b32.xlu1 %v623_v23, 256  ;;  %543 = vbcast.lane.b32.xlu0 %v541_v59, 256  ;;  %v869_v59 = vrot.slane %v4390_v6, %v3965_v4  ;;  %v862_v23 = vrot.slane %v4390_v6, %v3962_v3 }
  0xec   :  { %v4392_v18 = vpop.permute.xlu1 %1857  ;;  %v4394_v25 = vpop.permute.xlu0 %1775 }
  0xed   :  { %6532 = vst [vmem:[#allocation25_spill] sm:$0xff] %v4392_v18  ;;  %6533 = vst [vmem:[#allocation26_spill] sm:$0xff] %v4394_v25  ;;  %v1801_v25 = vrot.slane %v4059_v38, %v4205_v54  ;;  %v2047_v18 = vrot.slane %v4194_v48, %v4066_v41  ;;  %v2211_v38 = vrot.slane %v4353_v22, %v4004_v17 }
  0xee   :  { %789 = vbcast.lane.b32.xlu1 %v787_v31, 256  ;;  %707 = vbcast.lane.b32.xlu0 %v705_v11, 256 }
  0xf0   :  { %v4400_v1 = vpop.permute.xlu1 %1939  ;;  %v4402_v0 = vpop.permute.xlu0 %1932 }
  0xf1   :  { %6534 = vst [vmem:[#allocation27_spill] sm:$0xff] %v4400_v1  ;;  %6535 = vst [vmem:[#allocation28_spill] sm:$0xff] %v4402_v0  ;;  %v1965_v0 = vrot.slane %v4137_v15, %v4103_v56  ;;  %v548_v1 = vrot.slane %v4116_v61, %v4144_v20 }
  0xf2   :  { %871 = vbcast.lane.b32.xlu1 %v869_v59, 256  ;;  %864 = vbcast.lane.b32.xlu0 %v862_v23, 256 }
  0xf4   :  { %v4408_v31 = vpop.permute.xlu1 %194  ;;  %v4410_v11 = vpop.permute.xlu0 %105 }
  0xf5   :  { %6536 = vst [vmem:[#allocation29_spill] sm:$0xff] %v4408_v31  ;;  %6537 = vst [vmem:[#allocation30_spill] sm:$0xff] %v4410_v11  ;;  %v2129_v11 = vrot.slane %v4279_v47, %v4033_v28 }
  0xf6   :  { %1885 = vbcast.lane.b32.xlu1 %v1883_v58, 256  ;;  %1803 = vbcast.lane.b32.xlu0 %v1801_v25, 256  ;;  %v4427_v58 = vld [vmem:[%s6468_s1 + $0x48] sm:$0xff] }
  0xf8   :  { %v4416_v59 = vpop.permute.xlu1 %358  ;;  %v4418_v23 = vpop.permute.xlu0 %276 }
  0xf9   :  { %6538 = vst [vmem:[#allocation31_spill] sm:$0xff] %v4416_v59  ;;  %6539 = vst [vmem:[#allocation32_spill] sm:$0xff] %v4418_v23 }
  0xfa   :  { %2049 = vbcast.lane.b32.xlu1 %v2047_v18, 256  ;;  %1967 = vbcast.lane.b32.xlu0 %v1965_v0, 256  ;;  %v2293_v0 = vrot.slane %v4427_v58, %v3965_v4  ;;  %v2286_v18 = vrot.slane %v4427_v58, %v3962_v3 }
  0xfc   :  { %v4429_v25 = vpop.permute.xlu1 %522  ;;  %v4431_v31 = vpop.permute.xlu0 %440 }
  0xfd   :  { %6540 = vst [vmem:[#allocation33_spill] sm:$0xff] %v4429_v25  ;;  %6541 = vst [vmem:[#allocation34_spill] sm:$0xff] %v4431_v31  ;;  %v466_v31 = vrot.slane %v4079_v46, %v4205_v54  ;;  %v712_v25 = vrot.slane %v4234_v9, %v4066_v41  ;;  %v876_v46 = vrot.slane %v4390_v6, %v4004_v17 }
  0xfe   :  { %2213 = vbcast.lane.b32.xlu1 %v2211_v38, 256  ;;  %2131 = vbcast.lane.b32.xlu0 %v2129_v11, 256 }
 0x100   :  { %v4437_v23 = vpop.permute.xlu1 %604  ;;  %v4439_v59 = vpop.permute.xlu0 %597 }
 0x101   :  { %6542 = vst [vmem:[#allocation35_spill] sm:$0xff] %v4437_v23  ;;  %6543 = vst [vmem:[#allocation36_spill] sm:$0xff] %v4439_v59  ;;  %v630_v59 = vrot.slane %v4161_v29, %v4103_v56  ;;  %v1972_v23 = vrot.slane %v4137_v15, %v4144_v20 }
 0x102   :  { %2295 = vbcast.lane.b32.xlu1 %v2293_v0, 256  ;;  %2288 = vbcast.lane.b32.xlu0 %v2286_v18, 256 }
 0x104   :  { %v4445_v38 = vpop.permute.xlu1 %1618  ;;  %v4447_v11 = vpop.permute.xlu0 %1529 }
 0x105   :  { %6544 = vst [vmem:[#allocation37_spill] sm:$0xff] %v4445_v38  ;;  %6545 = vst [vmem:[#allocation38_spill] sm:$0xff] %v4447_v11  ;;  %v794_v11 = vrot.slane %v4316_v36, %v4033_v28 }
 0x106   :  { %550 = vbcast.lane.b32.xlu1 %v548_v1, 256  ;;  %468 = vbcast.lane.b32.xlu0 %v466_v31, 256  ;;  %v4464_v1 = vld [vmem:[%s6467_s0 + $0x50] sm:$0xff] }
 0x108   :  { %v4453_v0 = vpop.permute.xlu1 %1782  ;;  %v4455_v18 = vpop.permute.xlu0 %1700 }
 0x109   :  { %6546 = vst [vmem:[#allocation39_spill] sm:$0xff] %v4453_v0  ;;  %6547 = vst [vmem:[#allocation40_spill] sm:$0xff] %v4455_v18 }
 0x10a   :  { %714 = vbcast.lane.b32.xlu1 %v712_v25, 256  ;;  %632 = vbcast.lane.b32.xlu0 %v630_v59, 256  ;;  %v958_v59 = vrot.slane %v4464_v1, %v3965_v4  ;;  %v951_v25 = vrot.slane %v4464_v1, %v3962_v3 }
 0x10c   :  { %v4466_v31 = vpop.permute.xlu1 %1946  ;;  %v4468_v38 = vpop.permute.xlu0 %1864 }
 0x10d   :  { %6548 = vst [vmem:[#allocation41_spill] sm:$0xff] %v4466_v31  ;;  %6549 = vst [vmem:[#allocation42_spill] sm:$0xff] %v4468_v38  ;;  %v1890_v38 = vrot.slane %v4096_v53, %v4205_v54  ;;  %v2136_v31 = vrot.slane %v4279_v47, %v4066_v41  ;;  %v2300_v53 = vrot.slane %v4427_v58, %v4004_v17 }
 0x10e   :  { %878 = vbcast.lane.b32.xlu1 %v876_v46, 256  ;;  %796 = vbcast.lane.b32.xlu0 %v794_v11, 256 }
 0x110   :  { %v4474_v18 = vpop.permute.xlu1 %2028  ;;  %v4476_v0 = vpop.permute.xlu0 %2021 }
 0x111   :  { %6550 = vst [vmem:[#allocation43_spill] sm:$0xff] %v4474_v18  ;;  %6551 = vst [vmem:[#allocation44_spill] sm:$0xff] %v4476_v0  ;;  %v2054_v0 = vrot.slane %v4194_v48, %v4103_v56  ;;  %v2218_v18 = vrot.slane %v4353_v22, %v4033_v28 }
 0x112   :  { %960 = vbcast.lane.b32.xlu1 %v958_v59, 256  ;;  %953 = vbcast.lane.b32.xlu0 %v951_v25, 256 }
 0x114   :  { %v4482_v46 = vpop.permute.xlu1 %201  ;;  %v4484_v11 = vpop.permute.xlu0 %112 }
 0x115   :  { %6552 = vst [vmem:[#allocation45_spill] sm:$0xff] %v4482_v46  ;;  %6553 = vst [vmem:[#allocation46_spill] sm:$0xff] %v4484_v11  ;;  %v637_v46 = vrot.slane %v4161_v29, %v4144_v20 }
 0x116   :  { %1974 = vbcast.lane.b32.xlu1 %v1972_v23, 256  ;;  %1892 = vbcast.lane.b32.xlu0 %v1890_v38, 256  ;;  %v4501_v23 = vld [vmem:[%s6468_s1 + $0x50] sm:$0xff] }
 0x118   :  { %v4490_v59 = vpop.permute.xlu1 %365  ;;  %v4492_v25 = vpop.permute.xlu0 %283 }
 0x119   :  { %6554 = vst [vmem:[#allocation47_spill] sm:$0xff] %v4490_v59  ;;  %6555 = vst [vmem:[#allocation48_spill] sm:$0xff] %v4492_v25 }
 0x11a   :  { %2138 = vbcast.lane.b32.xlu1 %v2136_v31, 256  ;;  %2056 = vbcast.lane.b32.xlu0 %v2054_v0, 256  ;;  %v2382_v0 = vrot.slane %v4501_v23, %v3965_v4  ;;  %v2375_v31 = vrot.slane %v4501_v23, %v3962_v3 }
 0x11c   :  { %v4503_v38 = vpop.permute.xlu1 %529  ;;  %v4505_v11 = vpop.permute.xlu0 %447 }
 0x11d   :  { %6556 = vst [vmem:[#allocation49_spill] sm:$0xff] %v4503_v38  ;;  %6557 = vst [vmem:[#allocation50_spill] sm:$0xff] %v4505_v11  ;;  %v555_v11 = vrot.slane %v4116_v61, %v4205_v54  ;;  %v801_v38 = vrot.slane %v4316_v36, %v4066_v41  ;;  %v965_v61 = vrot.slane %v4464_v1, %v4004_v17 }
 0x11e   :  { %2302 = vbcast.lane.b32.xlu1 %v2300_v53, 256  ;;  %2220 = vbcast.lane.b32.xlu0 %v2218_v18, 256 }
 0x120   :  { %v4511_v25 = vpop.permute.xlu1 %686  ;;  %v4513_v59 = vpop.permute.xlu0 %611 }
 0x121   :  { %6558 = vst [vmem:[#allocation51_spill] sm:$0xff] %v4511_v25  ;;  %6559 = vst [vmem:[#allocation52_spill] sm:$0xff] %v4513_v59  ;;  %v719_v25 = vrot.slane %v4234_v9, %v4103_v56  ;;  %v2061_v59 = vrot.slane %v4194_v48, %v4144_v20 }
 0x122   :  { %2384 = vbcast.lane.b32.xlu1 %v2382_v0, 256  ;;  %2377 = vbcast.lane.b32.xlu0 %v2375_v31, 256 }
 0x124   :  { %v4519_v53 = vpop.permute.xlu1 %1536  ;;  %v4521_v18 = vpop.permute.xlu0 %693 }
 0x125   :  { %6560 = vst [vmem:[#allocation53_spill] sm:$0xff] %v4519_v53  ;;  %6561 = vst [vmem:[#allocation54_spill] sm:$0xff] %v4521_v18  ;;  %v883_v18 = vrot.slane %v4390_v6, %v4033_v28 }
 0x126   :  { %639 = vbcast.lane.b32.xlu1 %v637_v46, 256  ;;  %557 = vbcast.lane.b32.xlu0 %v555_v11, 256  ;;  %v4538_v46 = vld [vmem:[%s6467_s0 + $0x58] sm:$0xff] }
 0x128   :  { %v4527_v0 = vpop.permute.xlu1 %1707  ;;  %v4529_v31 = vpop.permute.xlu0 %1625 }
 0x129   :  { %6562 = vst [vmem:[#allocation55_spill] sm:$0xff] %v4527_v0  ;;  %6563 = vst [vmem:[#allocation56_spill] sm:$0xff] %v4529_v31 }
 0x12a   :  { %803 = vbcast.lane.b32.xlu1 %v801_v38, 256  ;;  %721 = vbcast.lane.b32.xlu0 %v719_v25, 256  ;;  %v1047_v25 = vrot.slane %v4538_v46, %v3965_v4  ;;  %v1040_v38 = vrot.slane %v4538_v46, %v3962_v3 }
 0x12c   :  { %v4540_v11 = vpop.permute.xlu1 %1871  ;;  %v4542_v53 = vpop.permute.xlu0 %1789 }
 0x12d   :  { %6564 = vst [vmem:[#allocation57_spill] sm:$0xff] %v4540_v11  ;;  %6565 = vst [vmem:[#allocation58_spill] sm:$0xff] %v4542_v53  ;;  %v1979_v53 = vrot.slane %v4137_v15, %v4205_v54  ;;  %v2225_v11 = vrot.slane %v4353_v22, %v4066_v41  ;;  %v2389_v15 = vrot.slane %v4501_v23, %v4004_v17 }
 0x12e   :  { %967 = vbcast.lane.b32.xlu1 %v965_v61, 256  ;;  %885 = vbcast.lane.b32.xlu0 %v883_v18, 256 }
 0x130   :  { %v4548_v0 = vpop.permute.xlu1 %2035  ;;  %v4550_v31 = vpop.permute.xlu0 %1953 }
 0x131   :  { %6566 = vst [vmem:[#allocation59_spill] sm:$0xff] %v4548_v0  ;;  %6567 = vst [vmem:[#allocation60_spill] sm:$0xff] %v4550_v31  ;;  %v2143_v31 = vrot.slane %v4279_v47, %v4103_v56  ;;  %v726_v0 = vrot.slane %v4234_v9, %v4144_v20 }
 0x132   :  { %1049 = vbcast.lane.b32.xlu1 %v1047_v25, 256  ;;  %1042 = vbcast.lane.b32.xlu0 %v1040_v38, 256 }
 0x134   :  { %v4556_v61 = vpop.permute.xlu1 %2117  ;;  %v4558_v18 = vpop.permute.xlu0 %2110 }
 0x135   :  { %6568 = vst [vmem:[#allocation61_spill] sm:$0xff] %v4556_v61  ;;  %6569 = vst [vmem:[#allocation62_spill] sm:$0xff] %v4558_v18  ;;  %v2307_v18 = vrot.slane %v4427_v58, %v4033_v28 }
 0x136   :  { %2063 = vbcast.lane.b32.xlu1 %v2061_v59, 256  ;;  %1981 = vbcast.lane.b32.xlu0 %v1979_v53, 256  ;;  %v4575_v59 = vld [vmem:[%s6468_s1 + $0x58] sm:$0xff] }
 0x138   :  { %v4564_v25 = vpop.permute.xlu1 %372  ;;  %v4566_v38 = vpop.permute.xlu0 %290 }
 0x139   :  { %6570 = vst [vmem:[#allocation63_spill] sm:$0xff] %v4564_v25  ;;  %6571 = vst [vmem:[#allocation64_spill] sm:$0xff] %v4566_v38 }
 0x13a   :  { %2227 = vbcast.lane.b32.xlu1 %v2225_v11, 256  ;;  %2145 = vbcast.lane.b32.xlu0 %v2143_v31, 256  ;;  %v2471_v31 = vrot.slane %v4575_v59, %v3965_v4  ;;  %v2464_v11 = vrot.slane %v4575_v59, %v3962_v3 }
 0x13c   :  { %v4577_v53 = vpop.permute.xlu1 %536  ;;  %v4579_v61 = vpop.permute.xlu0 %454 }
 0x13d   :  { %6572 = vst [vmem:[#allocation65_spill] sm:$0xff] %v4577_v53  ;;  %6573 = vst [vmem:[#allocation66_spill] sm:$0xff] %v4579_v61  ;;  %v644_v61 = vrot.slane %v4161_v29, %v4205_v54  ;;  %v890_v53 = vrot.slane %v4390_v6, %v4066_v41  ;;  %v1054_v29 = vrot.slane %v4538_v46, %v4004_v17 }
 0x13e   :  { %2391 = vbcast.lane.b32.xlu1 %v2389_v15, 256  ;;  %2309 = vbcast.lane.b32.xlu0 %v2307_v18, 256 }
 0x140   :  { %v4585_v25 = vpop.permute.xlu1 %700  ;;  %v4587_v38 = vpop.permute.xlu0 %618 }
 0x141   :  { %6574 = vst [vmem:[#allocation67_spill] sm:$0xff] %v4585_v25  ;;  %6575 = vst [vmem:[#allocation68_spill] sm:$0xff] %v4587_v38  ;;  %v808_v38 = vrot.slane %v4316_v36, %v4103_v56  ;;  %v2150_v25 = vrot.slane %v4279_v47, %v4144_v20 }
 0x142   :  { %2473 = vbcast.lane.b32.xlu1 %v2471_v31, 256  ;;  %2466 = vbcast.lane.b32.xlu0 %v2464_v11, 256 }
 0x144   :  { %v4593_v15 = vpop.permute.xlu1 %782  ;;  %v4595_v18 = vpop.permute.xlu0 %775 }
 0x145   :  { %6576 = vst [vmem:[#allocation69_spill] sm:$0xff] %v4593_v15  ;;  %6577 = vst [vmem:[#allocation70_spill] sm:$0xff] %v4595_v18  ;;  %v972_v18 = vrot.slane %v4464_v1, %v4033_v28 }
 0x146   :  { %728 = vbcast.lane.b32.xlu1 %v726_v0, 256  ;;  %646 = vbcast.lane.b32.xlu0 %v644_v61, 256  ;;  %v4612_v0 = vld [vmem:[%s6467_s0 + $0x60] sm:$0xff] }
 0x148   :  { %v4601_v31 = vpop.permute.xlu1 %1796  ;;  %v4603_v11 = vpop.permute.xlu0 %1714 }
 0x149   :  { %6578 = vst [vmem:[#allocation71_spill] sm:$0xff] %v4601_v31  ;;  %6579 = vst [vmem:[#allocation72_spill] sm:$0xff] %v4603_v11 }
 0x14a   :  { %892 = vbcast.lane.b32.xlu1 %v890_v53, 256  ;;  %810 = vbcast.lane.b32.xlu0 %v808_v38, 256  ;;  %v1136_v38 = vrot.slane %v4612_v0, %v3965_v4  ;;  %v1129_v53 = vrot.slane %v4612_v0, %v3962_v3 }
 0x14c   :  { %v4614_v61 = vpop.permute.xlu1 %1960  ;;  %v4616_v15 = vpop.permute.xlu0 %1878 }
 0x14d   :  { %6580 = vst [vmem:[#allocation73_spill] sm:$0xff] %v4614_v61  ;;  %6581 = vst [vmem:[#allocation74_spill] sm:$0xff] %v4616_v15  ;;  %v2068_v15 = vrot.slane %v4194_v48, %v4205_v54  ;;  %v2314_v61 = vrot.slane %v4427_v58, %v4066_v41  ;;  %v2478_v48 = vrot.slane %v4575_v59, %v4004_v17 }
 0x14e   :  { %1056 = vbcast.lane.b32.xlu1 %v1054_v29, 256  ;;  %974 = vbcast.lane.b32.xlu0 %v972_v18, 256 }
 0x150   :  { %v4622_v31 = vpop.permute.xlu1 %2124  ;;  %v4624_v11 = vpop.permute.xlu0 %2042 }
 0x151   :  { %6582 = vst [vmem:[#allocation75_spill] sm:$0xff] %v4622_v31  ;;  %6583 = vst [vmem:[#allocation76_spill] sm:$0xff] %v4624_v11  ;;  %v2232_v11 = vrot.slane %v4353_v22, %v4103_v56  ;;  %v815_v31 = vrot.slane %v4316_v36, %v4144_v20 }
 0x152   :  { %1138 = vbcast.lane.b32.xlu1 %v1136_v38, 256  ;;  %1131 = vbcast.lane.b32.xlu0 %v1129_v53, 256 }
 0x154   :  { %v4630_v29 = vpop.permute.xlu1 %2206  ;;  %v4632_v18 = vpop.permute.xlu0 %2199 }
 0x155   :  { %6584 = vst [vmem:[#allocation77_spill] sm:$0xff] %v4630_v29  ;;  %6585 = vst [vmem:[#allocation78_spill] sm:$0xff] %v4632_v18  ;;  %v2396_v18 = vrot.slane %v4501_v23, %v4033_v28 }
 0x156   :  { %2152 = vbcast.lane.b32.xlu1 %v2150_v25, 256  ;;  %2070 = vbcast.lane.b32.xlu0 %v2068_v15, 256  ;;  %v4649_v25 = vld [vmem:[%s6468_s1 + $0x60] sm:$0xff] }
 0x158   :  { %v4638_v38 = vpop.permute.xlu1 %461  ;;  %v4640_v53 = vpop.permute.xlu0 %379 }
 0x159   :  { %6586 = vst [vmem:[#allocation79_spill] sm:$0xff] %v4638_v38  ;;  %6587 = vst [vmem:[#allocation80_spill] sm:$0xff] %v4640_v53 }
 0x15a   :  { %2316 = vbcast.lane.b32.xlu1 %v2314_v61, 256  ;;  %2234 = vbcast.lane.b32.xlu0 %v2232_v11, 256  ;;  %v2560_v11 = vrot.slane %v4649_v25, %v3965_v4  ;;  %v2553_v61 = vrot.slane %v4649_v25, %v3962_v3 }
 0x15c   :  { %v4651_v15 = vpop.permute.xlu1 %625  ;;  %v4653_v29 = vpop.permute.xlu0 %543 }
 0x15d   :  { %6588 = vst [vmem:[#allocation81_spill] sm:$0xff] %v4651_v15  ;;  %6589 = vst [vmem:[#allocation82_spill] sm:$0xff] %v4653_v29  ;;  %v733_v29 = vrot.slane %v4234_v9, %v4205_v54  ;;  %v979_v15 = vrot.slane %v4464_v1, %v4066_v41  ;;  %v1143_v9 = vrot.slane %v4612_v0, %v4004_v17 }
 0x15e   :  { %2480 = vbcast.lane.b32.xlu1 %v2478_v48, 256  ;;  %2398 = vbcast.lane.b32.xlu0 %v2396_v18, 256 }
 0x160   :  { %v4659_v38 = vpop.permute.xlu1 %789  ;;  %v4661_v53 = vpop.permute.xlu0 %707 }
 0x161   :  { %6590 = vst [vmem:[#allocation83_spill] sm:$0xff] %v4659_v38  ;;  %6591 = vst [vmem:[#allocation84_spill] sm:$0xff] %v4661_v53  ;;  %v897_v53 = vrot.slane %v4390_v6, %v4103_v56 }
 0x162   :  { %2562 = vbcast.lane.b32.xlu1 %v2560_v11, 256  ;;  %2555 = vbcast.lane.b32.xlu0 %v2553_v61, 256  ;;  %v6593_v11 = vlaneseq }
 0x164   :  { %v4667_v48 = vpop.permute.xlu1 %871  ;;  %v4669_v18 = vpop.permute.xlu0 %864  ;;  %v4676_v61 = vand.u32 127, %v6593_v11 }
 0x165   :  { %6592 = vst [vmem:[#allocation85_spill] sm:$0xff] %v4669_v18  ;;  %v2239_v18 = vrot.slane %v4353_v22, %v4144_v20 }
 0x166   :  { %817 = vbcast.lane.b32.xlu1 %v815_v31, 256  ;;  %735 = vbcast.lane.b32.xlu0 %v733_v29, 256  ;;  %v1061_v31 = vrot.slane %v4538_v46, %v4033_v28  ;;  %vm204_vm0 = vcmp.eq.s32.totalorder %v4175_v37, %v4676_v61  ;;  %v4691_v29 = vld [vmem:[%s6467_s0 + $0x68] sm:$0xff]  ;;  %vm203_vm1 = vcmp.eq.s32.totalorder %v4167_v33, %v4676_v61  ;;  %v6598_v37 = vmov 0.0  }
 0x167   :  { %vm115_vm2 = vcmp.eq.s32.totalorder %v4177_v39, %v4676_v61  ;;  %vm1539_vm3 = vcmp.eq.s32.totalorder %v4183_v43, %v4676_v61  ;;  %vm1538_vm4 = vcmp.eq.s32.totalorder %v4185_v44, %v4676_v61  ;;  %vm114_vm5 = vcmp.eq.s32.totalorder %v4169_v34, %v4676_v61 }
 0x168   :  { %v4678_v38 = vpop.permute.xlu1 %1885  ;;  %v4680_v5 = vpop.permute.xlu0 %1803  ;;  %v3468_v11 = vsel %vm204_vm0, 1.0, %v6598_v37  ;;  %v1225_v33 = vrot.slane %v4691_v29, %v3965_v4  ;;  %v1218_v39 = vrot.slane %v4691_v29, %v3962_v3  ;;  %v3460_v43 = vsel %vm115_vm2, 1.0, %v6598_v37 }
 0x169   :  { %6594 = vst [vmem:[#allocation86_spill] sm:$0xff] %v4678_v38  ;;  %6595 = vst [vmem:[#allocation87_spill] sm:$0xff] %v4680_v5  ;;  %v3587_v44 = vsel %vm1538_vm4, 1.0, %v6598_v37  ;;  %vm1628_vm6 = vcmp.eq.s32.totalorder %v4196_v49, %v4676_v61  ;;  %vm1627_vm7 = vcmp.eq.s32.totalorder %v4198_v50, %v4676_v61  ;;  %vm205_vm8 = vcmp.eq.s32.totalorder %v4207_v55, %v4676_v61 }
 0x16a   :  { %981 = vbcast.lane.b32.xlu1 %v979_v15, 256  ;;  %899 = vbcast.lane.b32.xlu0 %v897_v53, 256  ;;  %v2157_v49 = vrot.slane %v4279_v47, %v4205_v54  ;;  %vm116_vm9 = vcmp.eq.s32.totalorder %v4209_v57, %v4676_v61  ;;  %vm293_vm10 = vcmp.eq.s32.totalorder %v4215_v60, %v4676_v61 }
 0x16b   :  { %vm292_vm11 = vcmp.eq.s32.totalorder %v4217_v62, %v4676_v61  ;;  %vm1629_vm12 = vcmp.eq.s32.totalorder %v4223_v7, %v4676_v61  ;;  %vm1540_vm13 = vcmp.eq.s32.totalorder %v4225_v8, %v4676_v61  ;;  %vm1717_vm14 = vcmp.eq.s32.totalorder %v4236_v10, %v4676_v61 }
 0x16c   :  { %v4697_v53 = vpop.permute.xlu1 %2049  ;;  %v4699_v15 = vpop.permute.xlu0 %1967  ;;  %vm1716_vm15 = vcmp.eq.s32.totalorder %v4238_v12, %v4676_v61  ;;  %vm206_vm0 = vcmp.eq.s32.totalorder %v4244_v19, %v4676_v61  ;;  %v3461_v57 = vsel %vm116_vm9, 1.0, %v6598_v37  ;;  %v2321_v8 = vrot.slane %v4427_v58, %v4103_v56 }
 0x16d   :  { %6596 = vst [vmem:[#allocation88_spill] sm:$0xff] %v4697_v53  ;;  %6597 = vst [vmem:[#allocation89_spill] sm:$0xff] %v4699_v15  ;;  %v3467_v15 = vsel %vm203_vm1, 1.0, %v6598_v37  ;;  %v3588_v53 = vsel %vm1539_vm3, 1.0, %v6598_v37  ;;  %vm117_vm1 = vcmp.eq.s32.totalorder %v4246_v21, %v4676_v61  ;;  %v3476_v12 = vsel %vm293_vm10, 1.0, %v6598_v37  ;;  %v4794_v21 = vld [vmem:[%s6468_s1 + $0x68] sm:$0xff] }
 0x16e   :  { %1145 = vbcast.lane.b32.xlu1 %v1143_v9, 256  ;;  %1063 = vbcast.lane.b32.xlu0 %v1061_v31, 256  ;;  %v3459_v31 = vsel %vm114_vm5, 1.0, %v6598_v37  ;;  %v227_v38 = vadd.f32 %v3468_v11, %v3467_v15  ;;  %v1562_v50 = vadd.f32 %v3588_v53, %v3587_v44  ;;  %v3469_v15 = vsel %vm205_vm8, 1.0, %v6598_v37 }
 0x16f   :  { %v138_v5 = vadd.f32 %v3460_v43, %v3459_v31  ;;  %v2403_v53 = vrot.slane %v4501_v23, %v4066_v41  ;;  %v3475_v19 = vsel %vm292_vm11, 1.0, %v6598_v37  ;;  %v3589_v11 = vsel %vm1540_vm13, 1.0, %v6598_v37 }
 0x170   :  { %v4720_v34 = vpop.permute.xlu1 %2213  ;;  %v4722_v9 = vpop.permute.xlu0 %2131  ;;  %v3470_v43 = vsel %vm206_vm0, 1.0, %v6598_v37  ;;  %v3462_v7 = vsel %vm117_vm1, 1.0, %v6598_v37  ;;  %vm294_vm2 = vcmp.eq.s32.totalorder %v4254_v26, %v4676_v61  ;;  %v2567_v31 = vrot.slane %v4649_v25, %v4004_v17 }
 0x171   :  { %6599 = vst [vmem:[#allocation90_spill] sm:$0xff] %v4720_v34  ;;  %6600 = vst [vmem:[#allocation91_spill] sm:$0xff] %v4722_v9  ;;  %v3596_v34 = vsel %vm1628_vm6, 1.0, %v6598_v37  ;;  %v3595_v9 = vsel %vm1627_vm7, 1.0, %v6598_v37  ;;  %v139_v62 = vadd.f32 %v3461_v57, %v138_v5  ;;  %v3477_v26 = vsel %vm294_vm2, 1.0, %v6598_v37 }
 0x172   :  { %1227 = vbcast.lane.b32.xlu1 %v1225_v33, 256  ;;  %1220 = vbcast.lane.b32.xlu0 %v1218_v39, 256  ;;  %v1651_v10 = vadd.f32 %v3596_v34, %v3595_v9  ;;  %v3604_v33 = vsel %vm1717_vm14, 1.0, %v6598_v37  ;;  %v3603_v39 = vsel %vm1716_vm15, 1.0, %v6598_v37  ;;  %v228_v34 = vadd.f32 %v3469_v15, %v227_v38 }
 0x173   :  { %v316_v9 = vadd.f32 %v3476_v12, %v3475_v19  ;;  %v1563_v38 = vadd.f32 %v3589_v11, %v1562_v50  ;;  %v1740_v5 = vadd.f32 %v3604_v33, %v3603_v39  ;;  %v140_v57 = vadd.f32 %v3462_v7, %v139_v62 }
 0x174   :  { %v4742_v55 = vpop.permute.xlu1 %2295  ;;  %v4744_v47 = vpop.permute.xlu0 %2288  ;;  %v229_v15 = vadd.f32 %v3470_v43, %v228_v34  ;;  %vm1541_vm3 = vcmp.eq.s32.totalorder %v4260_v32, %v4676_v61  ;;  %vm382_vm4 = vcmp.eq.s32.totalorder %v4262_v35, %v4676_v61  ;;  %vm1718_vm5 = vcmp.eq.s32.totalorder %v4268_v40, %v4676_v61 }
 0x175   :  { %vm1630_vm6 = vcmp.eq.s32.totalorder %v4270_v42, %v4676_v61  ;;  %vm1806_vm7 = vcmp.eq.s32.totalorder %v4281_v51, %v4676_v61  ;;  %vm1805_vm8 = vcmp.eq.s32.totalorder %v4283_v52, %v4676_v61  ;;  %vm207_vm9 = vcmp.eq.s32.totalorder %v4289_v2, %v4676_v61 }
 0x176   :  { %2241 = vbcast.lane.b32.xlu1 %v2239_v18, 256  ;;  %2159 = vbcast.lane.b32.xlu0 %v2157_v49, 256  ;;  %v3597_v18 = vsel %vm1629_vm12, 1.0, %v6598_v37  ;;  %v2485_v49 = vrot.slane %v4575_v59, %v4033_v28  ;;  %v2649_v32 = vrot.slane %v4794_v21, %v3965_v4  ;;  %v2642_v35 = vrot.slane %v4794_v21, %v3962_v3 }
 0x177   :  { %vm381_vm10 = vcmp.eq.s32.totalorder %v4252_v24, %v4676_v61  ;;  %v317_v40 = vadd.f32 %v3477_v26, %v316_v9  ;;  %v3590_v42 = vsel %vm1541_vm3, 1.0, %v6598_v37  ;;  %v3484_v51 = vsel %vm382_vm4, 1.0, %v6598_v37 }
 0x178   :  { %v4777_v60 = vpop.permute.xlu1 %550  ;;  %v4779_v44 = vpop.permute.xlu0 %468  ;;  %v3605_v52 = vsel %vm1718_vm5, 1.0, %v6598_v37  ;;  %v3598_v2 = vsel %vm1630_vm6, 1.0, %v6598_v37  ;;  %v3612_v50 = vsel %vm1806_vm7, 1.0, %v6598_v37  ;;  %vm118_vm11 = vcmp.eq.s32.totalorder %v4291_v63, %v4676_v61 }
 0x179   :  { %6601 = vst [vmem:[#allocation92_spill] sm:$0xff] %v4777_v60  ;;  %v1652_v60 = vadd.f32 %v3597_v18, %v1651_v10  ;;  %v3611_v10 = vsel %vm1805_vm8, 1.0, %v6598_v37  ;;  %v3471_v18 = vsel %vm207_vm9, 1.0, %v6598_v37  ;;  %vm383_vm12 = vcmp.eq.s32.totalorder %v4297_v13, %v4676_v61 }
 0x17a   :  { %2405 = vbcast.lane.b32.xlu1 %v2403_v53, 256  ;;  %2323 = vbcast.lane.b32.xlu0 %v2321_v8, 256  ;;  %vm295_vm13 = vcmp.eq.s32.totalorder %v4299_v16, %v4676_v61  ;;  %v3483_v24 = vsel %vm381_vm10, 1.0, %v6598_v37  ;;  %v1564_v11 = vadd.f32 %v3590_v42, %v1563_v38  ;;  %v904_v33 = vrot.slane %v4390_v6, %v4144_v20 }
 0x17b   :  { %v822_v39 = vrot.slane %v4316_v36, %v4205_v54  ;;  %v405_v43 = vadd.f32 %v3484_v51, %v3483_v24  ;;  %v1741_v34 = vadd.f32 %v3605_v52, %v1740_v5  ;;  %v1653_v63 = vadd.f32 %v3598_v2, %v1652_v60  ;;  %v6602_v36 = vld [vmem:[#allocation11_spill] sm:$0xff] }
 0x17c   :  { %v4801_v53 = vpop.permute.xlu1 %714  ;;  %v4803_v8 = vpop.permute.xlu0 %632  ;;  %v1829_v62 = vadd.f32 %v3612_v50, %v3611_v10  ;;  %v230_v7 = vadd.f32 %v3471_v18, %v229_v15  ;;  %v3463_v13 = vsel %vm118_vm11, 1.0, %v6598_v37  ;;  %v3485_v16 = vsel %vm383_vm12, 1.0, %v6598_v37  ;;  %v6603_v15 = vld [vmem:[#allocation12_spill] sm:$0xff]  ;;  %v6607_v52 = vld [vmem:[#allocation15_spill] sm:$0xff] }
 0x17d   :  { %v3478_v9 = vsel %vm295_vm13, 1.0, %v6598_v37  ;;  %vm471_vm14 = vcmp.eq.s32.totalorder %v4305_v27, %v4676_v61  ;;  %vm470_vm15 = vcmp.eq.s32.totalorder %v4307_v30, %v4676_v61  ;;  %vm1631_vm0 = vcmp.eq.s32.totalorder %v4318_v14, %v4676_v61  ;;  %v6608_v50 = vld [vmem:[#allocation16_spill] sm:$0xff] }
 0x17e   :  { %2569 = vbcast.lane.b32.xlu1 %v2567_v31, 256  ;;  %2487 = vbcast.lane.b32.xlu0 %v2485_v49, 256  ;;  %vm1542_vm1 = vcmp.eq.s32.totalorder %v4320_v45, %v4676_v61  ;;  %vm1807_vm2 = vcmp.eq.s32.totalorder %v6602_v36, %v4676_v61  ;;  %v1068_v60 = vrot.slane %v4538_v46, %v4066_v41  ;;  %v3492_v14 = vsel %vm471_vm14, 1.0, %v6598_v37 }
 0x17f   :  { %v986_v27 = vrot.slane %v4464_v1, %v4103_v56  ;;  %v141_v38 = vadd.f32 %v3463_v13, %v140_v57  ;;  %v406_v5 = vadd.f32 %v3485_v16, %v405_v43  ;;  %v318_v30 = vadd.f32 %v3478_v9, %v317_v40  ;;  %v6605_v57 = vld [vmem:[#allocation13_spill] sm:$0xff]  ;;  %v6606_v40 = vld [vmem:[#allocation14_spill] sm:$0xff]  ;;  %v4893_v13 = vld [vmem:[%s6467_s0 + $0x70] sm:$0xff] }
 0x180   :  { %v4827_v12 = vpop.permute.xlu1 %878  ;;  %v4829_v19 = vpop.permute.xlu0 %796  ;;  %vm1719_vm3 = vcmp.eq.s32.totalorder %v6603_v15, %v4676_v61  ;;  %v3491_v45 = vsel %vm470_vm15, 1.0, %v6598_v37  ;;  %v3599_v26 = vsel %vm1631_vm0, 1.0, %v6598_v37  ;;  %v3613_v51 = vsel %vm1807_vm2, 1.0, %v6598_v37  ;;  %v6609_v43 = vld [vmem:[#allocation17_spill] sm:$0xff] }
 0x181   :  { %vm1895_vm4 = vcmp.eq.s32.totalorder %v6605_v57, %v4676_v61  ;;  %vm1894_vm5 = vcmp.eq.s32.totalorder %v6606_v40, %v4676_v61  ;;  %vm208_vm6 = vcmp.eq.s32.totalorder %v6607_v52, %v4676_v61  ;;  %v3606_v2 = vsel %vm1719_vm3, 1.0, %v6598_v37  ;;  %v6615_v40 = vld [vmem:[#allocation22_spill] sm:$0xff]  ;;  %v6616_v52 = vld [vmem:[#allocation23_spill] sm:$0xff] }
 0x182   :  { %2651 = vbcast.lane.b32.xlu1 %v2649_v32, 256  ;;  %2644 = vbcast.lane.b32.xlu0 %v2642_v35, 256  ;;  %v3591_v32 = vsel %vm1542_vm1, 1.0, %v6598_v37  ;;  %vm119_vm7 = vcmp.eq.s32.totalorder %v6608_v50, %v4676_v61  ;;  %v1232_v10 = vrot.slane %v4691_v29, %v4004_v17  ;;  %v1150_v18 = vrot.slane %v4612_v0, %v4033_v28  ;;  %v6617_v50 = vld [vmem:[#allocation19_spill] sm:$0xff] }
 0x183   :  { %v494_v24 = vadd.f32 %v3492_v14, %v3491_v45  ;;  %vm384_vm8 = vcmp.eq.s32.totalorder %v6609_v43, %v4676_v61  ;;  %v4895_v16 = vadd.f32 %v3613_v51, %v1829_v62  ;;  %v3620_v9 = vsel %vm1895_vm4, 1.0, %v6598_v37  ;;  %v6612_v14 = vld [vmem:[#allocation18_spill] sm:$0xff]  ;;  %v6613_v62 = vld [vmem:[#allocation20_spill] sm:$0xff] }
 0x184   :  { %v4846_v31 = vpop.permute.xlu1 %960  ;;  %v4848_v49 = vpop.permute.xlu0 %953  ;;  %v3619_v36 = vsel %vm1894_vm5, 1.0, %v6598_v37  ;;  %v3464_v15 = vsel %vm119_vm7, 1.0, %v6598_v37  ;;  %vm296_vm9 = vcmp.eq.s32.totalorder %v6612_v14, %v4676_v61  ;;  %vm472_vm10 = vcmp.eq.s32.totalorder %v6613_v62, %v4676_v61  ;;  %v6621_v14 = vld [vmem:[#allocation25_spill] sm:$0xff] }
 0x185   :  { %v3486_v45 = vsel %vm384_vm8, 1.0, %v6598_v37  ;;  %v1918_v51 = vadd.f32 %v3620_v9, %v3619_v36  ;;  %vm560_vm12 = vcmp.eq.s32.totalorder %v6615_v40, %v4676_v61  ;;  %vm1720_vm13 = vcmp.eq.s32.totalorder %v6616_v52, %v4676_v61 }
 0x186   :  { %906 = vbcast.lane.b32.xlu1 %v904_v33, 256  ;;  %824 = vbcast.lane.b32.xlu0 %v822_v39, 256  ;;  %v1654_v33 = vadd.f32 %v3599_v26, %v1653_v63  ;;  %v1565_v39 = vadd.f32 %v3591_v32, %v1564_v11  ;;  %v1742_v11 = vadd.f32 %v3606_v2, %v1741_v34  ;;  %v6614_v26 = vld [vmem:[#allocation21_spill] sm:$0xff]  ;;  %v3479_v2 = vsel %vm296_vm9, 1.0, %v6598_v37 }
 0x187   :  { %vm1543_vm11 = vcmp.eq.s32.totalorder %v6614_v26, %v4676_v61  ;;  %v1314_v34 = vrot.slane %v4893_v13, %v3965_v4  ;;  %v1307_v32 = vrot.slane %v4893_v13, %v3962_v3  ;;  %vm559_vm14 = vcmp.eq.s32.totalorder %v6617_v50, %v4676_v61 }
 0x188   :  { %v4870_v35 = vpop.permute.xlu1 %1974  ;;  %v4872_v42 = vpop.permute.xlu0 %1892  ;;  %v4933_v36 = vadd.f32 %v3486_v45, %v406_v5  ;;  %vm1896_vm0 = vcmp.eq.s32.totalorder %v6621_v14, %v4676_v61  ;;  %v3500_v62 = vsel %vm560_vm12, 1.0, %v6598_v37  ;;  %v3607_v40 = vsel %vm1720_vm13, 1.0, %v6598_v37 }
 0x189   :  { %6604 = vst [vmem:[#allocation11_spill] sm:$0xff] %v4870_v35  ;;  %v2328_v52 = vrot.slane %v4427_v58, %v4144_v20  ;;  %v319_v5 = vadd.f32 %v3479_v2, %v318_v30  ;;  %v6622_v58 = vld [vmem:[#allocation26_spill] sm:$0xff]  ;;  %v4966_v50 = vadd.f32 %v3607_v40, %v1742_v11  ;;  %v2410_v14 = vrot.slane %v4501_v23, %v4103_v56 }
 0x18a   :  { %1070 = vbcast.lane.b32.xlu1 %v1068_v60, 256  ;;  %988 = vbcast.lane.b32.xlu0 %v986_v27, 256  ;;  %v3472_v60 = vsel %vm208_vm6, 1.0, %v6598_v37  ;;  %vm1808_vm1 = vcmp.eq.s32.totalorder %v6622_v58, %v4676_v61  ;;  %v6628_v40 = vld [vmem:[#allocation30_spill] sm:$0xff] }
 0x18b   :  { %v231_v57 = vadd.f32 %v3472_v60, %v230_v7  ;;  %v142_v7 = vadd.f32 %v3464_v15, %v141_v38  ;;  %v3592_v60 = vsel %vm1543_vm11, 1.0, %v6598_v37  ;;  %v2246_v38 = vrot.slane %v4353_v22, %v4205_v54  ;;  %v6623_v22 = vld [vmem:[#allocation27_spill] sm:$0xff] }
 0x18c   :  { %v4900_v27 = vpop.permute.xlu1 %2138  ;;  %v4902_v63 = vpop.permute.xlu0 %2056  ;;  %v3499_v15 = vsel %vm559_vm14, 1.0, %v6598_v37  ;;  %vm1984_vm2 = vcmp.eq.s32.totalorder %v6623_v22, %v4676_v61  ;;  %v3614_v11 = vsel %vm1808_vm1, 1.0, %v6598_v37  ;;  %vm120_vm5 = vcmp.eq.s32.totalorder %v6628_v40, %v4676_v61  ;;  %v6634_v22 = vld [vmem:[#allocation34_spill] sm:$0xff] }
 0x18d   :  { %6610 = vst [vmem:[#allocation12_spill] sm:$0xff] %v4900_v27  ;;  %6611 = vst [vmem:[#allocation13_spill] sm:$0xff] %v4902_v63  ;;  %vm473_vm9 = vcmp.eq.s32.totalorder %v6634_v22, %v4676_v61  ;;  %v1831_v40 = vadd.f32 %v3614_v11, %v4895_v16 }
 0x18e   :  { %1234 = vbcast.lane.b32.xlu1 %v1232_v10, 256  ;;  %1152 = vbcast.lane.b32.xlu0 %v1150_v18, 256  ;;  %v3493_v10 = vsel %vm472_vm10, 1.0, %v6598_v37  ;;  %v6618_v18 = vld [vmem:[#allocation24_spill] sm:$0xff]  ;;  %v3494_v11 = vsel %vm473_vm9, 1.0, %v6598_v37 }
 0x18f   :  { %vm1632_vm15 = vcmp.eq.s32.totalorder %v6618_v18, %v4676_v61  ;;  %v495_v45 = vadd.f32 %v3493_v10, %v494_v24  ;;  %v583_v24 = vadd.f32 %v3500_v62, %v3499_v15  ;;  %v6626_v10 = vld [vmem:[#allocation28_spill] sm:$0xff]  ;;  %v3628_v62 = vsel %vm1984_vm2, 1.0, %v6598_v37 }
 0x190   :  { %v4929_v43 = vpop.permute.xlu1 %2302  ;;  %v4931_v9 = vpop.permute.xlu0 %2220  ;;  %v3600_v26 = vsel %vm1632_vm15, 1.0, %v6598_v37  ;;  %vm1983_vm3 = vcmp.eq.s32.totalorder %v6626_v10, %v4676_v61  ;;  %v6630_v15 = vld [vmem:[#allocation32_spill] sm:$0xff]  ;;  %v6635_v10 = vld [vmem:[#allocation35_spill] sm:$0xff] }
 0x191   :  { %6619 = vst [vmem:[#allocation14_spill] sm:$0xff] %v4929_v43  ;;  %6620 = vst [vmem:[#allocation15_spill] sm:$0xff] %v4931_v9  ;;  %v4972_v18 = vadd.f32 %v3600_v26, %v1654_v33  ;;  %v3627_v33 = vsel %vm1983_vm3, 1.0, %v6598_v37  ;;  %vm297_vm7 = vcmp.eq.s32.totalorder %v6630_v15, %v4676_v61  ;;  %vm649_vm10 = vcmp.eq.s32.totalorder %v6635_v10, %v4676_v61  ;;  %v6639_v15 = vld [vmem:[#allocation37_spill] sm:$0xff] }
 0x192   :  { %1316 = vbcast.lane.b32.xlu1 %v1314_v34, 256  ;;  %1309 = vbcast.lane.b32.xlu0 %v1307_v32, 256  ;;  %v4955_v34 = vadd.f32 %v3592_v60, %v1565_v39  ;;  %v3621_v32 = vsel %vm1896_vm0, 1.0, %v6598_v37  ;;  %v6627_v39 = vld [vmem:[#allocation29_spill] sm:$0xff]  ;;  %v2492_v60 = vrot.slane %v4575_v59, %v4066_v41  ;;  %v3480_v16 = vsel %vm297_vm7, 1.0, %v6598_v37 }
 0x193   :  { %vm209_vm4 = vcmp.eq.s32.totalorder %v6627_v39, %v4676_v61  ;;  %v4978_v58 = vadd.f32 %v3621_v32, %v1918_v51  ;;  %v6633_v32 = vld [vmem:[#allocation33_spill] sm:$0xff]  ;;  %v6636_v39 = vld [vmem:[#allocation36_spill] sm:$0xff]  ;;  %vm1633_vm12 = vcmp.eq.s32.totalorder %v6639_v15, %v4676_v61  ;;  %v5042_v15 = vadd.f32 %v3494_v11, %v495_v45  ;;  %v6646_v45 = vld [vmem:[#allocation42_spill] sm:$0xff] }
 0x194   :  { %v4962_v30 = vpop.permute.xlu1 %2384  ;;  %v4964_v2 = vpop.permute.xlu0 %2377  ;;  %vm561_vm8 = vcmp.eq.s32.totalorder %v6633_v32, %v4676_v61  ;;  %vm648_vm11 = vcmp.eq.s32.totalorder %v6636_v39, %v4676_v61  ;;  %v2574_v32 = vrot.slane %v4649_v25, %v4033_v28  ;;  %v6640_v39 = vld [vmem:[#allocation38_spill] sm:$0xff]  ;;  %vm1897_vm1 = vcmp.eq.s32.totalorder %v6646_v45, %v4676_v61 }
 0x195   :  { %6624 = vst [vmem:[#allocation16_spill] sm:$0xff] %v4962_v30  ;;  %6625 = vst [vmem:[#allocation17_spill] sm:$0xff] %v4964_v2  ;;  %v3465_v2 = vsel %vm120_vm5, 1.0, %v6598_v37  ;;  %vm1544_vm13 = vcmp.eq.s32.totalorder %v6640_v39, %v4676_v61  ;;  %v6641_v30 = vld [vmem:[#allocation39_spill] sm:$0xff]  ;;  %v3601_v39 = vsel %vm1633_vm12, 1.0, %v6598_v37  ;;  %v993_v11 = vrot.slane %v4464_v1, %v4144_v20 }
 0x196   :  { %2330 = vbcast.lane.b32.xlu1 %v2328_v52, 256  ;;  %2248 = vbcast.lane.b32.xlu0 %v2246_v38, 256  ;;  %v3473_v52 = vsel %vm209_vm4, 1.0, %v6598_v37  ;;  %v6629_v38 = vld [vmem:[#allocation31_spill] sm:$0xff]  ;;  %vm1809_vm14 = vcmp.eq.s32.totalorder %v6641_v30, %v4676_v61  ;;  %v3593_v30 = vsel %vm1544_vm13, 1.0, %v6598_v37  ;;  %v1157_v45 = vrot.slane %v4612_v0, %v4066_v41 }
 0x197   :  { %vm385_vm6 = vcmp.eq.s32.totalorder %v6629_v38, %v4676_v61  ;;  %v232_v22 = vadd.f32 %v3473_v52, %v231_v57  ;;  %v3508_v57 = vsel %vm649_vm10, 1.0, %v6598_v37  ;;  %v143_v38 = vadd.f32 %v3465_v2, %v142_v7 }
 0x198   :  { %v4990_v26 = vpop.permute.xlu1 %639  ;;  %v4992_v51 = vpop.permute.xlu0 %557  ;;  %v3487_v10 = vsel %vm385_vm6, 1.0, %v6598_v37  ;;  %v320_v2 = vadd.f32 %v3480_v16, %v319_v5  ;;  %v6645_v5 = vld [vmem:[#allocation41_spill] sm:$0xff]  ;;  %v6648_v16 = vld [vmem:[#allocation46_spill] sm:$0xff] }
 0x199   :  { %6631 = vst [vmem:[#allocation18_spill] sm:$0xff] %v4990_v26  ;;  %6632 = vst [vmem:[#allocation20_spill] sm:$0xff] %v4992_v51  ;;  %v2656_v51 = vrot.slane %v4794_v21, %v4004_v17  ;;  %v2007_v26 = vadd.f32 %v3628_v62, %v3627_v33  ;;  %v3507_v62 = vsel %vm648_vm11, 1.0, %v6598_v37  ;;  %v5036_v9 = vadd.f32 %v3487_v10, %v4933_v36 }
 0x19a   :  { %2494 = vbcast.lane.b32.xlu1 %v2492_v60, 256  ;;  %2412 = vbcast.lane.b32.xlu0 %v2410_v14, 256  ;;  %v5019_v60 = vld [vmem:[%s6468_s1 + $0x70] sm:$0xff]  ;;  %v3501_v14 = vsel %vm561_vm8, 1.0, %v6598_v37  ;;  %v5044_v43 = vadd.f32 %v3508_v57, %v3507_v62  ;;  %v3615_v36 = vsel %vm1809_vm14, 1.0, %v6598_v37  ;;  %vm1985_vm0 = vcmp.eq.s32.totalorder %v6645_v5, %v4676_v61 }
 0x19b   :  { %v2731_v7 = vrot.slane %v5019_v60, %v3962_v3  ;;  %vm121_vm3 = vcmp.eq.s32.totalorder %v6648_v16, %v4676_v61  ;;  %v911_v57 = vrot.slane %v4390_v6, %v4205_v54  ;;  %v1656_v62 = vadd.f32 %v3601_v39, %v4972_v18  ;;  %v6654_v39 = vld [vmem:[#allocation48_spill] sm:$0xff] }
 0x19c   :  { %v5025_v33 = vpop.permute.xlu1 %803  ;;  %v5027_v52 = vpop.permute.xlu0 %721  ;;  %v5074_v16 = vadd.f32 %v3615_v36, %v1831_v40  ;;  %v3466_v1 = vsel %vm121_vm3, 1.0, %v6598_v37  ;;  %v6653_v40 = vld [vmem:[#allocation47_spill] sm:$0xff]  ;;  %vm298_vm7 = vcmp.eq.s32.totalorder %v6654_v39, %v4676_v61  ;;  %v6655_v36 = vld [vmem:[#allocation49_spill] sm:$0xff] }
 0x19d   :  { %6637 = vst [vmem:[#allocation21_spill] sm:$0xff] %v5025_v33  ;;  %6638 = vst [vmem:[#allocation22_spill] sm:$0xff] %v5027_v52  ;;  %v2738_v33 = vrot.slane %v5019_v60, %v3965_v4  ;;  %v584_v52 = vadd.f32 %v3501_v14, %v583_v24  ;;  %v6647_v24 = vld [vmem:[#allocation45_spill] sm:$0xff]  ;;  %v6649_v14 = vld [vmem:[#allocation43_spill] sm:$0xff]  ;;  %vm386_vm6 = vcmp.eq.s32.totalorder %v6653_v40, %v4676_v61  ;;  %v3481_v63 = vsel %vm298_vm7, 1.0, %v6598_v37 }
 0x19e   :  { %2658 = vbcast.lane.b32.xlu1 %v2656_v51, 256  ;;  %2576 = vbcast.lane.b32.xlu0 %v2574_v32, 256  ;;  %v6642_v51 = vld [vmem:[#allocation40_spill] sm:$0xff]  ;;  %vm210_vm2 = vcmp.eq.s32.totalorder %v6647_v24, %v4676_v61  ;;  %vm2073_vm4 = vcmp.eq.s32.totalorder %v6649_v14, %v4676_v61  ;;  %vm562_vm8 = vcmp.eq.s32.totalorder %v6655_v36, %v4676_v61 }
 0x19f   :  { %vm1721_vm15 = vcmp.eq.s32.totalorder %v6642_v51, %v4676_v61  ;;  %v1567_v51 = vadd.f32 %v3593_v30, %v4955_v34  ;;  %v6650_v24 = vld [vmem:[#allocation44_spill] sm:$0xff]  ;;  %v3622_v34 = vsel %vm1897_vm1, 1.0, %v6598_v37  ;;  %v3636_v18 = vsel %vm2073_vm4, 1.0, %v6598_v37 }
 0x1a0   :  { %v5051_v32 = vpop.permute.xlu1 %967  ;;  %v5053_v10 = vpop.permute.xlu0 %885  ;;  %v3608_v5 = vsel %vm1721_vm15, 1.0, %v6598_v37  ;;  %vm2072_vm5 = vcmp.eq.s32.totalorder %v6650_v24, %v4676_v61  ;;  %v1075_v14 = vrot.slane %v4538_v46, %v4103_v56  ;;  %v1920_v39 = vadd.f32 %v3622_v34, %v4978_v58  ;;  %v6658_v58 = vld [vmem:[#allocation52_spill] sm:$0xff] }
 0x1a1   :  { %6643 = vst [vmem:[#allocation23_spill] sm:$0xff] %v5051_v32  ;;  %6644 = vst [vmem:[#allocation19_spill] sm:$0xff] %v5053_v10  ;;  %v3635_v30 = vsel %vm2072_vm5, 1.0, %v6598_v37  ;;  %v1744_v24 = vadd.f32 %v3608_v5, %v4966_v50  ;;  %v3488_v32 = vsel %vm386_vm6, 1.0, %v6598_v37  ;;  %v3502_v50 = vsel %vm562_vm8, 1.0, %v6598_v37 }
 0x1a2   :  { %2740 = vbcast.lane.b32.xlu1 %v2738_v33, 256  ;;  %2733 = vbcast.lane.b32.xlu0 %v2731_v7, 256  ;;  %v3629_v33 = vsel %vm1985_vm0, 1.0, %v6598_v37  ;;  %v3474_v7 = vsel %vm210_vm2, 1.0, %v6598_v37  ;;  %v5114_v35 = vadd.f32 %v3636_v18, %v3635_v30  ;;  %vm650_vm10 = vcmp.eq.s32.totalorder %v6658_v58, %v4676_v61  ;;  %v5139_v18 = vld [vmem:[%s6467_s0 + $0x78] sm:$0xff]  ;;  %v6667_v58 = vld [vmem:[#allocation51_spill] sm:$0xff] }
 0x1a3   :  { %v233_v40 = vadd.f32 %v3474_v7, %v232_v22  ;;  %v6660_v22 = vld [vmem:[#allocation53_spill] sm:$0xff]  ;;  %v1239_v5 = vrot.slane %v4691_v29, %v4033_v28  ;;  %v5133_v7 = vadd.f32 %v3488_v32, %v5036_v9  ;;  %v5141_v30 = vadd.f32 %v3502_v50, %v584_v52  ;;  %v6666_v32 = vld [vmem:[#allocation58_spill] sm:$0xff] }
 0x1a4   :  { %v5079_v10 = vpop.permute.xlu1 %1049  ;;  %v5081_v6 = vpop.permute.xlu0 %1042  ;;  %vm1545_vm12 = vcmp.eq.s32.totalorder %v6660_v22, %v4676_v61  ;;  %v3509_v36 = vsel %vm650_vm10, 1.0, %v6598_v37  ;;  %v6665_v52 = vld [vmem:[#allocation57_spill] sm:$0xff]  ;;  %vm1810_vm0 = vcmp.eq.s32.totalorder %v6666_v32, %v4676_v61  ;;  %v1396_v50 = vrot.slane %v5139_v18, %v3962_v3  ;;  %v6670_v32 = vld [vmem:[#allocation59_spill] sm:$0xff] }
 0x1a5   :  { %6651 = vst [vmem:[#allocation24_spill] sm:$0xff] %v5079_v10  ;;  %6652 = vst [vmem:[#allocation25_spill] sm:$0xff] %v5081_v6  ;;  %v5103_v6 = vadd.f32 %v3629_v33, %v2007_v26  ;;  %v144_v10 = vadd.f32 %v3466_v1, %v143_v38  ;;  %v6659_v26 = vld [vmem:[#allocation56_spill] sm:$0xff]  ;;  %v1321_v38 = vrot.slane %v4893_v13, %v4004_v17 }
 0x1a6   :  { %995 = vbcast.lane.b32.xlu1 %v993_v11, 256  ;;  %913 = vbcast.lane.b32.xlu0 %v911_v57, 256  ;;  %v6656_v11 = vld [vmem:[#allocation50_spill] sm:$0xff]  ;;  %vm1634_vm11 = vcmp.eq.s32.totalorder %v6659_v26, %v4676_v61  ;;  %v321_v1 = vadd.f32 %v3481_v63, %v320_v2  ;;  %v3594_v63 = vsel %vm1545_vm12, 1.0, %v6598_v37  ;;  %v6664_v2 = vld [vmem:[#allocation55_spill] sm:$0xff]  ;;  %vm1898_vm15 = vcmp.eq.s32.totalorder %v6665_v52, %v4676_v61 }
 0x1a7   :  { %vm474_vm9 = vcmp.eq.s32.totalorder %v6656_v11, %v4676_v61  ;;  %v5130_v33 = vadd.f32 %v233_v40, %v144_v10  ;;  %v3602_v10 = vsel %vm1634_vm11, 1.0, %v6598_v37  ;;  %vm1722_vm14 = vcmp.eq.s32.totalorder %v6664_v2, %v4676_v61 }
 0x1a8   :  { %v5110_v57 = vpop.permute.xlu1 %2063  ;;  %v5112_v27 = vpop.permute.xlu0 %1981  ;;  %v3495_v34 = vsel %vm474_vm9, 1.0, %v6598_v37  ;;  %v1403_v11 = vrot.slane %v5139_v18, %v3965_v4  ;;  %vm737_vm1 = vcmp.eq.s32.totalorder %v6667_v58, %v4676_v61  ;;  %v5171_v26 = vadd.f32 %v3509_v36, %v5044_v43  ;;  %v6671_v43 = vld [vmem:[#allocation60_spill] sm:$0xff]  ;;  %v3866_v58 = vld [vmem:[%s6468_s1 + $0x48] sm:$0xff] }
 0x1a9   :  { %6657 = vst [vmem:[#allocation26_spill] sm:$0xff] %v5110_v57  ;;  %v5162_v40 = vadd.f32 %v3495_v34, %v5042_v15  ;;  %v1568_v2 = vadd.f32 %v3594_v63, %v1567_v51  ;;  %v3609_v15 = vsel %vm1722_vm14, 1.0, %v6598_v37  ;;  %vm2074_vm2 = vcmp.eq.s32.totalorder %v6670_v32, %v4676_v61  ;;  %v6672_v36 = vld [vmem:[#allocation64_spill] sm:$0xff]  ;;  %v6674_v63 = vld [vmem:[#allocation62_spill] sm:$0xff] }
 0x1aa   :  { %1159 = vbcast.lane.b32.xlu1 %v1157_v45, 256  ;;  %1077 = vbcast.lane.b32.xlu0 %v1075_v14, 256  ;;  %v6661_v45 = vld [vmem:[#allocation54_spill] sm:$0xff]  ;;  %vm1986_vm3 = vcmp.eq.s32.totalorder %v6671_v43, %v4676_v61  ;;  %vm299_vm4 = vcmp.eq.s32.totalorder %v6672_v36, %v4676_v61  ;;  %v3515_v51 = vsel %vm737_vm1, 1.0, %v6598_v37  ;;  %vm2161_vm6 = vcmp.eq.s32.totalorder %v6674_v63, %v4676_v61 }
 0x1ab   :  { %vm738_vm13 = vcmp.eq.s32.totalorder %v6661_v45, %v4676_v61  ;;  %v1657_v45 = vadd.f32 %v3602_v10, %v1656_v62  ;;  %v2417_v62 = vrot.slane %v4501_v23, %v4144_v20  ;;  %v6673_v10 = vld [vmem:[#allocation61_spill] sm:$0xff]  ;;  %v2499_v32 = vrot.slane %v4575_v59, %v4103_v56 }
 0x1ac   :  { %v5147_v14 = vpop.permute.xlu1 %2227  ;;  %v5149_v9 = vpop.permute.xlu0 %2145  ;;  %v3516_v22 = vsel %vm738_vm13, 1.0, %v6598_v37  ;;  %vm2162_vm5 = vcmp.eq.s32.totalorder %v6673_v10, %v4676_v61  ;;  %v6678_v10 = vld [vmem:[#allocation67_spill] sm:$0xff] }
 0x1ad   :  { %6662 = vst [vmem:[#allocation27_spill] sm:$0xff] %v5147_v14  ;;  %6663 = vst [vmem:[#allocation28_spill] sm:$0xff] %v5149_v9  ;;  %v1745_v9 = vadd.f32 %v3609_v15, %v1744_v24  ;;  %v5198_v14 = vadd.f32 %v1657_v45, %v1568_v2  ;;  %v3482_v24 = vsel %vm299_vm4, 1.0, %v6598_v37  ;;  %v3643_v45 = vsel %vm2161_vm6, 1.0, %v6598_v37  ;;  %v6675_v2 = vld [vmem:[#allocation63_spill] sm:$0xff]  ;;  %v6676_v15 = vld [vmem:[#allocation65_spill] sm:$0xff] }
 0x1ae   :  { %1323 = vbcast.lane.b32.xlu1 %v1321_v38, 256  ;;  %1241 = vbcast.lane.b32.xlu0 %v1239_v5, 256  ;;  %v3623_v38 = vsel %vm1898_vm15, 1.0, %v6598_v37  ;;  %v3616_v5 = vsel %vm1810_vm0, 1.0, %v6598_v37  ;;  %vm387_vm7 = vcmp.eq.s32.totalorder %v6675_v2, %v4676_v61  ;;  %vm563_vm8 = vcmp.eq.s32.totalorder %v6676_v15, %v4676_v61  ;;  %v5272_v15 = vld [vmem:[%s6468_s1 + $0x78] sm:$0xff] }
 0x1af   :  { %v5200_v23 = vadd.f32 %v3623_v38, %v1920_v39  ;;  %v1833_v57 = vadd.f32 %v3616_v5, %v5074_v16  ;;  %v3644_v16 = vsel %vm2162_vm5, 1.0, %v6598_v37  ;;  %v6677_v38 = vld [vmem:[#allocation66_spill] sm:$0xff]  ;;  %v2581_v5 = vrot.slane %v4649_v25, %v4066_v41 }
 0x1b0   :  { %v5177_v34 = vpop.permute.xlu1 %2391  ;;  %v5179_v52 = vpop.permute.xlu0 %2309  ;;  %vm475_vm9 = vcmp.eq.s32.totalorder %v6677_v38, %v4676_v61  ;;  %vm739_vm10 = vcmp.eq.s32.totalorder %v6678_v10, %v4676_v61  ;;  %v5245_v63 = vadd.f32 %v3644_v16, %v3643_v45  ;;  %v6685_v16 = vld [vmem:[#allocation71_spill] sm:$0xff]  ;;  %v2745_v45 = vrot.slane %v5019_v60, %v4004_v17 }
 0x1b1   :  { %6668 = vst [vmem:[#allocation29_spill] sm:$0xff] %v5177_v34  ;;  %6669 = vst [vmem:[#allocation30_spill] sm:$0xff] %v5179_v52  ;;  %v2335_v52 = vrot.slane %v3866_v58, %v4205_v54  ;;  %v761_v34 = vadd.f32 %v3516_v22, %v3515_v51  ;;  %v322_v51 = vadd.f32 %v3482_v24, %v321_v1  ;;  %v6679_v58 = vld [vmem:[#allocation68_spill] sm:$0xff]  ;;  %v6682_v1 = vld [vmem:[#allocation69_spill] sm:$0xff]  ;;  %v3517_v24 = vsel %vm739_vm10, 1.0, %v6598_v37 }
 0x1b2   :  { %1405 = vbcast.lane.b32.xlu1 %v1403_v11, 256  ;;  %1398 = vbcast.lane.b32.xlu0 %v1396_v50, 256  ;;  %v3637_v11 = vsel %vm2074_vm2, 1.0, %v6598_v37  ;;  %v3630_v50 = vsel %vm1986_vm3, 1.0, %v6598_v37  ;;  %vm651_vm11 = vcmp.eq.s32.totalorder %v6679_v58, %v4676_v61  ;;  %vm827_vm12 = vcmp.eq.s32.totalorder %v6682_v1, %v4676_v61 }
 0x1b3   :  { %v5238_v43 = vadd.f32 %v3637_v11, %v5114_v35  ;;  %v5241_v36 = vadd.f32 %v3630_v50, %v5103_v6  ;;  %v3496_v6 = vsel %vm475_vm9, 1.0, %v6598_v37  ;;  %v6683_v11 = vld [vmem:[#allocation70_spill] sm:$0xff]  ;;  %v6684_v50 = vld [vmem:[#allocation72_spill] sm:$0xff]  ;;  %vm1811_vm15 = vcmp.eq.s32.totalorder %v6685_v16, %v4676_v61 }
 0x1b4   :  { %v5215_v22 = vpop.permute.xlu1 %2473  ;;  %v5217_v39 = vpop.permute.xlu0 %2466  ;;  %vm826_vm13 = vcmp.eq.s32.totalorder %v6683_v11, %v4676_v61  ;;  %vm1723_vm14 = vcmp.eq.s32.totalorder %v6684_v50, %v4676_v61  ;;  %v2663_v2 = vrot.slane %v4794_v21, %v4033_v28  ;;  %v5276_v10 = vadd.f32 %v322_v51, %v5130_v33 }
 0x1b5   :  { %v3524_v11 = vsel %vm827_vm12, 1.0, %v6598_v37  ;;  %v3523_v50 = vsel %vm826_vm13, 1.0, %v6598_v37  ;;  %v3617_v51 = vsel %vm1811_vm15, 1.0, %v6598_v37  ;;  %vm916_vm12 = vcmp.eq.s32.totalorder %v4667_v48, %v4676_v61 }
 0x1b6   :  { %2419 = vbcast.lane.b32.xlu1 %v2417_v62, 256  ;;  %2337 = vbcast.lane.b32.xlu0 %v2335_v52, 256  ;;  %v3489_v52 = vsel %vm387_vm7, 1.0, %v6598_v37  ;;  %v3503_v62 = vsel %vm563_vm8, 1.0, %v6598_v37  ;;  %v2841_v48 = vrot.slane %v5272_v15, %v4033_v28 }
 0x1b7   :  { %v410_v38 = vadd.f32 %v3489_v52, %v5133_v7  ;;  %v5279_v1 = vadd.f32 %v3503_v62, %v5141_v30  ;;  %v3610_v7 = vsel %vm1723_vm14, 1.0, %v6598_v37  ;;  %v5295_v30 = vadd.f32 %v3517_v24, %v761_v34  ;;  %v6688_v34 = vld [vmem:[#allocation74_spill] sm:$0xff] }
 0x1b8   :  { %v5251_v59 = vpop.permute.xlu1 %728  ;;  %v5253_v35 = vpop.permute.xlu0 %646  ;;  %v2820_v62 = vrot.slane %v5272_v15, %v3962_v3  ;;  %vm1899_vm1 = vcmp.eq.s32.totalorder %v6688_v34, %v4676_v61  ;;  %v5312_v24 = vadd.f32 %v3524_v11, %v3523_v50  ;;  %v1746_v16 = vadd.f32 %v3610_v7, %v1745_v9  ;;  %v3867_v3 = vld [vmem:[%s6467_s0 + $0x50] sm:$0xff]  ;;  %v6694_v50 = vld [vmem:[#allocation77_spill] sm:$0xff]  ;;  %v6695_v7 = vld [vmem:[#allocation78_spill] sm:$0xff] }
 0x1b9   :  { %6680 = vst [vmem:[#allocation31_spill] sm:$0xff] %v5251_v59  ;;  %6681 = vst [vmem:[#allocation32_spill] sm:$0xff] %v5253_v35  ;;  %v1246_v9 = vrot.slane %v4691_v29, %v4066_v41  ;;  %v3624_v11 = vsel %vm1899_vm1, 1.0, %v6598_v37  ;;  %vm2251_vm5 = vcmp.eq.s32.totalorder %v6694_v50, %v4676_v61  ;;  %vm2250_vm6 = vcmp.eq.s32.totalorder %v6695_v7, %v4676_v61 }
 0x1ba   :  { %2583 = vbcast.lane.b32.xlu1 %v2581_v5, 256  ;;  %2501 = vbcast.lane.b32.xlu0 %v2499_v32, 256  ;;  %v3510_v5 = vsel %vm651_vm11, 1.0, %v6598_v37  ;;  %v5286_v32 = vadd.f32 %v3496_v6, %v5162_v40  ;;  %v2827_v40 = vrot.slane %v5272_v15, %v3965_v4  ;;  %v6687_v6 = vld [vmem:[#allocation73_spill] sm:$0xff]  ;;  %v1082_v4 = vrot.slane %v4538_v46, %v4144_v20 }
 0x1bb   :  { %v5306_v58 = vadd.f32 %v3510_v5, %v5171_v26  ;;  %vm1987_vm0 = vcmp.eq.s32.totalorder %v6687_v6, %v4676_v61  ;;  %v1000_v26 = vrot.slane %v3867_v3, %v4205_v54  ;;  %v5320_v5 = vadd.f32 %v3617_v51, %v1833_v57  ;;  %v6689_v6 = vld [vmem:[#allocation75_spill] sm:$0xff]  ;;  %v6692_v3 = vld [vmem:[#allocation76_spill] sm:$0xff] }
 0x1bc   :  { %v5291_v52 = vpop.permute.xlu1 %892  ;;  %v5293_v33 = vpop.permute.xlu0 %810  ;;  %vm2163_vm2 = vcmp.eq.s32.totalorder %v6689_v6, %v4676_v61  ;;  %v1164_v46 = vrot.slane %v4612_v0, %v4103_v56  ;;  %vm2075_vm3 = vcmp.eq.s32.totalorder %v6692_v3, %v4676_v61  ;;  %v6693_v57 = vld [vmem:[#allocation80_spill] sm:$0xff]  ;;  %v1410_v0 = vrot.slane %v5139_v18, %v4004_v17  ;;  %v6696_v3 = vld [vmem:[#allocation79_spill] sm:$0xff] }
 0x1bd   :  { %6686 = vst [vmem:[#allocation33_spill] sm:$0xff] %v5291_v52  ;;  %vm388_vm4 = vcmp.eq.s32.totalorder %v6693_v57, %v4676_v61  ;;  %v5345_v51 = vadd.f32 %v1746_v16, %v5198_v14  ;;  %v3645_v6 = vsel %vm2163_vm2, 1.0, %v6598_v37  ;;  %vm476_vm7 = vcmp.eq.s32.totalorder %v6696_v3, %v4676_v61 }
 0x1be   :  { %2747 = vbcast.lane.b32.xlu1 %v2745_v45, 256  ;;  %2665 = vbcast.lane.b32.xlu0 %v2663_v2, 256  ;;  %v3631_v2 = vsel %vm1987_vm0, 1.0, %v6598_v37  ;;  %v1328_v57 = vrot.slane %v4893_v13, %v4033_v28  ;;  %v3490_v7 = vsel %vm388_vm4, 1.0, %v6598_v37  ;;  %v3652_v52 = vsel %vm2251_vm5, 1.0, %v6598_v37 }
 0x1bf   :  { %v5353_v50 = vadd.f32 %v3631_v2, %v5241_v36  ;;  %v3651_v3 = vsel %vm2250_vm6, 1.0, %v6598_v37  ;;  %v5369_v36 = vld [vmem:[%s6468_s1 + $0x58] sm:$0xff]  ;;  %v5376_v2 = vld [vmem:[%s6468_s1 + $0x50] sm:$0xff]  ;;  %v5381_v35 = vadd.f32 %v3645_v6, %v5245_v63  ;;  %v3497_v59 = vsel %vm476_vm7, 1.0, %v6598_v37 }
 0x1c0   :  { %v5324_v34 = vpop.permute.xlu1 %1056  ;;  %v5326_v45 = vpop.permute.xlu0 %974  ;;  %v5395_v6 = vadd.f32 %v3652_v52, %v3651_v3  ;;  %v5427_v3 = vld [vmem:[%s6467_s0 + $0x60] sm:$0xff]  ;;  %vm2340_vm4 = vcmp.eq.s32.totalorder %v4742_v55, %v4676_v61  ;;  %vm2339_vm5 = vcmp.eq.s32.totalorder %v4744_v47, %v4676_v61  ;;  %vm477_vm6 = vcmp.eq.s32.totalorder %v4779_v44, %v4676_v61  ;;  %v5565_v47 = vld [vmem:[%s6467_s0 + $0x68] sm:$0xff] }
 0x1c1   :  { %6690 = vst [vmem:[#allocation34_spill] sm:$0xff] %v5324_v34  ;;  %6691 = vst [vmem:[#allocation35_spill] sm:$0xff] %v5326_v45  ;;  %v411_v45 = vadd.f32 %v3490_v7, %v410_v38  ;;  %v6701_v34 = vld [vmem:[#allocation83_spill] sm:$0xff]  ;;  %v5408_v38 = vadd.f32 %v3497_v59, %v5286_v32  ;;  %v6716_v55 = vrot.slane %v4649_v25, %v4103_v56  ;;  %v6746_v44 = vld [vmem:[#allocation29_spill] sm:$0xff] }
 0x1c2   :  { %2829 = vbcast.lane.b32.xlu1 %v2827_v40, 256  ;;  %2822 = vbcast.lane.b32.xlu0 %v2820_v62, 256  ;;  %v5356_v40 = vadd.f32 %v3624_v11, %v5200_v23  ;;  %v3638_v62 = vsel %vm2075_vm3, 1.0, %v6598_v37  ;;  %vm828_vm10 = vcmp.eq.s32.totalorder %v6701_v34, %v4676_v61  ;;  %v6703_v34 = vld [vmem:[#allocation85_spill] sm:$0xff]  ;;  %v6704_v7 = vld [vmem:[#allocation87_spill] sm:$0xff]  ;;  %v6747_v11 = vld [vmem:[#allocation30_spill] sm:$0xff] }
 0x1c3   :  { %v5389_v23 = vadd.f32 %v3638_v62, %v5238_v43  ;;  %v6702_v62 = vld [vmem:[#allocation84_spill] sm:$0xff]  ;;  %vm915_vm13 = vcmp.eq.s32.totalorder %v6703_v34, %v4676_v61  ;;  %vm1812_vm14 = vcmp.eq.s32.totalorder %v6704_v7, %v4676_v61  ;;  %v5421_v59 = vadd.f32 %v411_v45, %v5276_v10  ;;  %v6711_v7 = vld [vmem:[#allocation91_spill] sm:$0xff] }
 0x1c4   :  { %v5360_v14 = vpop.permute.xlu1 %1138  ;;  %v5362_v16 = vpop.permute.xlu0 %1131  ;;  %vm740_vm11 = vcmp.eq.s32.totalorder %v6702_v62, %v4676_v61  ;;  %v3525_v32 = vsel %vm828_vm10, 1.0, %v6598_v37  ;;  %v5434_v43 = vld [vmem:[%s6467_s0 + $0x58] sm:$0xff]  ;;  %vm2164_vm3 = vcmp.eq.s32.totalorder %v6711_v7, %v4676_v61  ;;  %v3498_v7 = vsel %vm477_vm6, 1.0, %v6598_v37 }
 0x1c5   :  { %6697 = vst [vmem:[#allocation36_spill] sm:$0xff] %v5360_v14  ;;  %6698 = vst [vmem:[#allocation37_spill] sm:$0xff] %v5362_v16  ;;  %v6699_v16 = vld [vmem:[#allocation81_spill] sm:$0xff]  ;;  %v6700_v14 = vld [vmem:[#allocation82_spill] sm:$0xff]  ;;  %vm917_vm10 = vcmp.eq.s32.totalorder %v4827_v12, %v4676_v61  ;;  %v6717_v12 = vrot.slane %v5272_v15, %v4004_v17  ;;  %v6748_v17 = vrot.slane %v5019_v60, %v4066_v41 }
 0x1c6   :  { %vm652_vm8 = vcmp.eq.s32.totalorder %v6699_v16, %v4676_v61  ;;  %vm564_vm9 = vcmp.eq.s32.totalorder %v6700_v14, %v4676_v61  ;;  %1084 = vbcast.lane.b32.xlu1 %v1082_v4, 256  ;;  %1002 = vbcast.lane.b32.xlu0 %v1000_v26, 256  ;;  %v6706_v62 = vld [vmem:[#allocation88_spill] sm:$0xff] }
 0x1c7   :  { %v3511_v26 = vsel %vm652_vm8, 1.0, %v6598_v37  ;;  %v3504_v52 = vsel %vm564_vm9, 1.0, %v6598_v37  ;;  %vm2076_vm0 = vcmp.eq.s32.totalorder %v6706_v62, %v4676_v61  ;;  %v6708_v62 = vld [vmem:[#allocation90_spill] sm:$0xff]  ;;  %vm741_vm8 = vcmp.eq.s32.totalorder %v4801_v53, %v4676_v61 }
 0x1c8   :  { %v5399_v16 = vpop.permute.xlu1 %2152  ;;  %v5401_v14 = vpop.permute.xlu0 %2070  ;;  %v5439_v10 = vadd.f32 %v3511_v26, %v5306_v58  ;;  %v5442_v45 = vadd.f32 %v3504_v52, %v5279_v1  ;;  %v3531_v1 = vsel %vm915_vm13, 1.0, %v6598_v37  ;;  %v6705_v58 = vld [vmem:[#allocation86_spill] sm:$0xff]  ;;  %v3618_v26 = vsel %vm1812_vm14, 1.0, %v6598_v37 }
 0x1c9   :  { %vm1900_vm15 = vcmp.eq.s32.totalorder %v6705_v58, %v4676_v61  ;;  %v5466_v52 = vadd.f32 %v3525_v32, %v5312_v24  ;;  %v6707_v58 = vld [vmem:[#allocation89_spill] sm:$0xff]  ;;  %vm2252_vm2 = vcmp.eq.s32.totalorder %v6708_v62, %v4676_v61  ;;  %v6712_v62 = vrot.slane %v5369_v36, %v4144_v20 }
 0x1ca   :  { %1248 = vbcast.lane.b32.xlu1 %v1246_v9, 256  ;;  %1166 = vbcast.lane.b32.xlu0 %v1164_v46, 256  ;;  %v3518_v46 = vsel %vm740_vm11, 1.0, %v6598_v37  ;;  %v3532_v9 = vsel %vm916_vm12, 1.0, %v6598_v37  ;;  %vm1988_vm1 = vcmp.eq.s32.totalorder %v6707_v58, %v4676_v61  ;;  %v3639_v58 = vsel %vm2076_vm0, 1.0, %v6598_v37 }
 0x1cb   :  { %v5473_v34 = vadd.f32 %v3518_v46, %v5295_v30  ;;  %v5481_v32 = vadd.f32 %v3532_v9, %v3531_v1  ;;  %v5499_v1 = vld [vmem:[%s6468_s1 + $0x60] sm:$0xff]  ;;  %v6713_v9 = vrot.slane %v5376_v2, %v4205_v54  ;;  %v3653_v24 = vsel %vm2252_vm2, 1.0, %v6598_v37 }
 0x1cc   :  { %v5445_v4 = vpop.permute.xlu1 %2316  ;;  %v5447_v63 = vpop.permute.xlu0 %2234  ;;  %v3646_v2 = vsel %vm2164_vm3, 1.0, %v6598_v37  ;;  %vm653_vm9 = vcmp.eq.s32.totalorder %v4803_v8, %v4676_v61  ;;  %vm1901_vm11 = vcmp.eq.s32.totalorder %v4872_v42, %v4676_v61  ;;  %vm829_vm12 = vcmp.eq.s32.totalorder %v4829_v19, %v4676_v61  ;;  %v6721_v19 = vld [vmem:[#allocation12_spill] sm:$0xff]  ;;  %v6722_v8 = vld [vmem:[#allocation13_spill] sm:$0xff] }
 0x1cd   :  { %vm1005_vm13 = vcmp.eq.s32.totalorder %v4846_v31, %v4676_v61  ;;  %vm1004_vm14 = vcmp.eq.s32.totalorder %v4848_v49, %v4676_v61  ;;  %v3626_v31 = vsel %vm1901_vm11, 1.0, %v6598_v37  ;;  %vm2165_vm0 = vcmp.eq.s32.totalorder %v6721_v19, %v4676_v61 }
 0x1ce   :  { %1412 = vbcast.lane.b32.xlu1 %v1410_v0, 256  ;;  %1330 = vbcast.lane.b32.xlu0 %v1328_v57, 256  ;;  %v3625_v0 = vsel %vm1900_vm15, 1.0, %v6598_v37  ;;  %v1835_v57 = vadd.f32 %v3618_v26, %v5320_v5  ;;  %v3632_v26 = vsel %vm1988_vm1, 1.0, %v6598_v37  ;;  %v3539_v42 = vsel %vm1004_vm14, 1.0, %v6598_v37 }
 0x1cf   :  { %v1923_v5 = vadd.f32 %v3625_v0, %v5356_v40  ;;  %v6714_v40 = vld [vmem:[#allocation92_spill] sm:$0xff]  ;;  %vm2077_vm1 = vcmp.eq.s32.totalorder %v6722_v8, %v4676_v61  ;;  %v6723_v53 = vrot.slane %v5427_v3, %v4144_v20  ;;  %v6727_v8 = vrot.slane %v4893_v13, %v4066_v41 }
 0x1d0   :  { %v5487_v30 = vpop.permute.xlu1 %2480  ;;  %v5489_v46 = vpop.permute.xlu0 %2398  ;;  %vm565_vm7 = vcmp.eq.s32.totalorder %v6714_v40, %v4676_v61 }
 0x1d1   :  { %6709 = vst [vmem:[#allocation38_spill] sm:$0xff] %v5487_v30  ;;  %6710 = vst [vmem:[#allocation39_spill] sm:$0xff] %v5489_v46  ;;  %v5523_v46 = vadd.f32 %v1835_v57, %v5345_v51  ;;  %v5526_v30 = vadd.f32 %v3639_v58, %v5389_v23  ;;  %v3660_v51 = vsel %vm2340_vm4, 1.0, %v6598_v37  ;;  %v3659_v23 = vsel %vm2339_vm5, 1.0, %v6598_v37 }
 0x1d2   :  { %2508 = vbcast.lane.b32.xlu1 %v6712_v62, 256  ;;  %2426 = vbcast.lane.b32.xlu0 %v6713_v9, 256  ;;  %v5539_v62 = vadd.f32 %v3632_v26, %v5353_v50  ;;  %v5554_v57 = vadd.f32 %v3653_v24, %v5395_v6  ;;  %v6715_v50 = vrot.slane %v4794_v21, %v4066_v41  ;;  %v3505_v58 = vsel %vm565_vm7, 1.0, %v6598_v37 }
 0x1d3   :  { %v2187_v24 = vadd.f32 %v3646_v2, %v5381_v35  ;;  %v5577_v25 = vadd.f32 %v3660_v51, %v3659_v23  ;;  %v500_v26 = vadd.f32 %v3498_v7, %v5408_v38  ;;  %v5597_v38 = vadd.f32 %v3505_v58, %v5442_v45 }
 0x1d4   :  { %v5534_v0 = vpop.permute.xlu1 %2562  ;;  %v5536_v9 = vpop.permute.xlu0 %2555  ;;  %v3519_v2 = vsel %vm741_vm8, 1.0, %v6598_v37  ;;  %v3512_v51 = vsel %vm653_vm9, 1.0, %v6598_v37  ;;  %v6718_v23 = vrot.slane %v5019_v60, %v4033_v28  ;;  %v3533_v58 = vsel %vm917_vm10, 1.0, %v6598_v37 }
 0x1d5   :  { %v5618_v7 = vadd.f32 %v500_v26, %v5421_v59  ;;  %v5632_v45 = vadd.f32 %v3519_v2, %v5473_v34  ;;  %v5635_v59 = vadd.f32 %v3512_v51, %v5439_v10  ;;  %v3526_v26 = vsel %vm829_vm12, 1.0, %v6598_v37 }
 0x1d6   :  { %2672 = vbcast.lane.b32.xlu1 %v6715_v50, 256  ;;  %2590 = vbcast.lane.b32.xlu0 %v6716_v55, 256  ;;  %v6724_v10 = vrot.slane %v5434_v43, %v4205_v54  ;;  %v5653_v2 = vadd.f32 %v3533_v58, %v5481_v32  ;;  %v1924_v19 = vadd.f32 %v3626_v31, %v1923_v5  ;;  %v3640_v5 = vsel %vm2077_vm1, 1.0, %v6598_v37  ;;  %v6725_v31 = vld [vmem:[#allocation14_spill] sm:$0xff]  ;;  %v6734_v32 = vld [vmem:[#allocation20_spill] sm:$0xff] }
 0x1d7   :  { %6719 = vst [vmem:[#allocation40_spill] sm:$0xff] %v5618_v7  ;;  %v5659_v35 = vadd.f32 %v3526_v26, %v5466_v52  ;;  %vm2341_vm2 = vcmp.eq.s32.totalorder %v6725_v31, %v4676_v61  ;;  %v6726_v52 = vld [vmem:[#allocation15_spill] sm:$0xff]  ;;  %vm566_vm9 = vcmp.eq.s32.totalorder %v6734_v32, %v4676_v61  ;;  %vm1990_vm10 = vcmp.eq.s32.totalorder %v5112_v27, %v4676_v61  ;;  %v6738_v27 = vld [vmem:[#allocation24_spill] sm:$0xff] }
 0x1d8   :  { %v5580_v40 = vpop.permute.xlu1 %817  ;;  %v5582_v50 = vpop.permute.xlu0 %735  ;;  %vm2253_vm3 = vcmp.eq.s32.totalorder %v6726_v52, %v4676_v61  ;;  %v5689_v31 = vadd.f32 %v1924_v19, %v5523_v46  ;;  %v6730_v19 = vld [vmem:[#allocation17_spill] sm:$0xff]  ;;  %v6732_v46 = vrot.slane %v5369_v36, %v4205_v54  ;;  %v6737_v32 = vld [vmem:[#allocation23_spill] sm:$0xff]  ;;  %vm1094_vm14 = vcmp.eq.s32.totalorder %v6738_v27, %v4676_v61  ;;  %v6742_v27 = vld [vmem:[#allocation26_spill] sm:$0xff] }
 0x1d9   :  { %vm2428_vm5 = vcmp.eq.s32.totalorder %v6730_v19, %v4676_v61 }
 0x1da   :  { %2836 = vbcast.lane.b32.xlu1 %v6717_v12, 256  ;;  %2754 = vbcast.lane.b32.xlu0 %v6718_v23, 256  ;;  %v6720_v12 = vld [vmem:[#allocation11_spill] sm:$0xff] }
 0x1db   :  { %vm1989_vm15 = vcmp.eq.s32.totalorder %v6720_v12, %v4676_v61  ;;  %v3540_v12 = vsel %vm1005_vm13, 1.0, %v6598_v37  ;;  %vm1006_vm13 = vcmp.eq.s32.totalorder %v6737_v32, %v4676_v61  ;;  %v5763_v32 = vsel %vm566_vm9, 1.0, %v6598_v37 }
 0x1dc   :  { %v5627_v49 = vpop.permute.xlu1 %981  ;;  %v5629_v23 = vpop.permute.xlu0 %899  ;;  %v3633_v51 = vsel %vm1989_vm15, 1.0, %v6598_v37  ;;  %v5670_v58 = vadd.f32 %v3540_v12, %v3539_v42 }
 0x1dd   :  { %v2012_v26 = vadd.f32 %v3633_v51, %v5539_v62 }
 0x1de   :  { %1173 = vbcast.lane.b32.xlu1 %v6723_v53, 256  ;;  %1091 = vbcast.lane.b32.xlu0 %v6724_v10, 256  ;;  %v3647_v53 = vsel %vm2165_vm0, 1.0, %v6598_v37  ;;  %v6728_v10 = vrot.slane %v4691_v29, %v4103_v56  ;;  %v5698_v29 = vadd.f32 %v3640_v5, %v5526_v30  ;;  %v6731_v30 = vld [vmem:[#allocation18_spill] sm:$0xff]  ;;  %vm2078_vm0 = vcmp.eq.s32.totalorder %v6742_v27, %v4676_v61  ;;  %v6744_v27 = vld [vmem:[#allocation27_spill] sm:$0xff] }
 0x1df   :  { %v5691_v52 = vadd.f32 %v3647_v53, %v2187_v24  ;;  %v6729_v24 = vld [vmem:[#allocation16_spill] sm:$0xff]  ;;  %vm654_vm8 = vcmp.eq.s32.totalorder %v6731_v30, %v4676_v61  ;;  %v6741_v30 = vrot.slane %v5499_v1, %v4144_v20  ;;  %vm2254_vm1 = vcmp.eq.s32.totalorder %v6744_v27, %v4676_v61 }
 0x1e0   :  { %v5662_v55 = vpop.permute.xlu1 %1145  ;;  %v5664_v43 = vpop.permute.xlu0 %1063  ;;  %vm2429_vm4 = vcmp.eq.s32.totalorder %v6729_v24, %v4676_v61  ;;  %v6733_v24 = vrot.slane %v5139_v18, %v4033_v28 }
 0x1e1   :  { %v3668_v36 = vsel %vm2429_vm4, 1.0, %v6598_v37  ;;  %vm2342_vm4 = vcmp.eq.s32.totalorder %v6747_v11, %v4676_v61  ;;  %v6752_v11 = vrot.slane %v5427_v3, %v4205_v54 }
 0x1e2   :  { %1337 = vbcast.lane.b32.xlu1 %v6727_v8, 256  ;;  %1255 = vbcast.lane.b32.xlu0 %v6728_v10, 256  ;;  %v3661_v8 = vsel %vm2341_vm2, 1.0, %v6598_v37  ;;  %v3654_v10 = vsel %vm2253_vm3, 1.0, %v6598_v37  ;;  %vm2430_vm3 = vcmp.eq.s32.totalorder %v6746_v44, %v4676_v61  ;;  %v6750_v44 = vld [vmem:[#allocation34_spill] sm:$0xff] }
 0x1e3   :  { %v2276_v19 = vadd.f32 %v3654_v10, %v5554_v57  ;;  %v3513_v57 = vsel %vm654_vm8, 1.0, %v6598_v37  ;;  %v6736_v10 = vld [vmem:[#allocation22_spill] sm:$0xff]  ;;  %vm2517_vm8 = vcmp.eq.s32.totalorder %v5217_v39, %v4676_v61  ;;  %vm1095_vm9 = vcmp.eq.s32.totalorder %v6750_v44, %v4676_v61 }
 0x1e4   :  { %v1228_v12 = vpop.permute.xlu1 %1227  ;;  %v1221_v42 = vpop.permute.xlu0 %1220  ;;  %vm742_vm12 = vcmp.eq.s32.totalorder %v6736_v10, %v4676_v61  ;;  %v5769_v62 = vadd.f32 %v3513_v57, %v5635_v59  ;;  %v6745_v59 = vld [vmem:[#allocation28_spill] sm:$0xff]  ;;  %v3641_v57 = vsel %vm2078_vm0, 1.0, %v6598_v37  ;;  %v6754_v39 = vrot.slane %v5139_v18, %v4066_v41 }
 0x1e5   :  { %vm1272_vm6 = vcmp.eq.s32.totalorder %v1228_v12, %v4676_v61  ;;  %vm1271_vm7 = vcmp.eq.s32.totalorder %v1221_v42, %v4676_v61  ;;  %v5723_v42 = vadd.f32 %v3661_v8, %v5577_v25  ;;  %v6735_v8 = vld [vmem:[#allocation21_spill] sm:$0xff]  ;;  %v3520_v12 = vsel %vm742_vm12, 1.0, %v6598_v37 }
 0x1e6   :  { %v3564_v53 = vsel %vm1272_vm6, 1.0, %v6598_v37  ;;  %v3563_v5 = vsel %vm1271_vm7, 1.0, %v6598_v37  ;;  %2515 = vbcast.lane.b32.xlu1 %v6732_v46, 256  ;;  %1419 = vbcast.lane.b32.xlu0 %v6733_v24, 256  ;;  %v3667_v46 = vsel %vm2428_vm5, 1.0, %v6598_v37  ;;  %vm830_vm11 = vcmp.eq.s32.totalorder %v6735_v8, %v4676_v61  ;;  %6743 = vst [vmem:[#allocation41_spill] sm:$0xff] %v5769_v62 }
 0x1e7   :  { %v5726_v51 = vadd.f32 %v3564_v53, %v3563_v5  ;;  %v6739_v53 = vld [vmem:[#allocation25_spill] sm:$0xff]  ;;  %v6740_v5 = vrot.slane %v4794_v21, %v4103_v56  ;;  %v2452_v10 = vadd.f32 %v3668_v36, %v3667_v46  ;;  %v3548_v46 = vsel %vm1094_vm14, 1.0, %v6598_v37 }
 0x1e8   :  { %v5736_v24 = vpop.permute.xlu1 %2241  ;;  %v5738_v25 = vpop.permute.xlu0 %2159  ;;  %vm1093_vm15 = vcmp.eq.s32.totalorder %v6739_v53, %v4676_v61  ;;  %v3634_v53 = vsel %vm1990_vm10, 1.0, %v6598_v37  ;;  %vm2166_vm2 = vcmp.eq.s32.totalorder %v6745_v59, %v4676_v61  ;;  %v5797_v59 = vadd.f32 %v3520_v12, %v5632_v45 }
 0x1e9   :  { %v3547_v8 = vsel %vm1093_vm15, 1.0, %v6598_v37  ;;  %v2013_v6 = vadd.f32 %v3634_v53, %v2012_v26  ;;  %v6749_v53 = vld [vmem:[#allocation19_spill] sm:$0xff]  ;;  %v3655_v62 = vsel %vm2254_vm1, 1.0, %v6598_v37  ;;  %v3648_v28 = vsel %vm2166_vm2, 1.0, %v6598_v37 }
 0x1ea   :  { %2679 = vbcast.lane.b32.xlu1 %v6740_v5, 256  ;;  %2597 = vbcast.lane.b32.xlu0 %v6741_v30, 256  ;;  %v3527_v5 = vsel %vm830_vm11, 1.0, %v6598_v37  ;;  %v3541_v30 = vsel %vm1006_vm13, 1.0, %v6598_v37  ;;  %vm918_vm5 = vcmp.eq.s32.totalorder %v6749_v53, %v4676_v61  ;;  %v1117_v7 = vadd.f32 %v3548_v46, %v3547_v8 }
 0x1eb   :  { %v853_v27 = vadd.f32 %v3527_v5, %v5659_v35  ;;  %v1029_v26 = vadd.f32 %v3541_v30, %v5670_v58  ;;  %vm831_vm6 = vcmp.eq.s32.totalorder %v5293_v33, %v4676_v61  ;;  %v3794_v35 = vld [vmem:[#allocation4] sm:$0xff]   ;;  %v5811_v45 = vadd.f32 %v3641_v57, %v5698_v29  ;;  %v3795_v33 = vld [vmem:[#allocation4 + $0x8] sm:$0xff]  }
 0x1ec   :  { %v5774_v34 = vpop.permute.xlu1 %2405  ;;  %v5776_v36 = vpop.permute.xlu0 %2323  ;;  %v3669_v58 = vsel %vm2430_vm3, 1.0, %v6598_v37  ;;  %v3662_v12 = vsel %vm2342_vm4, 1.0, %v6598_v37  ;;  %vm2518_vm7 = vcmp.eq.s32.totalorder %v5215_v22, %v4676_v61  ;;  %v5824_v8 = vsel %vm918_vm5, 1.0, %v6598_v37  ;;  %3766 = vmatpush3.bf16.msra.mxu0 %v3794_v35 }
 0x1ed   :  { %v5827_v5 = vadd.f32 %v2013_v6, %v5689_v31  ;;  %v6751_v29 = vrot.slane %v5565_v47, %v4144_v20  ;;  %v5839_v22 = vadd.f32 %v3655_v62, %v2276_v19  ;;  %v5842_v30 = vadd.f32 %v3648_v28, %v5691_v52  ;;  %v6753_v62 = vld [vmem:[#allocation35_spill] sm:$0xff]  ;;  %3767 = vmatprep.subr.bf16.mxu0 %v6598_v37 }
 0x1ee   :  { %2843 = vbcast.lane.b32.xlu1 %v2841_v48, 256  ;;  %2761 = vbcast.lane.b32.xlu0 %v6748_v17, 256  ;;  %v3528_v6 = vsel %vm831_vm6, 1.0, %v6598_v37  ;;  %vm832_vm10 = vcmp.eq.s32.totalorder %v5580_v40, %v4676_v61  ;;  %v5850_v31 = vadd.f32 %v3669_v58, %v2452_v10  ;;  %v5853_v46 = vadd.f32 %v3662_v12, %v5723_v42 }
 0x1ef   :  { %v3676_v3 = vsel %vm2518_vm7, 1.0, %v6598_v37  ;;  %vm1007_vm11 = vcmp.eq.s32.totalorder %v6753_v62, %v4676_v61  ;;  %v3675_v40 = vsel %vm2517_vm8, 1.0, %v6598_v37  ;;  %v3549_v42 = vsel %vm1095_vm9, 1.0, %v6598_v37  ;;  %v3796_v62 = vld [vmem:[#allocation4 + $0x10] sm:$0xff]  }
 0x1f0   :  { %v5806_v48 = vpop.permute.xlu1 %2569  ;;  %v5808_v17 = vpop.permute.xlu0 %2487  ;;  %v854_v19 = vadd.f32 %v3528_v6, %v853_v27  ;;  %v3529_v10 = vsel %vm832_vm10, 1.0, %v6598_v37  ;;  %v6755_v35 = vrot.slane %v4893_v13, %v4103_v56  ;;  %v3542_v58 = vsel %vm1007_vm11, 1.0, %v6598_v37  ;;  %3768 = vmatpush3.bf16.msra.mxu0 %v3795_v33 }
 0x1f1   :  { %vm1008_vm14 = vcmp.eq.s32.totalorder %v5627_v49, %v4676_v61  ;;  %vm1096_vm15 = vcmp.eq.s32.totalorder %v5664_v43, %v4676_v61  ;;  %v5885_v12 = vadd.f32 %v3676_v3, %v3675_v40  ;;  %v1118_v44 = vadd.f32 %v3549_v42, %v1117_v7  ;;  %3769 = vmatprep.subr.bf16.mxu0 %v6598_v37 }
 0x1f2   :  { %1262 = vbcast.lane.b32.xlu1 %v6751_v29, 256  ;;  %1180 = vbcast.lane.b32.xlu0 %v6752_v11, 256  ;;  %v6756_v29 = vld [vmem:[#allocation36_spill] sm:$0xff]  ;;  %vm2079_vm1 = vcmp.eq.s32.totalorder %v5401_v14, %v4676_v61  ;;  %vm2167_vm3 = vcmp.eq.s32.totalorder %v5399_v16, %v4676_v61  ;;  %v855_v3 = vadd.f32 %v3529_v10, %v854_v19  ;;  %v3550_v33 = vsel %vm1096_vm15, 1.0, %v6598_v37  ;;  %v3797_v14 = vld [vmem:[#allocation4 + $0x18] sm:$0xff]  }
 0x1f3   :  { %vm1183_vm0 = vcmp.eq.s32.totalorder %v6756_v29, %v4676_v61  ;;  %v1030_v7 = vadd.f32 %v3542_v58, %v1029_v26  ;;  %v6758_v42 = vrot.slane %v4794_v21, %v4144_v20  ;;  %v6759_v16 = vrot.slane %v5499_v1, %v4205_v54 }
 0x1f4   :  { %v2652_v28 = vpop.permute.xlu1 %2651  ;;  %v2645_v52 = vpop.permute.xlu0 %2644  ;;  %v3556_v49 = vsel %vm1183_vm0, 1.0, %v6598_v37  ;;  %v3642_v43 = vsel %vm2079_vm1, 1.0, %v6598_v37  ;;  %vm1184_vm5 = vcmp.eq.s32.totalorder %v5662_v55, %v4676_v61  ;;  %3770 = vmatpush3.bf16.msra.mxu0 %v3796_v62  ;;  %v3649_v1 = vsel %vm2167_vm3, 1.0, %v6598_v37 }
 0x1f5   :  { %vm2696_vm12 = vcmp.eq.s32.totalorder %v2652_v28, %v4676_v61  ;;  %vm2695_vm13 = vcmp.eq.s32.totalorder %v2645_v52, %v4676_v61  ;;  %v6757_v28 = vld [vmem:[#allocation37_spill] sm:$0xff]  ;;  %v3543_v52 = vsel %vm1008_vm14, 1.0, %v6598_v37  ;;  %vm2343_vm6 = vcmp.eq.s32.totalorder %v5445_v4, %v4676_v61  ;;  %3771 = vmatprep.subr.bf16.mxu0 %v6598_v37 }
 0x1f6   :  { %v3692_v57 = vsel %vm2696_vm12, 1.0, %v6598_v37  ;;  %v3691_v53 = vsel %vm2695_vm13, 1.0, %v6598_v37  ;;  %1426 = vbcast.lane.b32.xlu1 %v6754_v39, 256  ;;  %1344 = vbcast.lane.b32.xlu0 %v6755_v35, 256  ;;  %vm1182_vm2 = vcmp.eq.s32.totalorder %v6757_v28, %v4676_v61  ;;  %vm2255_vm7 = vcmp.eq.s32.totalorder %v5447_v63, %v4676_v61 }
 0x1f7   :  { %v5883_v27 = vadd.f32 %v3692_v57, %v3691_v53  ;;  %v3555_v19 = vsel %vm1182_vm2, 1.0, %v6598_v37  ;;  %v1031_v53 = vadd.f32 %v3543_v52, %v1030_v7  ;;  %v1119_v39 = vadd.f32 %v3550_v33, %v1118_v44  ;;  %v6762_v33 = vld [vmem:[#allocation38_spill] sm:$0xff] }
 0x1f8   :  { %v5891_v11 = vpop.permute.xlu1 %906  ;;  %v825_v6 = vpop.permute.xlu0 %824  ;;  %v2102_v35 = vadd.f32 %v3642_v43, %v5811_v45  ;;  %v3557_v58 = vsel %vm1184_vm5, 1.0, %v6598_v37  ;;  %v6760_v62 = vrot.slane %v5272_v15, %v4066_v41  ;;  %v6761_v44 = vrot.slane %v5019_v60, %v4103_v56  ;;  %3772 = vmatpush3.bf16.msra.mxu0 %v3797_v14 }
 0x1f9   :  { %vm833_vm4 = vcmp.eq.s32.totalorder %v825_v6, %v4676_v61  ;;  %v1206_v28 = vadd.f32 %v3556_v49, %v3555_v19  ;;  %v2190_v45 = vadd.f32 %v3649_v1, %v5842_v30  ;;  %v3663_v55 = vsel %vm2343_vm6, 1.0, %v6598_v37  ;;  %v6763_v30 = vld [vmem:[#allocation39_spill] sm:$0xff]  ;;  %3773 = vmatprep.subr.bf16.mxu0 %v6598_v37 }
 0x1fa   :  { %v3530_v40 = vsel %vm833_vm4, 1.0, %v6598_v37  ;;  %2686 = vbcast.lane.b32.xlu1 %v6758_v42, 256  ;;  %2604 = vbcast.lane.b32.xlu0 %v6759_v16, 256  ;;  %v3656_v52 = vsel %vm2255_vm7, 1.0, %v6598_v37  ;;  %vm2519_vm10 = vcmp.eq.s32.totalorder %v6762_v33, %v4676_v61  ;;  %vm2431_vm11 = vcmp.eq.s32.totalorder %v6763_v30, %v4676_v61  ;;  %v3798_v16 = vld [vmem:[#allocation4 + $0x20] sm:$0xff]  }
 0x1fb   :  { %v5924_v26 = vadd.f32 %v3530_v40, %v855_v3  ;;  %v6764_v49 = vld [vmem:[#allocation31_spill] sm:$0xff]  ;;  %v1207_v4 = vadd.f32 %v3557_v58, %v1206_v28  ;;  %vm2168_vm13 = vcmp.eq.s32.totalorder %v5738_v25, %v4676_v61  ;;  %v2103_v63 = vadd.f32 %v2102_v35, %v5827_v5 }
 0x1fc   :  { %v1071_v10 = vpop.permute.xlu1 %1070  ;;  %v989_v57 = vpop.permute.xlu0 %988  ;;  %vm743_vm12 = vcmp.eq.s32.totalorder %v6764_v49, %v4676_v61  ;;  %vm2256_vm0 = vcmp.eq.s32.totalorder %v5736_v24, %v4676_v61  ;;  %v6765_v1 = vrot.slane %v4893_v13, %v4144_v20  ;;  %vm2344_vm1 = vcmp.eq.s32.totalorder %v5776_v36, %v4676_v61  ;;  %3774 = vmatpush3.bf16.msra.mxu0 %v3798_v16 }
 0x1fd   :  { %vm1097_vm8 = vcmp.eq.s32.totalorder %v1071_v10, %v4676_v61  ;;  %vm1009_vm9 = vcmp.eq.s32.totalorder %v989_v57, %v4676_v61  ;;  %v6766_v10 = vrot.slane %v5565_v47, %v4205_v54  ;;  %v2366_v57 = vadd.f32 %v3663_v55, %v5853_v46  ;;  %3775 = vmatprep.subr.bf16.mxu0 %v6598_v37 }
 0x1fe   :  { %v3551_v29 = vsel %vm1097_vm8, 1.0, %v6598_v37  ;;  %v3544_v6 = vsel %vm1009_vm9, 1.0, %v6598_v37  ;;  %2850 = vbcast.lane.b32.xlu1 %v6760_v62, 256  ;;  %2768 = vbcast.lane.b32.xlu0 %v6761_v44, 256  ;;  %v3670_v47 = vsel %vm2431_vm11, 1.0, %v6598_v37  ;;  %vm2607_vm2 = vcmp.eq.s32.totalorder %v5534_v0, %v4676_v61 }
 0x1ff   :  { %v5949_v3 = vadd.f32 %v3551_v29, %v1119_v39  ;;  %v5951_v7 = vadd.f32 %v3544_v6, %v1031_v53  ;;  %v2278_v53 = vadd.f32 %v3656_v52, %v5839_v22  ;;  %v3677_v39 = vsel %vm2519_vm10, 1.0, %v6598_v37  ;;  %v3799_v22 = vld [vmem:[#allocation4 + $0x28] sm:$0xff]  }
 0x200   :  { %v1235_v40 = vpop.permute.xlu1 %1234  ;;  %v1153_v42 = vpop.permute.xlu0 %1152  ;;  %v3657_v58 = vsel %vm2256_vm0, 1.0, %v6598_v37  ;;  %vm2432_vm5 = vcmp.eq.s32.totalorder %v5774_v34, %v4676_v61  ;;  %v3664_v25 = vsel %vm2344_vm1, 1.0, %v6598_v37  ;;  %v6767_v24 = vrot.slane %v4794_v21, %v4205_v54  ;;  %3776 = vmatpush3.bf16.msra.mxu0 %v3799_v22 }
 0x201   :  { %vm1273_vm14 = vcmp.eq.s32.totalorder %v1235_v40, %v4676_v61  ;;  %vm1185_vm15 = vcmp.eq.s32.totalorder %v1153_v42, %v4676_v61  ;;  %v6768_v62 = vrot.slane %v5139_v18, %v4103_v56  ;;  %vm2606_vm6 = vcmp.eq.s32.totalorder %v5536_v9, %v4676_v61  ;;  %3777 = vmatprep.subr.bf16.mxu0 %v6598_v37 }
 0x202   :  { %v3565_v43 = vsel %vm1273_vm14, 1.0, %v6598_v37  ;;  %v3558_v19 = vsel %vm1185_vm15, 1.0, %v6598_v37  ;;  %1351 = vbcast.lane.b32.xlu1 %v6765_v1, 256  ;;  %1269 = vbcast.lane.b32.xlu0 %v6766_v10, 256  ;;  %vm2520_vm7 = vcmp.eq.s32.totalorder %v5808_v17, %v4676_v61  ;;  %v2542_v28 = vadd.f32 %v3677_v39, %v5885_v12  ;;  %v6772_v10 = vld [vmem:[#allocation33_spill] sm:$0xff] }
 0x203   :  { %v5987_v5 = vadd.f32 %v3565_v43, %v5726_v51  ;;  %v5989_v14 = vadd.f32 %v3558_v19, %v1207_v4  ;;  %v3650_v51 = vsel %vm2168_vm13, 1.0, %v6598_v37  ;;  %v2454_v55 = vadd.f32 %v3670_v47, %v5850_v31  ;;  %v3801_v19 = vld [vmem:[#allocation4 + $0x38] sm:$0xff]  }
 0x204   :  { %v1317_v46 = vpop.permute.xlu1 %1316  ;;  %v1310_v35 = vpop.permute.xlu0 %1309  ;;  %v2191_v44 = vadd.f32 %v3650_v51, %v2190_v45  ;;  %v3684_v21 = vsel %vm2607_vm2, 1.0, %v6598_v37  ;;  %v2279_v52 = vadd.f32 %v3657_v58, %v2278_v53  ;;  %v3800_v45 = vld [vmem:[#allocation4 + $0x30] sm:$0xff]   ;;  %v3671_v40 = vsel %vm2432_vm5, 1.0, %v6598_v37 }
 0x205   :  { %vm1361_vm3 = vcmp.eq.s32.totalorder %v1317_v46, %v4676_v61  ;;  %vm1360_vm4 = vcmp.eq.s32.totalorder %v1310_v35, %v4676_v61  ;;  %v2367_v42 = vadd.f32 %v3664_v25, %v2366_v57  ;;  %v3683_v0 = vsel %vm2606_vm6, 1.0, %v6598_v37  ;;  %3778 = vmatpush3.bf16.msra.mxu0 %v3800_v45 }
 0x206   :  { %v3572_v29 = vsel %vm1361_vm3, 1.0, %v6598_v37  ;;  %v3571_v6 = vsel %vm1360_vm4, 1.0, %v6598_v37  ;;  %2693 = vbcast.lane.b32.xlu1 %v6767_v24, 256  ;;  %1433 = vbcast.lane.b32.xlu0 %v6768_v62, 256  ;;  %v3678_v31 = vsel %vm2520_vm7, 1.0, %v6598_v37  ;;  %v6769_v16 = vrot.slane %v5272_v15, %v4103_v56  ;;  %v6771_v56 = vld [vmem:[#allocation32_spill] sm:$0xff] }
 0x207   :  { %v6031_v36 = vadd.f32 %v3572_v29, %v3571_v6  ;;  %v6770_v4 = vrot.slane %v5019_v60, %v4144_v20  ;;  %v2192_v43 = vadd.f32 %v2191_v44, %v2103_v63  ;;  %vm2608_vm10 = vcmp.eq.s32.totalorder %v5806_v48, %v4676_v61  ;;  %3779 = vmatprep.subr.bf16.mxu0 %v6598_v37 }
 0x208   :  { %v2331_v33 = vpop.permute.xlu1 %2330  ;;  %v2249_v30 = vpop.permute.xlu0 %2248  ;;  %v3521_v1 = vsel %vm743_vm12, 1.0, %v6598_v37  ;;  %vm655_vm11 = vcmp.eq.s32.totalorder %v6771_v56, %v4676_v61  ;;  %vm919_vm13 = vcmp.eq.s32.totalorder %v6772_v10, %v4676_v61  ;;  %v2455_v63 = vadd.f32 %v3671_v40, %v2454_v55  ;;  %v6777_v55 = vld [vmem:[#allocation41_spill] sm:$0xff] }
 0x209   :  { %vm2345_vm8 = vcmp.eq.s32.totalorder %v2331_v33, %v4676_v61  ;;  %vm2257_vm9 = vcmp.eq.s32.totalorder %v2249_v30, %v4676_v61  ;;  %v2543_v39 = vadd.f32 %v3678_v31, %v2542_v28  ;;  %v2630_v49 = vadd.f32 %v3684_v21, %v3683_v0  ;;  %3780 = vmatpush3.bf16.msra.mxu0 %v3801_v19  ;;  %v6778_v33 = vld [vmem:[#allocation40_spill] sm:$0xff] }
 0x20a   :  { %v3665_v12 = vsel %vm2345_vm8, 1.0, %v6598_v37  ;;  %v3658_v34 = vsel %vm2257_vm9, 1.0, %v6598_v37  ;;  %2857 = vbcast.lane.b32.xlu1 %v6769_v16, 256  ;;  %2775 = vbcast.lane.b32.xlu0 %v6770_v4, 256  ;;  %v3685_v51 = vsel %vm2608_vm10, 1.0, %v6598_v37  ;;  %v6773_v22 = vrot.slane %v5139_v18, %v4144_v20 }
 0x20b   :  { %v6064_v9 = vadd.f32 %v3665_v12, %v2367_v42  ;;  %v2280_v17 = vadd.f32 %v3658_v34, %v2279_v52  ;;  %v6774_v58 = vrot.slane %v4893_v13, %v4205_v54  ;;  %vm744_vm12 = vcmp.eq.s32.totalorder %v5582_v50, %v4676_v61 }
 0x20c   :  { %v2495_v57 = vpop.permute.xlu1 %2494  ;;  %v2413_v53 = vpop.permute.xlu0 %2412  ;;  %v589_v48 = vadd.f32 %v5763_v32, %v5597_v38  ;;  %v941_v6 = vadd.f32 %v5824_v8, %v5653_v2  ;;  %v766_v24 = vadd.f32 %v3521_v1, %v5797_v59  ;;  %v3514_v13 = vsel %vm655_vm11, 1.0, %v6598_v37 }
 0x20d   :  { %v6075_v47 = vadd.f32 %v2280_v17, %v2192_v43  ;;  %vm2521_vm14 = vcmp.eq.s32.totalorder %v2495_v57, %v4676_v61  ;;  %vm2433_vm15 = vcmp.eq.s32.totalorder %v2413_v53, %v4676_v61  ;;  %vm3902_vm0 = vmmov 0  }
 0x20e   :  { %v3679_v46 = vsel %vm2521_vm14, 1.0, %v6598_v37  ;;  %v3672_v35 = vsel %vm2433_vm15, 1.0, %v6598_v37  ;;  %1440 = vbcast.lane.b32.xlu1 %v6773_v22, 256  ;;  %1358 = vbcast.lane.b32.xlu0 %v6774_v58, 256  ;;  %vm920_vm1 = vcmp.eq.s32.totalorder %v5629_v23, %v4676_v61  ;;  %v2631_v28 = vadd.f32 %v3685_v51, %v2630_v49 }
 0x20f   :  { %v6093_v25 = vadd.f32 %v3679_v46, %v2543_v39  ;;  %v6095_v29 = vadd.f32 %v3672_v35, %v2455_v63  ;;  %3781 = vmatprep.mubr.msk.bf16.mxu0 %vm3902_vm0, %v6598_v37  ;;  %v3535_v38 = vsel %vm919_vm13, 1.0, %v6598_v37  ;;  %v3522_v2 = vsel %vm744_vm12, 1.0, %v6598_v37 }
 0x210   :  { %v2659_v62 = vpop.permute.xlu1 %2658  ;;  %v2577_v44 = vpop.permute.xlu0 %2576  ;;  %v6775_v23 = vrot.slane %v5272_v15, %v4144_v20  ;;  %v6776_v8 = vrot.slane %v5019_v60, %v4205_v54  ;;  %v678_v21 = vadd.f32 %v3514_v13, %v6777_v55  ;;  %vm921_vm4 = vcmp.eq.s32.totalorder %v5891_v11, %v4676_v61 }
 0x211   :  { %vm2697_vm2 = vcmp.eq.s32.totalorder %v2659_v62, %v4676_v61  ;;  %vm2609_vm3 = vcmp.eq.s32.totalorder %v2577_v44, %v4676_v61  ;;  %v590_v30 = vadd.f32 %v589_v48, %v6778_v33  ;;  %v3536_v45 = vsel %vm920_vm1, 1.0, %v6598_v37 }
 0x212   :  { %v3693_v32 = vsel %vm2697_vm2, 1.0, %v6598_v37  ;;  %v3686_v59 = vsel %vm2609_vm3, 1.0, %v6598_v37  ;;  %2864 = vbcast.lane.b32.xlu1 %v6775_v23, 256  ;;  %2782 = vbcast.lane.b32.xlu0 %v6776_v8, 256  ;;  %v942_v0 = vadd.f32 %v3535_v38, %v941_v6  ;;  %v767_v31 = vadd.f32 %v3522_v2, %v766_v24 }
 0x213   :  { %v6131_v50 = vadd.f32 %v3693_v32, %v5883_v27  ;;  %v6133_v52 = vadd.f32 %v3686_v59, %v2631_v28  ;;  %v3537_v60 = vsel %vm921_vm4, 1.0, %v6598_v37  ;;  %v6779_v12 = vrot.slane %v5272_v15, %v4205_v54 }
 0x214   :  { %v2741_v40 = vpop.permute.xlu1 %2740  ;;  %v2734_v42 = vpop.permute.xlu0 %2733  ;;  %v6780_v34 = vrot.slane %v5139_v18, %v4205_v54  ;;  %v679_v16 = vadd.f32 %v678_v21, %v590_v30  ;;  %v943_v4 = vadd.f32 %v3536_v45, %v942_v0 }
 0x215   :  { %vm2785_vm5 = vcmp.eq.s32.totalorder %v2741_v40, %v4676_v61  ;;  %vm2784_vm6 = vcmp.eq.s32.totalorder %v2734_v42, %v4676_v61 }
 0x216   :  { %v3700_v11 = vsel %vm2785_vm5, 1.0, %v6598_v37  ;;  %v3699_v27 = vsel %vm2784_vm6, 1.0, %v6598_v37  ;;  %2871 = vbcast.lane.b32.xlu1 %v6779_v12, 256  ;;  %1447 = vbcast.lane.b32.xlu0 %v6780_v34, 256  ;;  %v768_v1 = vadd.f32 %v767_v31, %v679_v16  ;;  %v944_v56 = vadd.f32 %v3537_v60, %v943_v4 }
 0x217   :  { %v2808_v43 = vadd.f32 %v3700_v11, %v3699_v27 }
 0x218   :  { %v996_v17 = vpop.permute.xlu1 %995  ;;  %v914_v19 = vpop.permute.xlu0 %913  ;;  %v857_v63 = vadd.f32 %v5924_v26, %v768_v1 }
 0x219   :  { %vm1010_vm7 = vcmp.eq.s32.totalorder %v996_v17, %v4676_v61  ;;  %vm922_vm8 = vcmp.eq.s32.totalorder %v914_v19, %v4676_v61 }
 0x21a   :  { %v3545_v10 = vsel %vm1010_vm7, 1.0, %v6598_v37  ;;  %v3538_v15 = vsel %vm922_vm8, 1.0, %v6598_v37 }
 0x21b   :  { %v6154_v54 = vadd.f32 %v3545_v10, %v5951_v7  ;;  %v945_v18 = vadd.f32 %v3538_v15, %v944_v56 }
 0x21c   :  { %v1160_v57 = vpop.permute.xlu1 %1159  ;;  %v1078_v53 = vpop.permute.xlu0 %1077 }
 0x21d   :  { %v6156_v39 = vadd.f32 %v945_v18, %v857_v63  ;;  %vm1186_vm9 = vcmp.eq.s32.totalorder %v1160_v57, %v4676_v61  ;;  %vm1098_vm10 = vcmp.eq.s32.totalorder %v1078_v53, %v4676_v61 }
 0x21e   :  { %v3559_v49 = vsel %vm1186_vm9, 1.0, %v6598_v37  ;;  %v3552_v51 = vsel %vm1098_vm10, 1.0, %v6598_v37 }
 0x21f   :  { %v6163_v46 = vadd.f32 %v3559_v49, %v5989_v14  ;;  %v1121_v26 = vadd.f32 %v3552_v51, %v5949_v3 }
 0x220   :  { %v1324_v7 = vpop.permute.xlu1 %1323  ;;  %v1242_v35 = vpop.permute.xlu0 %1241 }
 0x221   :  { %vm1362_vm11 = vcmp.eq.s32.totalorder %v1324_v7, %v4676_v61  ;;  %vm1274_vm13 = vcmp.eq.s32.totalorder %v1242_v35, %v4676_v61 }
 0x222   :  { %v3573_v22 = vsel %vm1362_vm11, 1.0, %v6598_v37  ;;  %v3566_v58 = vsel %vm1274_vm13, 1.0, %v6598_v37 }
 0x223   :  { %v6171_v48 = vadd.f32 %v3573_v22, %v6031_v36  ;;  %v1297_v6 = vadd.f32 %v3566_v58, %v5987_v5 }
 0x224   :  { %v1406_v24 = vpop.permute.xlu1 %1405  ;;  %v1399_v14 = vpop.permute.xlu0 %1398 }
 0x225   :  { %vm1450_vm14 = vcmp.eq.s32.totalorder %v1406_v24, %v4676_v61  ;;  %vm1449_vm15 = vcmp.eq.s32.totalorder %v1399_v14, %v4676_v61 }
 0x226   :  { %v3580_v3 = vsel %vm1450_vm14, 1.0, %v6598_v37  ;;  %v3579_v13 = vsel %vm1449_vm15, 1.0, %v6598_v37 }
 0x227   :  { %v6178_v62 = vadd.f32 %v3580_v3, %v3579_v13 }
 0x228   :  { %v2420_v44 = vpop.permute.xlu1 %2419  ;;  %v2338_v28 = vpop.permute.xlu0 %2337 }
 0x229   :  { %vm2434_vm12 = vcmp.eq.s32.totalorder %v2420_v44, %v4676_v61  ;;  %vm2346_vm0 = vcmp.eq.s32.totalorder %v2338_v28, %v4676_v61 }
 0x22a   :  { %v3673_v5 = vsel %vm2434_vm12, 1.0, %v6598_v37  ;;  %v3666_v36 = vsel %vm2346_vm0, 1.0, %v6598_v37 }
 0x22b   :  { %v2457_v38 = vadd.f32 %v3673_v5, %v6095_v29  ;;  %v2369_v2 = vadd.f32 %v3666_v36, %v6064_v9 }
 0x22c   :  { %v2584_v32 = vpop.permute.xlu1 %2583  ;;  %v2502_v59 = vpop.permute.xlu0 %2501 }
 0x22d   :  { %v2370_v23 = vadd.f32 %v2369_v2, %v6075_v47  ;;  %vm2610_vm1 = vcmp.eq.s32.totalorder %v2584_v32, %v4676_v61  ;;  %vm2522_vm2 = vcmp.eq.s32.totalorder %v2502_v59, %v4676_v61 }
 0x22e   :  { %v3687_v8 = vsel %vm2610_vm1, 1.0, %v6598_v37  ;;  %v3680_v55 = vsel %vm2522_vm2, 1.0, %v6598_v37 }
 0x22f   :  { %v6192_v21 = vadd.f32 %v3687_v8, %v6133_v52  ;;  %v2545_v33 = vadd.f32 %v3680_v55, %v6093_v25 }
 0x230   :  { %v2748_v29 = vpop.permute.xlu1 %2747  ;;  %v2666_v30 = vpop.permute.xlu0 %2665 }
 0x231   :  { %vm2786_vm3 = vcmp.eq.s32.totalorder %v2748_v29, %v4676_v61  ;;  %vm2698_vm4 = vcmp.eq.s32.totalorder %v2666_v30, %v4676_v61 }
 0x232   :  { %v3701_v9 = vsel %vm2786_vm3, 1.0, %v6598_v37  ;;  %v3694_v47 = vsel %vm2698_vm4, 1.0, %v6598_v37 }
 0x233   :  { %v6199_v45 = vadd.f32 %v3701_v9, %v2808_v43  ;;  %v6202_v40 = vadd.f32 %v3694_v47, %v6131_v50 }
 0x234   :  { %v2830_v42 = vpop.permute.xlu1 %2829  ;;  %v2823_v52 = vpop.permute.xlu0 %2822 }
 0x235   :  { %vm2874_vm5 = vcmp.eq.s32.totalorder %v2830_v42, %v4676_v61  ;;  %vm2873_vm6 = vcmp.eq.s32.totalorder %v2823_v52, %v4676_v61 }
 0x236   :  { %v3708_v25 = vsel %vm2874_vm5, 1.0, %v6598_v37  ;;  %v3707_v0 = vsel %vm2873_vm6, 1.0, %v6598_v37 }
 0x237   :  { %v6208_v31 = vadd.f32 %v3708_v25, %v3707_v0 }
 0x238   :  { %v1085_v60 = vpop.permute.xlu1 %1084  ;;  %v1003_v11 = vpop.permute.xlu0 %1002 }
 0x239   :  { %vm1099_vm7 = vcmp.eq.s32.totalorder %v1085_v60, %v4676_v61  ;;  %vm1011_vm8 = vcmp.eq.s32.totalorder %v1003_v11, %v4676_v61 }
 0x23a   :  { %v3553_v50 = vsel %vm1099_vm7, 1.0, %v6598_v37  ;;  %v3546_v27 = vsel %vm1011_vm8, 1.0, %v6598_v37 }
 0x23b   :  { %v1122_v12 = vadd.f32 %v3553_v50, %v1121_v26  ;;  %v1034_v34 = vadd.f32 %v3546_v27, %v6154_v54 }
 0x23c   :  { %v1249_v16 = vpop.permute.xlu1 %1248  ;;  %v1167_v4 = vpop.permute.xlu0 %1166 }
 0x23d   :  { %v1035_v43 = vadd.f32 %v1034_v34, %v6156_v39  ;;  %vm1275_vm9 = vcmp.eq.s32.totalorder %v1249_v16, %v4676_v61  ;;  %vm1187_vm10 = vcmp.eq.s32.totalorder %v1167_v4, %v4676_v61 }
 0x23e   :  { %v3567_v17 = vsel %vm1275_vm9, 1.0, %v6598_v37  ;;  %v3560_v19 = vsel %vm1187_vm10, 1.0, %v6598_v37 }
 0x23f   :  { %v6220_v1 = vadd.f32 %v3567_v17, %v1297_v6  ;;  %v1210_v56 = vadd.f32 %v3560_v19, %v6163_v46 }
 0x240   :  { %v6223_v10 = vpop.permute.xlu1 %1412  ;;  %v6225_v15 = vpop.permute.xlu0 %1330 }
 0x241   :  { %vm1363_vm7 = vcmp.eq.s32.totalorder %v6225_v15, %v4676_v61  ;;  %vm1451_vm10 = vcmp.eq.s32.totalorder %v6223_v10, %v4676_v61 }
 0x242   :  { %v3581_v10 = vsel %vm1451_vm10, 1.0, %v6598_v37 }
 0x244   :  { %v2509_v63 = vpop.permute.xlu1 %2508  ;;  %v2427_v54 = vpop.permute.xlu0 %2426 }
 0x245   :  { %vm2435_vm11 = vcmp.eq.s32.totalorder %v2427_v54, %v4676_v61  ;;  %vm2523_vm14 = vcmp.eq.s32.totalorder %v2509_v63, %v4676_v61 }
 0x246   :  { %v3674_v18 = vsel %vm2435_vm11, 1.0, %v6598_v37  ;;  %v3681_v14 = vsel %vm2523_vm14, 1.0, %v6598_v37 }
 0x247   :  { %v2458_v57 = vadd.f32 %v3674_v18, %v2457_v38  ;;  %v2546_v44 = vadd.f32 %v3681_v14, %v2545_v33 }
 0x248   :  { %v2673_v53 = vpop.permute.xlu1 %2672  ;;  %v2591_v39 = vpop.permute.xlu0 %2590 }
 0x249   :  { %v2459_v49 = vadd.f32 %v2458_v57, %v2370_v23  ;;  %vm2611_vm0 = vcmp.eq.s32.totalorder %v2591_v39, %v4676_v61  ;;  %vm2699_vm5 = vcmp.eq.s32.totalorder %v2673_v53, %v4676_v61 }
 0x24a   :  { %v3688_v9 = vsel %vm2611_vm0, 1.0, %v6598_v37 }
 0x24b   :  { %v2634_v0 = vadd.f32 %v3688_v9, %v6192_v21 }
 0x24c   :  { %v6229_v51 = vpop.permute.xlu1 %2836  ;;  %v6231_v26 = vpop.permute.xlu0 %2754 }
 0x24d   :  { %vm2875_vm14 = vcmp.eq.s32.totalorder %v6229_v51, %v4676_v61  ;;  %v1474_v51 = vadd.f32 %v3581_v10, %v6178_v62 }
 0x250   :  { %v1174_v7 = vpop.permute.xlu1 %1173  ;;  %v1092_v46 = vpop.permute.xlu0 %1091 }
 0x251   :  { %vm1100_vm13 = vcmp.eq.s32.totalorder %v1092_v46, %v4676_v61  ;;  %vm1188_vm12 = vcmp.eq.s32.totalorder %v1174_v7, %v4676_v61 }
 0x252   :  { %v3554_v35 = vsel %vm1100_vm13, 1.0, %v6598_v37  ;;  %v3561_v23 = vsel %vm1188_vm12, 1.0, %v6598_v37 }
 0x253   :  { %v1123_v22 = vadd.f32 %v3554_v35, %v1122_v12  ;;  %v1211_v33 = vadd.f32 %v3561_v23, %v1210_v56  ;;  %v3574_v56 = vsel %vm1363_vm7, 1.0, %v6598_v37 }
 0x254   :  { %v6236_v58 = vpop.permute.xlu1 %1337  ;;  %v1256_v6 = vpop.permute.xlu0 %1255  ;;  %v1386_v7 = vadd.f32 %v3574_v56, %v6171_v48  ;;  %v3709_v48 = vsel %vm2875_vm14, 1.0, %v6598_v37 }
 0x255   :  { %v1124_v24 = vadd.f32 %v1123_v22, %v1035_v43  ;;  %vm1276_vm3 = vcmp.eq.s32.totalorder %v1256_v6, %v4676_v61  ;;  %v3695_v43 = vsel %vm2699_vm5, 1.0, %v6598_v37  ;;  %vm1364_vm11 = vcmp.eq.s32.totalorder %v6236_v58, %v4676_v61 }
 0x256   :  { %v3568_v34 = vsel %vm1276_vm3, 1.0, %v6598_v37  ;;  %v2722_v18 = vadd.f32 %v3695_v43, %v6202_v40  ;;  %v3575_v40 = vsel %vm1364_vm11, 1.0, %v6598_v37 }
 0x257   :  { %v1299_v19 = vadd.f32 %v3568_v34, %v6220_v1 }
 0x258   :  { %v2516_v3 = vpop.permute.xlu1 %2515  ;;  %v6239_v13 = vpop.permute.xlu0 %1419 }
 0x259   :  { %vm2524_vm15 = vcmp.eq.s32.totalorder %v2516_v3, %v4676_v61  ;;  %vm1452_vm12 = vcmp.eq.s32.totalorder %v6239_v13, %v4676_v61 }
 0x25a   :  { %v3682_v28 = vsel %vm2524_vm15, 1.0, %v6598_v37  ;;  %vm2787_vm15 = vcmp.eq.s32.totalorder %v6231_v26, %v4676_v61  ;;  %v3582_v3 = vsel %vm1452_vm12, 1.0, %v6598_v37 }
 0x25b   :  { %v2547_v5 = vadd.f32 %v3682_v28, %v2546_v44  ;;  %v3702_v6 = vsel %vm2787_vm15, 1.0, %v6598_v37 }
 0x25c   :  { %v2680_v36 = vpop.permute.xlu1 %2679  ;;  %v2598_v38 = vpop.permute.xlu0 %2597 }
 0x25d   :  { %v2548_v2 = vadd.f32 %v2547_v5, %v2459_v49  ;;  %vm2612_vm2 = vcmp.eq.s32.totalorder %v2598_v38, %v4676_v61  ;;  %vm2700_vm8 = vcmp.eq.s32.totalorder %v2680_v36, %v4676_v61  ;;  %v2898_v36 = vadd.f32 %v3709_v48, %v6208_v31  ;;  %v3802_v48 = vld [vmem:[%s6470_s3 + $0x4] ss:$16 sps:$4 sm:$0xff]  }
 0x25e   :  { %v3689_v25 = vsel %vm2612_vm2, 1.0, %v6598_v37  ;;  %v3696_v63 = vsel %vm2700_vm8, 1.0, %v6598_v37  ;;  %v2810_v38 = vadd.f32 %v3702_v6, %v6199_v45  ;;  %v3807_v6 = vld [vmem:[%s6470_s3] ss:$16 sps:$4 sm:$0xff]   ;;  %3282 = vmatprep.subr.bf16.mxu1 %v3802_v48 }
 0x25f   :  { %v2635_v50 = vadd.f32 %v3689_v25, %v2634_v0  ;;  %v2723_v39 = vadd.f32 %v3696_v63, %v2722_v18  ;;  %3283 = vmatpush1.bf16.msra.mxu1 %v3807_v6 }
 0x260   :  { %v6244_v32 = vpop.permute.xlu1 %2843  ;;  %v6246_v59 = vpop.permute.xlu0 %2761 }
 0x261   :  { %vm2788_vm2 = vcmp.eq.s32.totalorder %v6246_v59, %v4676_v61 }
 0x262   :  { %v3703_v28 = vsel %vm2788_vm2, 1.0, %v6598_v37  ;;  %vm3439_vm2 = vcmp.eq.s32.totalorder %v4676_v61, 0 }
 0x264   :  { %v1263_v8 = vpop.permute.xlu1 %1262  ;;  %v1181_v55 = vpop.permute.xlu0 %1180 }
 0x265   :  { %vm1189_vm1 = vcmp.eq.s32.totalorder %v1181_v55, %v4676_v61  ;;  %vm1277_vm6 = vcmp.eq.s32.totalorder %v1263_v8, %v4676_v61  ;;  %v2811_v55 = vadd.f32 %v3703_v28, %v2810_v38  ;;  %v3816_v28 = vld [vmem:[%s6470_s3 + $0x48] ss:$16 sps:$4 sm:$0xff]   ;;  %v3824_v38 = vld [vmem:[%s6470_s3 + $0x6c] ss:$16 sps:$4 sm:$0xff]  }
 0x266   :  { %v3562_v29 = vsel %vm1189_vm1, 1.0, %v6598_v37  ;;  %v3569_v17 = vsel %vm1277_vm6, 1.0, %v6598_v37 }
 0x267   :  { %v1212_v30 = vadd.f32 %v3562_v29, %v1211_v33  ;;  %v1300_v57 = vadd.f32 %v3569_v17, %v1299_v19 }
 0x268   :  { %v6254_v47 = vpop.permute.xlu1 %1426  ;;  %v1345_v42 = vpop.permute.xlu0 %1344 }
 0x269   :  { %v1213_v52 = vadd.f32 %v1212_v30, %v1124_v24  ;;  %vm1365_vm0 = vcmp.eq.s32.totalorder %v1345_v42, %v4676_v61  ;;  %v1387_v24 = vadd.f32 %v3575_v40, %v1386_v7  ;;  %vm1453_vm6 = vcmp.eq.s32.totalorder %v6254_v47, %v4676_v61 }
 0x26a   :  { %v3576_v62 = vsel %vm1365_vm0, 1.0, %v6598_v37  ;;  %v3583_v33 = vsel %vm1453_vm6, 1.0, %v6598_v37 }
 0x26b   :  { %v1388_v23 = vadd.f32 %v3576_v62, %v1387_v24  ;;  %v3808_v24 = vld [vmem:[%s6470_s3 + $0x24] ss:$16 sps:$4 sm:$0xff]   ;;  %v3813_v62 = vld [vmem:[%s6470_s3 + $0x20] ss:$16 sps:$4 sm:$0xff]  }
 0x26c   :  { %v2687_v60 = vpop.permute.xlu1 %2686  ;;  %v2605_v11 = vpop.permute.xlu0 %2604  ;;  %3284 = vmatprep.subr.bf16.mxu1 %v3808_v24  ;;  %v6784_v24 = vld [vmem:[#allocation10_spill] sm:$0xff] }
 0x26d   :  { %vm2613_vm4 = vcmp.eq.s32.totalorder %v2605_v11, %v4676_v61  ;;  %vm2701_vm9 = vcmp.eq.s32.totalorder %v2687_v60, %v4676_v61  ;;  %3285 = vmatpush1.bf16.msra.mxu1 %v3813_v62 }
 0x26e   :  { %v3690_v27 = vsel %vm2613_vm4, 1.0, %v6598_v37  ;;  %v3697_v1 = vsel %vm2701_vm9, 1.0, %v6598_v37  ;;  %vm2876_vm4 = vcmp.eq.s32.totalorder %v6244_v32, %v4676_v61  ;;  %v1475_v32 = vadd.f32 %v3582_v3, %v1474_v51  ;;  %v3810_v3 = vld [vmem:[%s6470_s3 + $0x28] ss:$16 sps:$4 sm:$0xff]  }
 0x26f   :  { %v2636_v12 = vadd.f32 %v3690_v27, %v2635_v50  ;;  %v2724_v22 = vadd.f32 %v3697_v1, %v2723_v39  ;;  %v3710_v59 = vsel %vm2876_vm4, 1.0, %v6598_v37 }
 0x270   :  { %v6264_v16 = vpop.permute.xlu1 %2850  ;;  %v2769_v4 = vpop.permute.xlu0 %2768  ;;  %v2899_v47 = vadd.f32 %v3710_v59, %v2898_v36  ;;  %v1476_v60 = vadd.f32 %v3583_v33, %v1475_v32  ;;  %v3820_v36 = vld [vmem:[%s6470_s3 + $0x64] ss:$16 sps:$4 sm:$0xff]  }
 0x271   :  { %v2637_v21 = vadd.f32 %v2636_v12, %v2548_v2  ;;  %vm2789_vm5 = vcmp.eq.s32.totalorder %v2769_v4, %v4676_v61  ;;  %vm2877_vm7 = vcmp.eq.s32.totalorder %v6264_v16, %v4676_v61 }
 0x272   :  { %v3704_v8 = vsel %vm2789_vm5, 1.0, %v6598_v37  ;;  %v3711_v29 = vsel %vm2877_vm7, 1.0, %v6598_v37 }
 0x273   :  { %v2812_v42 = vadd.f32 %v3704_v8, %v2811_v55  ;;  %v2900_v11 = vadd.f32 %v3711_v29, %v2899_v47 }
 0x274   :  { %v1352_v54 = vpop.permute.xlu1 %1351  ;;  %v1270_v15 = vpop.permute.xlu0 %1269 }
 0x275   :  { %vm1278_vm13 = vcmp.eq.s32.totalorder %v1270_v15, %v4676_v61  ;;  %vm1366_vm3 = vcmp.eq.s32.totalorder %v1352_v54, %v4676_v61 }
 0x276   :  { %v3570_v53 = vsel %vm1278_vm13, 1.0, %v6598_v37  ;;  %v3577_v2 = vsel %vm1366_vm3, 1.0, %v6598_v37  ;;  %vm3452_vm3 = vcmask 15360  }
 0x277   :  { %v1301_v49 = vadd.f32 %v3570_v53, %v1300_v57  ;;  %v1389_v45 = vadd.f32 %v3577_v2, %v1388_v23  ;;  %v3822_v2 = vld [vmem:[%s6470_s3 + $0x68] ss:$16 sps:$4 sm:$0xff]  }
 0x278   :  { %v2694_v46 = vpop.permute.xlu1 %2693  ;;  %v1434_v35 = vpop.permute.xlu0 %1433 }
 0x279   :  { %v1302_v58 = vadd.f32 %v1301_v49, %v1213_v52  ;;  %vm2702_vm1 = vcmp.eq.s32.totalorder %v2694_v46, %v4676_v61  ;;  %vm1454_vm9 = vcmp.eq.s32.totalorder %v1434_v35, %v4676_v61  ;;  %v3903_v46 = vmov 0  }
 0x27a   :  { %v3698_v26 = vsel %vm2702_vm1, 1.0, %v6598_v37  ;;  %v3584_v25 = vsel %vm1454_vm9, 1.0, %v6598_v37  ;;  %vm50_vm1 = vcmask 7168   ;;  %3793 = vset.pattern.permute.xlu1 %v3903_v46  ;;  %3792 = vset.pattern.permute.xlu0 %v3903_v46 }
 0x27b   :  { %v2725_v14 = vadd.f32 %v3698_v26, %v2724_v22  ;;  %52 = vst.msk [vmem:[#allocation3 + $0x8] sm:$0xff] %vm50_vm1, %v6598_v37  ;;  %51 = vst.msk [vmem:[#allocation3] sm:$0xff] %vm50_vm1, %v6598_v37  ;;  %3314 = vmatprep.mubr.bf16.mxu1 %v3903_v46  ;;  %v3804_v26 = vld [vmem:[%s6470_s3 + $0x8] ss:$16 sps:$4 sm:$0xff]  }
 0x27c   :  { %v2858_v13 = vpop.permute.xlu1 %2857  ;;  %v2776_v44 = vpop.permute.xlu0 %2775 }
 0x27d   :  { %v2726_v5 = vadd.f32 %v2725_v14, %v2637_v21  ;;  %vm2790_vm8 = vcmp.eq.s32.totalorder %v2776_v44, %v4676_v61  ;;  %vm2878_vm10 = vcmp.eq.s32.totalorder %v2858_v13, %v4676_v61  ;;  %v1477_v21 = vadd.f32 %v3584_v25, %v1476_v60  ;;  %v3812_v14 = vld [vmem:[%s6470_s3 + $0x2c] ss:$16 sps:$4 sm:$0xff]   ;;  %v3814_v13 = vld [vmem:[%s6470_s3 + $0x44] ss:$16 sps:$4 sm:$0xff]   ;;  %v3825_v25 = vld [vmem:[%s6470_s3 + $0x60] ss:$16 sps:$4 sm:$0xff]  }
 0x27e   :  { %v3705_v9 = vsel %vm2790_vm8, 1.0, %v6598_v37  ;;  %v3712_v50 = vsel %vm2878_vm10, 1.0, %v6598_v37  ;;  %v3818_v44 = vld [vmem:[%s6470_s3 + $0x4c] ss:$16 sps:$4 sm:$0xff]   ;;  %3286 = vmatprep.subr.bf16.mxu1 %v3814_v13  ;;  %v3828_v60 = vld [vmem:[%s6470_s3 + $0x88] ss:$16 sps:$4 sm:$0xff]  }
 0x27f   :  { %v2813_v27 = vadd.f32 %v3705_v9, %v2812_v42  ;;  %v2901_v19 = vadd.f32 %v3712_v50, %v2900_v11  ;;  %v3830_v11 = vld [vmem:[%s6470_s3 + $0x8c] ss:$16 sps:$4 sm:$0xff]   ;;  %v3831_v50 = vld [vmem:[%s6470_s3 + $0x80] ss:$16 sps:$4 sm:$0xff]  }
 0x280   :  { %v1441_v31 = vpop.permute.xlu1 %1440  ;;  %v1359_v30 = vpop.permute.xlu0 %1358 }
 0x281   :  { %vm1367_vm11 = vcmp.eq.s32.totalorder %v1359_v30, %v4676_v61  ;;  %vm1455_vm13 = vcmp.eq.s32.totalorder %v1441_v31, %v4676_v61 }
 0x282   :  { %v3578_v52 = vsel %vm1367_vm11, 1.0, %v6598_v37  ;;  %v3585_v16 = vsel %vm1455_vm13, 1.0, %v6598_v37  ;;  %v3035_v55 = vld [vmem:[#allocation3 + $0x8] sm:$0xff]  ;;  %v3026_v33 = vld [vmem:[#allocation3] sm:$0xff] }
 0x283   :  { %v1390_v0 = vadd.f32 %v3578_v52, %v1389_v45  ;;  %v1478_v63 = vadd.f32 %v3585_v16, %v1477_v21  ;;  %v3837_v16 = vld [vmem:[%s6470_s3 + $0xa0] ss:$16 sps:$4 sm:$0xff]   ;;  %v3838_v21 = vld [vmem:[%s6470_s3 + $0xc4] ss:$16 sps:$4 sm:$0xff]  }
 0x284   :  { %v2865_v12 = vpop.permute.xlu1 %2864  ;;  %v2783_v34 = vpop.permute.xlu0 %2782 }
 0x285   :  { %v1391_v4 = vadd.f32 %v1390_v0, %v1302_v58  ;;  %vm2879_vm14 = vcmp.eq.s32.totalorder %v2865_v12, %v4676_v61  ;;  %vm2791_vm15 = vcmp.eq.s32.totalorder %v2783_v34, %v4676_v61  ;;  %v3826_v0 = vld [vmem:[%s6470_s3 + $0x84] ss:$16 sps:$4 sm:$0xff]   ;;  %v3836_v12 = vld [vmem:[%s6470_s3 + $0xac] ss:$16 sps:$4 sm:$0xff]   ;;  %v3834_v34 = vld [vmem:[%s6470_s3 + $0xa8] ss:$16 sps:$4 sm:$0xff]  }
 0x286   :  { %v3713_v43 = vsel %vm2879_vm14, 1.0, %v6598_v37  ;;  %v3706_v17 = vsel %vm2791_vm15, 1.0, %v6598_v37 }
 0x287   :  { %v2814_v56 = vadd.f32 %v3706_v17, %v2813_v27  ;;  %v2902_v18 = vadd.f32 %v3713_v43, %v2901_v19  ;;  %v3832_v27 = vld [vmem:[%s6470_s3 + $0xa4] ss:$16 sps:$4 sm:$0xff]   ;;  %v3840_v43 = vld [vmem:[%s6470_s3 + $0xc8] ss:$16 sps:$4 sm:$0xff]   ;;  %v3843_v17 = vld [vmem:[%s6470_s3 + $0xc0] ss:$16 sps:$4 sm:$0xff]  }
 0x288   :  { %v2872_v54 = vpop.permute.xlu1 %2871  ;;  %v1448_v15 = vpop.permute.xlu0 %1447  ;;  %v3848_v19 = vld [vmem:[%s6470_s3 + $0xec] ss:$16 sps:$4 sm:$0xff]  }
 0x289   :  { %v2815_v57 = vadd.f32 %v2814_v56, %v2726_v5  ;;  %vm2880_vm12 = vcmp.eq.s32.totalorder %v2872_v54, %v4676_v61  ;;  %vm1456_vm0 = vcmp.eq.s32.totalorder %v1448_v15, %v4676_v61  ;;  %v3819_v5 = vld [vmem:[%s6470_s3 + $0x40] ss:$16 sps:$4 sm:$0xff]   ;;  %v3844_v56 = vld [vmem:[%s6470_s3 + $0xe4] ss:$16 sps:$4 sm:$0xff]  }
 0x28a   :  { %v3714_v1 = vsel %vm2880_vm12, 1.0, %v6598_v37  ;;  %v3586_v53 = vsel %vm1456_vm0, 1.0, %v6598_v37  ;;  %v3806_v37 = vld [vmem:[%s6470_s3 + $0xc] ss:$16 sps:$4 sm:$0xff]   ;;  %3287 = vmatpush1.bf16.msra.mxu1 %v3819_v5  ;;  %v3849_v54 = vld [vmem:[%s6470_s3 + $0xe0] ss:$16 sps:$4 sm:$0xff]  }
 0x28b   :  { %v2903_v10 = vadd.f32 %v3714_v1, %v2902_v18  ;;  %v1479_v39 = vadd.f32 %v3586_v53, %v1478_v63  ;;  %3323 = vmatprep.subr.bf16.mxu0 %v3806_v37  ;;  %3288 = vmatprep.subr.bf16.mxu1 %v3820_v36  ;;  %v3846_v63 = vld [vmem:[%s6470_s3 + $0xe8] ss:$16 sps:$4 sm:$0xff]  }
 0x28d   :  { %v2904_v49 = vadd.f32 %v2903_v10, %v2815_v57  ;;  %v1480_v7 = vadd.f32 %v1479_v39, %v1391_v4  ;;  %v3842_v4 = vld [vmem:[%s6470_s3 + $0xcc] ss:$16 sps:$4 sm:$0xff]  }
 0x28e   :  { %3289 = vmatpush1.bf16.msra.mxu1 %v3825_v25 }
 0x28f   :  { %3019 = vadd.xlane.f32.xlu1 %v2904_v49  ;;  %3017 = vadd.xlane.f32.xlu0 %v1480_v7  ;;  %v2905_v40 = vpack.c.bf16 %v2904_v49, %v1480_v7 }
 0x290   :  { %3290 = vmatprep.subr.bf16.mxu1 %v3826_v0 }
 0x291   :  { %3782 = vmatmul.mubr.bf16.vlgmr.msra.gmra.mrb[0].mxu0 %v2905_v40  ;;  %v3369_v40 = vld [vmem:[%s6473_s6] sm:$0x1] }
 0x292   :  { %3355 = vmatprep.mubr.bf16.mxu0 %v3903_v46  ;;  %3324 = vmatpush1.bf16.msra.mxu0 %v3804_v26  ;;  %v3100_v46 = vld [vmem:[%s6471_s4] sm:$0xf]  ;;  %v6783_v26 = vld [vmem:[#allocation8_spill] sm:$0xff] }
 0x293   :  { %3325 = vmatprep.subr.bf16.mxu0 %v3812_v14  ;;  %3291 = vmatpush1.bf16.msra.mxu1 %v3831_v50  ;;  %v3109_v37 = vrot.slane %v3100_v46, %v6783_v26  ;;  %v3117_v14 = vrot.slane %v3100_v46, %v6784_v24 }
 0x294   :  { %3292 = vmatprep.subr.bf16.mxu1 %v3832_v27 }
 0x296   :  { %3326 = vmatpush1.bf16.msra.mxu0 %v3810_v3 }
 0x297   :  { %3327 = vmatprep.subr.bf16.mxu0 %v3818_v44  ;;  %3293 = vmatpush1.bf16.msra.mxu1 %v3837_v16 }
 0x298   :  { %3294 = vmatprep.subr.bf16.mxu1 %v3838_v21 }
 0x29a   :  { %3328 = vmatpush1.bf16.msra.mxu0 %v3816_v28 }
 0x29b   :  { %3329 = vmatprep.subr.bf16.mxu0 %v3824_v38  ;;  %3295 = vmatpush1.bf16.msra.mxu1 %v3843_v17 }
 0x29c   :  { %3296 = vmatprep.subr.bf16.mxu1 %v3844_v56 }
 0x29e   :  { %3330 = vmatpush1.bf16.msra.mxu0 %v3822_v2 }
 0x29f   :  { %3331 = vmatprep.subr.bf16.mxu0 %v3830_v11  ;;  %3297 = vmatpush1.bf16.msra.mxu1 %v3849_v54 }
 0x2a2   :  { %3332 = vmatpush1.bf16.msra.mxu0 %v3828_v60 }
 0x2a3   :  { %3333 = vmatprep.subr.bf16.mxu0 %v3836_v12 }
 0x2a6   :  { %3334 = vmatpush1.bf16.msra.mxu0 %v3834_v34 }
 0x2a7   :  { %3335 = vmatprep.subr.bf16.mxu0 %v3842_v4 }
 0x2aa   :  { %3336 = vmatpush1.bf16.msra.mxu0 %v3840_v43 }
 0x2ab   :  { %3337 = vmatprep.subr.bf16.mxu0 %v3848_v19 }
 0x2ae   :  { %3338 = vmatpush1.bf16.msra.mxu0 %v3846_v63 }
 0x31c   :  { %v3020_v35 = vpop.xlane.xlu1 %3019  ;;  %v3018_v22 = vpop.xlane.xlu0 %3017 }
 0x31d   :  { %v3036_v58 = vsub.f32 %v3020_v35, %v2904_v49  ;;  %v3027_v51 = vsub.f32 %v3018_v22, %v1480_v7  ;;  %v3368_v35 = vld [vmem:[%s6472_s5] sm:$0xff]  ;;  %v6781_v22 = vld [vmem:[#allocation7_spill] sm:$0xff] }
 0x31e   :  { %v3755_v6 = vrot.slane %v3368_v35, 9 }
 0x31f   :  { %3038 = vrot.lane.b32.xlu1 %v3036_v58, %s3904_s26  ;;  %3029 = vrot.lane.b32.xlu0 %v3027_v51, %s3904_s26  ;;  %v3105_v58 = vrot.slane %v3100_v46, %v6781_v22  ;;  %v6782_v51 = vld [vmem:[#allocation9_spill] sm:$0xff] }
 0x320   :  { %v3113_v48 = vrot.slane %v3100_v46, %v6782_v51 }
 0x364   :  { %v3006_v32 = vpop.f32.mrb[0].mxu0 }
 0x365   :  { %v3783_v59 = vpop.f32.mrb[1].mxu0 }
 0x366   :  { %v3009_v23 = vpop.f32.mrb[2].mxu0 }
 0x367   :  { %v3784_v8 = vpop.f32.mrb[3].mxu0 }
 0x391   :  { %v3039_v29 = vpop.permute.xlu1 %3038  ;;  %v3030_v31 = vpop.permute.xlu0 %3029 }
 0x392   :  { %v3041_v30 = vadd.f32 %v3039_v29, %v3035_v55  ;;  %v3032_v45 = vadd.f32 %v3030_v31, %v3026_v33 }
 0x394   :  { %3042 = vst.msk [vmem:[#allocation3 + $0x8] sm:$0xff] %vm50_vm1, %v3041_v30  ;;  %3034 = vst.msk [vmem:[#allocation3] sm:$0xff] %vm50_vm1, %v3032_v45 }
 0x39b   :  { %v3046_v9 = vld [vmem:[#allocation3 + $0x8] sm:$0xff]  ;;  %v3045_v47 = vld [vmem:[#allocation3] sm:$0xff] }
 0x39c   :  { %v3048_v42 = vmax.f32 %v3046_v9, 1.0  ;;  %v3047_v52 = vmax.f32 %v3045_v47, 1.0 }
 0x39e   :  { %3058 = vperm.xlu1 %3793, %v3048_v42   ;;  %3053 = vperm.xlu0 %3792, %v3047_v52  }
 0x3a2   :  { %3376 = vrot.lane.b32.xlu0 %v3369_v40, %s3904_s26 }
 0x41d   :  { %v3059_v15 = vpop.permute.xlu1 %3058  ;;  %v3054_v18 = vpop.permute.xlu0 %3053 }
 0x41e   :  { %3850 = vrcp.f32 %v3059_v15 }
 0x41f   :  { %3852 = vrcp.f32 %v3054_v18 }
 0x421   :  { %v3377_v16 = vpop.permute.xlu0 %3376 }
 0x428   :  { %v3851_v57 = vpop.eup %3850 }
 0x429   :  { %v3853_v1 = vpop.eup %3852  ;;  %v3064_v53 = vmul.f32 %v3851_v57, %v3009_v23 }
 0x42a   :  { %v3062_v10 = vmul.f32 %v3853_v1, %v3006_v32  ;;  %v3374_v32 = vsub.f32 %v3368_v35, %v3755_v6 }
 0x42c   :  { %v3065_v39 = vsub.f32 %v3062_v10, %v3064_v53  ;;  %v3384_v55 = vrot.slane %v3374_v32, %v6781_v22  ;;  %v3388_v33 = vrot.slane %v3374_v32, %v6782_v51  ;;  %v3392_v29 = vrot.slane %v3374_v32, %v4066_v41 }
 0x42d   :  { %v3396_v30 = vrot.slane %v3374_v32, %v4144_v20  ;;  %v3379_v20 = vsub.f32 %v3369_v40, %v3377_v16 }
 0x42e   :  { %v3066_v49 = vand.u32 2147483647, %v3065_v39  ;;  %v3404_v31 = vrot.slane %v3384_v55, %v6781_v22  ;;  %v3408_v45 = vrot.slane %v3388_v33, %v6781_v22  ;;  %v3412_v42 = vrot.slane %v3392_v29, %v6781_v22 }
 0x42f   :  { %v3416_v0 = vrot.slane %v3396_v30, %v6781_v22  ;;  %v3430_v4 = vrot.slane %v3379_v20, %v6781_v22 }
 0x430   :  { %v3067_v7 = vpack.c.bf16 %v3066_v49, %v3066_v49 }
 0x432   :  { %3315 = vmatmul.mubr.bf16.vlgmr.msra.gmra.mrb[0].mxu1 %v3067_v7  ;;  %3356 = vmatmul.mubr.bf16.vlgmr.msra.gmra.mrb[4].mxu0 %v3067_v7 }
 0x505   :  { %v3316_v3 = vpop.f32.mrb[0].mxu1  ;;  %v3357_v62 = vpop.f32.mrb[4].mxu0 }
 0x506   :  { %v3317_v13 = vadd.f32 %v3316_v3, %v3105_v58  ;;  %v3358_v44 = vadd.f32 %v3357_v62, %v3113_v48  ;;  %v3318_v28 = vpop.f32.mrb[1].mxu1  ;;  %v3359_v5 = vpop.f32.mrb[5].mxu0 }
 0x507   :  { %v3319_v36 = vadd.f32 %v3318_v28, %v3109_v37  ;;  %v3320_v38 = vpop.f32.mrb[2].mxu1  ;;  %v3361_v2 = vpop.f32.mrb[6].mxu0  ;;  %v3360_v59 = vadd.f32 %v3359_v5, %v3117_v14 }
 0x508   :  { %3854 = vtanh.f32 %v3317_v13  ;;  %v3321_v23 = vpop.f32.mrb[3].mxu1  ;;  %v3362_v8 = vpop.f32.mrb[7].mxu0 }
 0x509   :  { %3856 = vtanh.f32 %v3358_v44 }
 0x50a   :  { %3858 = vtanh.f32 %v3319_v36 }
 0x50b   :  { %3860 = vtanh.f32 %v3360_v59 }
 0x512   :  { %v3855_v9 = vpop.eup %3854 }
 0x513   :  { %v3857_v47 = vpop.eup %3856  ;;  %v3417_v52 = vmul.f32 %v3855_v9, %v3404_v31 }
 0x514   :  { %v3859_v25 = vpop.eup %3858  ;;  %v3419_v50 = vmul.f32 %v3857_v47, %v3412_v42 }
 0x515   :  { %v3418_v60 = vmul.f32 %v3859_v25, %v3408_v45  ;;  %v3861_v11 = vpop.eup %3860 }
 0x516   :  { %v3420_v12 = vmul.f32 %v3861_v11, %v3416_v0 }
 0x517   :  { %v3421_v27 = vadd.f32 %v3418_v60, %v3417_v52 }
 0x519   :  { %v3422_v41 = vadd.f32 %v3421_v27, %v3419_v50 }
 0x51b   :  { %v3423_v34 = vadd.f32 %v3422_v41, %v3420_v12 }
 0x51d   :  { %3424 = vadd.xlane.f32.xlu1 %v3423_v34 }
 0x5aa   :  { %v3425_v21 = vpop.xlane.xlu1 %3424 }
 0x5ab   :  { %v3432_v43 = vadd.f32 %v3430_v4, %v3425_v21 }
 0x5ad   :  { %v3433_v17 = vsub.f32 0.0, %v3432_v43 }
 0x5af   :  { %v3434_v19 = vmul.f32 1.442695, %v3433_v17 }
 0x5b1   :  { %3862 = vpow2.f32 %v3434_v19 }
 0x5bb   :  { %v3863_v56 = vpop.eup %3862 }
 0x5bc   :  { %v3436_v63 = vadd.f32 1.0, %v3863_v56 }
 0x5be   :  { %3864 = vrcp.f32 %v3436_v63 }
 0x5c8   :  { %v3865_v54 = vpop.eup %3864 }
 0x5c9   :  { %3443 = vperm.xlu0 %3792, %v3865_v54   ;;  %v3440_v15 = vsub.f32 1.0, %v3865_v54 }
 0x5cd   :  { %3448 = vperm.xlu0 %3792, %v3440_v15  }
 0x648   :  { %v3444_v18 = vpop.permute.xlu0 %3443 }
 0x64c   :  { %v3449_v57 = vpop.permute.xlu0 %3448 }
 0x64d   :  { %v3451_v1 = vsel %vm3439_vm2, %v3444_v18, %v3449_v57 }
 0x64e   :  { %3453 = vst.msk [vmem:[%s6474_s7] sm:$0xff] %vm3452_vm3, %v3451_v1 }
 0x64f   :  { %3458 = vsyncpa [#allocation5], 1 }

</bundles_post_ra>
